<compile_context>
chip_gen: v5e
topology: v5e:2x2
jax: 0.10.0
libtpu: 0.0.40
codegen_flags: <defaults>
</compile_context>

<pallas_src>
import functools

import jax
import jax.numpy as jnp
from jax.experimental import pallas as pl
from jax.experimental.pallas import tpu as pltpu

EPS = 1e-3
TM = 256                          # row tile for both kernels (multiple of 16)
VMEM_LIMIT_BYTES = 48 * 1024 * 1024   # explicit budget (safe on v5e/v6e/v7x)


def _round_up(x, m):
    return ((x + m - 1) // m) * m


# ----------------------------------------------------------------------------
# Pallas kernel 1: submanifold 3x3x3 conv (stride 1, pad 1) + BN + ReLU + mask
#   x3_ref : (S, 3*Cin) bf16, VMEM-resident; columns = [x[r-1], x[r], x[r+1]]
#   w_ref  : (3, 3, 3*Cin, Cout) bf16 (BN scale folded in)
#   b_ref  : (1, Cout) f32 folded BN bias
#   m_ref  : (tm, 1) f32 active-voxel mask for this row tile
# For each (dz, dy) tap the needed rows are a constant, 16-aligned shift of the
# output rows; the dx taps are already folded into the 3*Cin columns.
# ----------------------------------------------------------------------------
def _subm3_kernel(x3_ref, w_ref, b_ref, m_ref, o_ref, acc_ref, *,
                  Wp, HpWp, S, tm):
    i = pl.program_id(0)
    row0 = i * tm
    acc_ref[...] = jnp.zeros_like(acc_ref)
    for dz in range(3):
        for dy in range(3):
            off = (dz - 1) * HpWp + (dy - 1) * Wp      # static, multiple of 16
            base = jnp.clip(row0 + off, 0, S - tm)     # clipped tiles are in the
            base = pl.multiple_of(base, 16)            # zero guard (mask == 0)
            lhs = x3_ref[pl.ds(base, tm), :]           # (tm, 3*Cin) bf16
            acc_ref[...] += jnp.dot(lhs, w_ref[dz, dy],
                                    preferred_element_type=jnp.float32)
    y = jnp.maximum(acc_ref[...] + b_ref[...], 0.0) * m_ref[...]
    o_ref[...] = y.astype(o_ref.dtype)


def subm_conv_layer(xf, mf, geom, w, bias, tm=TM):
    """xf: (S, Cin) bf16 guarded-flat activation, mf: (S, 1) f32 mask."""
    S = geom["S"]
    C = xf.shape[1]
    Cout = w.shape[-1]
    # Fold the three x-taps into the channel axis (one cheap bf16 copy).
    xpad = jnp.pad(xf, ((1, 1), (0, 0)))
    x3 = jnp.concatenate([xpad[:-2], xpad[1:-1], xpad[2:]], axis=1)  # (S, 3C)

    kernel = functools.partial(_subm3_kernel, Wp=geom["Wp"],
                               HpWp=geom["Hp"] * geom["Wp"], S=S, tm=tm)
    out = pl.pallas_call(
        kernel,
        out_shape=jax.ShapeDtypeStruct((S, Cout), jnp.bfloat16),
        grid_spec=pltpu.PrefetchScalarGridSpec(
            num_scalar_prefetch=0,
            grid=(S // tm,),
            in_specs=[
                pl.BlockSpec((S, 3 * C), lambda i: (0, 0)),          # resident
                pl.BlockSpec((3, 3, 3 * C, Cout), lambda i: (0, 0, 0, 0)),
                pl.BlockSpec((1, Cout), lambda i: (0, 0)),
                pl.BlockSpec((tm, 1), lambda i: (i, 0)),
            ],
            out_specs=pl.BlockSpec((tm, Cout), lambda i: (i, 0)),
            scratch_shapes=[pltpu.VMEM((tm, Cout), jnp.float32)],
        ),
        compiler_params=pltpu.CompilerParams(
            dimension_semantics=("parallel",),
            vmem_limit_bytes=VMEM_LIMIT_BYTES),
    )(x3, w, bias, mf)
    return out


# ----------------------------------------------------------------------------
# Pallas kernel 2: fused (patches @ W) + bias -> ReLU -> mask (bf16 MXU matmul)
# Used for the strided SparseConv3d layers and conv_out (small im2col).
# ----------------------------------------------------------------------------
def _matmul_bias_relu_mask_kernel(p_ref, w_ref, b_ref, m_ref, o_ref):
    acc = jnp.dot(p_ref[...], w_ref[...], preferred_element_type=jnp.float32)
    y = jnp.maximum(acc + b_ref[...], 0.0)
    o_ref[...] = (y * m_ref[...]).astype(o_ref.dtype)


def fused_conv_matmul(patches, w2d, bias, mask_col, tm=TM):
    """patches: (M, K) bf16, w2d: (K, N) bf16, bias: (1, N) f32, mask: (M, 1)."""
    M, K = patches.shape
    N = w2d.shape[1]
    Mp = _round_up(max(M, tm), tm)
    if Mp != M:
        patches = jnp.pad(patches, ((0, Mp - M), (0, 0)))
        mask_col = jnp.pad(mask_col, ((0, Mp - M), (0, 0)))
    out = pl.pallas_call(
        _matmul_bias_relu_mask_kernel,
        out_shape=jax.ShapeDtypeStruct((Mp, N), jnp.float32),
        grid_spec=pltpu.PrefetchScalarGridSpec(
            num_scalar_prefetch=0,
            grid=(Mp // tm,),
            in_specs=[
                pl.BlockSpec((tm, K), lambda i: (i, 0)),
                pl.BlockSpec((K, N), lambda i: (0, 0)),
                pl.BlockSpec((1, N), lambda i: (0, 0)),
                pl.BlockSpec((tm, 1), lambda i: (i, 0)),
            ],
            out_specs=pl.BlockSpec((tm, N), lambda i: (i, 0)),
        ),
        compiler_params=pltpu.CompilerParams(
            dimension_semantics=("parallel",),
            vmem_limit_bytes=VMEM_LIMIT_BYTES),
    )(patches, w2d, bias, mask_col)
    return out[:M]


# ----------------------------------------------------------------------------
# Guarded-flat layout helpers (built once per resolution change, not per layer)
# ----------------------------------------------------------------------------
def to_guarded_flat(x_dense, mask_dense, tm=TM):
    """(B,D,H,W,C) -> (S,C) bf16 with zero spatial padding + zero guard rows."""
    B, D, H, W, C = x_dense.shape
    Dp, Hp = D + 2, H + 2
    Wp = _round_up(W + 2, 16)           # keep all row shifts 16-aligned
    HpWp = Hp * Wp
    G = HpWp + Wp + tm                  # guard rows (multiple of 16)
    V = B * Dp * Hp * Wp
    S = _round_up(2 * G + V, tm)
    xp = jnp.pad(x_dense, ((0, 0), (1, 1), (1, 1), (1, Wp - W - 1), (0, 0)))
    mp = jnp.pad(mask_dense, ((0, 0), (1, 1), (1, 1), (1, Wp - W - 1)))
    xf = jnp.zeros((S, C), jnp.bfloat16).at[G:G + V].set(
        xp.reshape(V, C).astype(jnp.bfloat16))
    mf = jnp.zeros((S, 1), jnp.float32).at[G:G + V, 0].set(
        mp.reshape(V).astype(jnp.float32))
    geom = dict(B=B, D=D, H=H, W=W, Dp=Dp, Hp=Hp, Wp=Wp, G=G, V=V, S=S)
    return xf, mf, geom


def from_guarded_flat(xf, geom):
    B, D, H, W = geom["B"], geom["D"], geom["H"], geom["W"]
    Dp, Hp, Wp, G, V = geom["Dp"], geom["Hp"], geom["Wp"], geom["G"], geom["V"]
    xp = xf[G:G + V].reshape(B, Dp, Hp, Wp, -1)
    return xp[:, 1:1 + D, 1:1 + H, 1:1 + W, :]


# ----------------------------------------------------------------------------
# Generic sparse-conv (strided SparseConv3d / conv_out) via small im2col
# ----------------------------------------------------------------------------
def im2col(x, ksize, stride, padding):
    kd, kh, kw = ksize
    sd, sh, sw = stride
    pd, ph, pw = padding
    xp = jnp.pad(x, ((0, 0), (pd, pd), (ph, ph), (pw, pw), (0, 0)))
    B, Dp, Hp, Wp, C = xp.shape
    Do = (Dp - kd) // sd + 1
    Ho = (Hp - kh) // sh + 1
    Wo = (Wp - kw) // sw + 1
    cols = []
    for dz in range(kd):
        for dy in range(kh):
            for dx in range(kw):
                cols.append(xp[:, dz:dz + sd * Do:sd,
                               dy:dy + sh * Ho:sh,
                               dx:dx + sw * Wo:sw, :])
    patches = jnp.stack(cols, axis=-2)  # (B, Do, Ho, Wo, taps, C)
    return patches.reshape(B * Do * Ho * Wo, kd * kh * kw * C), (B, Do, Ho, Wo)


def generic_sparse_conv(x_dense, mask_dense, cfg, p, tm=TM):
    ksize, stride, padding = cfg["ksize"], cfg["stride"], cfg["padding"]
    patches, (B, Do, Ho, Wo) = im2col(x_dense, ksize, stride, padding)
    if cfg["subm"]:
        out_mask = mask_dense
    else:
        kd, kh, kw = ksize
        sd, sh, sw = stride
        pd, ph, pw = padding
        out_mask = jax.lax.reduce_window(
            mask_dense, 0.0, jax.lax.max,
            window_dimensions=(1, kd, kh, kw),
            window_strides=(1, sd, sh, sw),
            padding=((0, 0), (pd, pd), (ph, ph), (pw, pw)))
    y = fused_conv_matmul(patches, p["w"], p["bias"],
                          out_mask.reshape(-1, 1), tm=tm)
    return y.reshape(B, Do, Ho, Wo, -1).astype(jnp.bfloat16), out_mask


# ----------------------------------------------------------------------------
# Module configuration (mirrors SparseEncoder.__init__ defaults)
# ----------------------------------------------------------------------------
def _norm_pad(p):
    return tuple(p) if isinstance(p, (tuple, list)) else (p, p, p)


def build_layer_cfgs(in_channels, base_channels, output_channels,
                     encoder_channels, encoder_paddings):
    cfgs = []
    cfgs.append(dict(cin=in_channels, cout=base_channels, ksize=(3, 3, 3),
                     stride=(1, 1, 1), padding=(1, 1, 1), subm=True))
    in_ch = base_channels
    for i, blocks in enumerate(encoder_channels):
        for j, out_ch in enumerate(blocks):
            pad = _norm_pad(encoder_paddings[i][j])
            if i != 0 and j == 0:
                cfgs.append(dict(cin=in_ch, cout=out_ch, ksize=(3, 3, 3),
                                 stride=(2, 2, 2), padding=pad, subm=False))
            else:
                cfgs.append(dict(cin=in_ch, cout=out_ch, ksize=(3, 3, 3),
                                 stride=(1, 1, 1), padding=pad, subm=True))
            in_ch = out_ch
    cfgs.append(dict(cin=in_ch, cout=output_channels, ksize=(3, 1, 1),
                     stride=(2, 1, 1), padding=(0, 0, 0), subm=False))
    return cfgs


def init_params(key, cfgs):
    params = []
    for cfg in cfgs:
        key, k1, k2, k3, k4, k5 = jax.random.split(key, 6)
        kd, kh, kw = cfg["ksize"]
        cin, cout = cfg["cin"], cfg["cout"]
        fan_in = kd * kh * kw * cin
        w = jax.random.normal(k1, (kd, kh, kw, cin, cout), jnp.float32)
        w = w * jnp.sqrt(2.0 / fan_in)
        params.append(dict(
            w=w,
            gamma=1.0 + 0.1 * jax.random.normal(k2, (cout,), jnp.float32),
            beta=0.1 * jax.random.normal(k3, (cout,), jnp.float32),
            mean=0.1 * jax.random.normal(k4, (cout,), jnp.float32),
            var=1.0 + 0.1 * jax.random.uniform(k5, (cout,), jnp.float32),
        ))
    return params


def prepare_params(cfgs, params):
    """Fold eval-mode BN into the weights once; cast to bf16; reshape per path."""
    prepped = []
    for cfg, p in zip(cfgs, params):
        scale = p["gamma"] / jnp.sqrt(p["var"] + EPS)
        bias = (p["beta"] - p["mean"] * scale).reshape(1, -1).astype(jnp.float32)
        w_f = (p["w"] * scale).astype(jnp.bfloat16)   # (kd,kh,kw,Cin,Cout)
        fast = (cfg["subm"] and cfg["ksize"] == (3, 3, 3)
                and tuple(cfg["stride"]) == (1, 1, 1)
                and tuple(cfg["padding"]) == (1, 1, 1))
        if fast:
            w_store = w_f.reshape(3, 3, 3 * cfg["cin"], cfg["cout"])
        else:
            w_store = w_f.reshape(-1, cfg["cout"])
        prepped.append(dict(w=w_store, bias=bias, fast=fast))
    return prepped


# ----------------------------------------------------------------------------
# Forward pass
# ----------------------------------------------------------------------------
def sparse_encoder_forward(voxel_features, coors, batch_size, sparse_shape,
                           cfgs, prepped, tm=TM):
    """voxel_features: (N, C) f32, coors: (N, 4) int32 (batch, z, y, x)."""
    D, H, W = sparse_shape
    C = voxel_features.shape[1]
    b, z, y, x = coors[:, 0], coors[:, 1], coors[:, 2], coors[:, 3]
    x_dense = jnp.zeros((batch_size, D, H, W, C), jnp.bfloat16)
    x_dense = x_dense.at[b, z, y, x].set(voxel_features.astype(jnp.bfloat16))
    mask_dense = jnp.zeros((batch_size, D, H, W), jnp.float32)
    mask_dense = mask_dense.at[b, z, y, x].set(1.0)

    flat = None   # (xf, mf, geom) guarded-flat state for runs of subm layers
    for cfg, p in zip(cfgs, prepped):
        if p["fast"]:
            if flat is None:
                flat = to_guarded_flat(x_dense, mask_dense, tm)
            xf, mf, geom = flat
            xf = subm_conv_layer(xf, mf, geom, p["w"], p["bias"], tm)
            flat = (xf, mf, geom)
        else:
            if flat is not None:
                xf, mf, geom = flat
                x_dense = from_guarded_flat(xf, geom)
                flat = None
            x_dense, mask_dense = generic_sparse_conv(x_dense, mask_dense,
                                                      cfg, p, tm)
    if flat is not None:
        xf, mf, geom = flat
        x_dense = from_guarded_flat(xf, geom)

    # out.dense() -> (N, C, D, H, W); then .view(N, C*D, H, W)
    out = jnp.transpose(x_dense.astype(jnp.float32), (0, 4, 1, 2, 3))
    N_, C_, D_, H_, W_ = out.shape
    return out.reshape(N_, C_ * D_, H_, W_)


if __name__ == "__main__":
    # Small synthetic config consistent with the module (3 stride-2 stages +
    # conv_out with kernel 3 / stride 2 along depth require D >= 25).
    in_channels = 4
    sparse_shape = [25, 16, 16]          # (D, H, W)
    batch_size = 2
    base_channels = 16
    output_channels = 128
    encoder_channels = ((16,), (32, 32, 32), (64, 64, 64), (64, 64, 64))
    encoder_paddings = ((1,), (1, 1, 1), (1, 1, 1), ((0, 1, 1), 1, 1))
    n_voxels = 400

    cfgs = build_layer_cfgs(in_channels, base_channels, output_channels,
                            encoder_channels, encoder_paddings)

    key = jax.random.PRNGKey(0)
    kp, kf, kc = jax.random.split(key, 3)
    params = init_params(kp, cfgs)
    prepped = prepare_params(cfgs, params)

    D, H, W = sparse_shape
    total = batch_size * D * H * W
    flat_idx = jax.random.choice(kc, total, shape=(n_voxels,), replace=False)
    b = flat_idx // (D * H * W)
    rem = flat_idx % (D * H * W)
    z = rem // (H * W)
    rem2 = rem % (H * W)
    yy = rem2 // W
    xx = rem2 % W
    coors = jnp.stack([b, z, yy, xx], axis=1).astype(jnp.int32)
    voxel_features = jax.random.normal(kf, (n_voxels, in_channels), jnp.float32)

    out = sparse_encoder_forward(voxel_features, coors, batch_size,
                                 sparse_shape, cfgs, prepped)
    out = jax.block_until_ready(out)

    assert out.shape == (batch_size, output_channels * 1, 2, 2), out.shape
    assert bool(jnp.all(jnp.isfinite(out)))
    print("KERNEL_OK")
</pallas_src>

<mosaic_0001>
module attributes {stable_mosaic.version = 11 : i64} {
  func.func @_subm3_kernel(%arg0: i32, %arg1: memref<33024x12xbf16, #tpu.memory_space<vmem>>, %arg2: memref<3x3x12x16xbf16, #tpu.memory_space<vmem>>, %arg3: memref<1x16xf32, #tpu.memory_space<vmem>>, %arg4: memref<256x1xf32, #tpu.memory_space<vmem>>, %arg5: memref<256x16xbf16, #tpu.memory_space<vmem>>, %arg6: memref<256x16xf32, #tpu.memory_space<vmem>>) attributes {dimension_semantics = [#tpu.dimension_semantics<parallel>], iteration_bounds = array<i64: 129>, scalar_prefetch = 0 : i64, scratch_operands = 1 : i64, tpu.core_type = #tpu.core_type<tc>, window_params = [{pipeline_mode = #tpu.pipeline_mode<synchronous>, transform_indices = @transform_0, window_bounds = array<i64: 33024, 12>}, {pipeline_mode = #tpu.pipeline_mode<synchronous>, transform_indices = @transform_1, window_bounds = array<i64: 3, 3, 12, 16>}, {pipeline_mode = #tpu.pipeline_mode<synchronous>, transform_indices = @transform_2, window_bounds = array<i64: 1, 16>}, {transform_indices = @transform_3, window_bounds = array<i64: 256, 1>}, {transform_indices = @transform_4, window_bounds = array<i64: 256, 16>}]} {
    %c256_i32 = arith.constant 256 : i32
    %0 = arith.muli %arg0, %c256_i32 : i32
    %cst = arith.constant 0.000000e+00 : f32
    %1 = vector.broadcast %cst : f32 to vector<256x16xf32>
    %c0 = arith.constant 0 : index
    %c0_0 = arith.constant 0 : index
    %2 = vector.load %arg6[%c0, %c0_0] : memref<256x16xf32, #tpu.memory_space<vmem>>, vector<256x16xf32>
    tpu.vector_store %arg6[%c0, %c0_0], %1 {strides = array<i32>} : memref<256x16xf32, #tpu.memory_space<vmem>>, vector<256x16xf32>,
    %c-608_i32 = arith.constant -608 : i32
    %3 = arith.addi %0, %c-608_i32 : i32
    %c0_i32 = arith.constant 0 : i32
    %c32768_i32 = arith.constant 32768 : i32
    %4 = arith.maxsi %c0_i32, %3 : i32
    %5 = arith.minsi %c32768_i32, %4 : i32
    %6 = tpu.assume_multiple %5, 16 : i32
    %7 = arith.index_cast %6 : i32 to index
    %c0_1 = arith.constant 0 : index
    %8 = vector.load %arg1[%7, %c0_1] : memref<33024x12xbf16, #tpu.memory_space<vmem>>, vector<256x12xbf16>
    %c0_2 = arith.constant 0 : index
    %c0_3 = arith.constant 0 : index
    %9 = vector.load %arg6[%c0_2, %c0_3] : memref<256x16xf32, #tpu.memory_space<vmem>>, vector<256x16xf32>
    %c0_4 = arith.constant 0 : index
    %c0_5 = arith.constant 0 : index
    %c0_6 = arith.constant 0 : index
    %c0_7 = arith.constant 0 : index
    %10 = vector.load %arg2[%c0_4, %c0_5, %c0_6, %c0_7] : memref<3x3x12x16xbf16, #tpu.memory_space<vmem>>, vector<1x1x12x16xbf16>
    %11 = vector.shape_cast %10 : vector<1x1x12x16xbf16> to vector<12x16xbf16>
    %cst_8 = arith.constant dense<0.000000e+00> : vector<256x16xf32>
    %12 = tpu.matmul %8, %11, %cst_8 {dimension_numbers = #tpu.dot_dimension_numbers<[1], [0], [0], [1], [0, 0, 1, 1], [], []>} : vector<256x12xbf16>, vector<12x16xbf16>, vector<256x16xf32> -> vector<256x16xf32>
    %13 = arith.addf %9, %12 : vector<256x16xf32>
    %c0_9 = arith.constant 0 : index
    %c0_10 = arith.constant 0 : index
    %14 = vector.load %arg6[%c0_9, %c0_10] : memref<256x16xf32, #tpu.memory_space<vmem>>, vector<256x16xf32>
    tpu.vector_store %arg6[%c0_9, %c0_10], %13 {strides = array<i32>} : memref<256x16xf32, #tpu.memory_space<vmem>>, vector<256x16xf32>,
    %c-576_i32 = arith.constant -576 : i32
    %15 = arith.addi %0, %c-576_i32 : i32
    %c0_i32_11 = arith.constant 0 : i32
    %c32768_i32_12 = arith.constant 32768 : i32
    %16 = arith.maxsi %c0_i32_11, %15 : i32
    %17 = arith.minsi %c32768_i32_12, %16 : i32
    %18 = tpu.assume_multiple %17, 16 : i32
    %19 = arith.index_cast %18 : i32 to index
    %c0_13 = arith.constant 0 : index
    %20 = vector.load %arg1[%19, %c0_13] : memref<33024x12xbf16, #tpu.memory_space<vmem>>, vector<256x12xbf16>
    %c0_14 = arith.constant 0 : index
    %c0_15 = arith.constant 0 : index
    %21 = vector.load %arg6[%c0_14, %c0_15] : memref<256x16xf32, #tpu.memory_space<vmem>>, vector<256x16xf32>
    %c0_16 = arith.constant 0 : index
    %c1 = arith.constant 1 : index
    %c0_17 = arith.constant 0 : index
    %c0_18 = arith.constant 0 : index
    %22 = vector.load %arg2[%c0_16, %c1, %c0_17, %c0_18] : memref<3x3x12x16xbf16, #tpu.memory_space<vmem>>, vector<1x1x12x16xbf16>
    %23 = vector.shape_cast %22 : vector<1x1x12x16xbf16> to vector<12x16xbf16>
    %cst_19 = arith.constant dense<0.000000e+00> : vector<256x16xf32>
    %24 = tpu.matmul %20, %23, %cst_19 {dimension_numbers = #tpu.dot_dimension_numbers<[1], [0], [0], [1], [0, 0, 1, 1], [], []>} : vector<256x12xbf16>, vector<12x16xbf16>, vector<256x16xf32> -> vector<256x16xf32>
    %25 = arith.addf %21, %24 : vector<256x16xf32>
    %c0_20 = arith.constant 0 : index
    %c0_21 = arith.constant 0 : index
    %26 = vector.load %arg6[%c0_20, %c0_21] : memref<256x16xf32, #tpu.memory_space<vmem>>, vector<256x16xf32>
    tpu.vector_store %arg6[%c0_20, %c0_21], %25 {strides = array<i32>} : memref<256x16xf32, #tpu.memory_space<vmem>>, vector<256x16xf32>,
    %c-544_i32 = arith.constant -544 : i32
    %27 = arith.addi %0, %c-544_i32 : i32
    %c0_i32_22 = arith.constant 0 : i32
    %c32768_i32_23 = arith.constant 32768 : i32
    %28 = arith.maxsi %c0_i32_22, %27 : i32
    %29 = arith.minsi %c32768_i32_23, %28 : i32
    %30 = tpu.assume_multiple %29, 16 : i32
    %31 = arith.index_cast %30 : i32 to index
    %c0_24 = arith.constant 0 : index
    %32 = vector.load %arg1[%31, %c0_24] : memref<33024x12xbf16, #tpu.memory_space<vmem>>, vector<256x12xbf16>
    %c0_25 = arith.constant 0 : index
    %c0_26 = arith.constant 0 : index
    %33 = vector.load %arg6[%c0_25, %c0_26] : memref<256x16xf32, #tpu.memory_space<vmem>>, vector<256x16xf32>
    %c0_27 = arith.constant 0 : index
    %c2 = arith.constant 2 : index
    %c0_28 = arith.constant 0 : index
    %c0_29 = arith.constant 0 : index
    %34 = vector.load %arg2[%c0_27, %c2, %c0_28, %c0_29] : memref<3x3x12x16xbf16, #tpu.memory_space<vmem>>, vector<1x1x12x16xbf16>
    %35 = vector.shape_cast %34 : vector<1x1x12x16xbf16> to vector<12x16xbf16>
    %cst_30 = arith.constant dense<0.000000e+00> : vector<256x16xf32>
    %36 = tpu.matmul %32, %35, %cst_30 {dimension_numbers = #tpu.dot_dimension_numbers<[1], [0], [0], [1], [0, 0, 1, 1], [], []>} : vector<256x12xbf16>, vector<12x16xbf16>, vector<256x16xf32> -> vector<256x16xf32>
    %37 = arith.addf %33, %36 : vector<256x16xf32>
    %c0_31 = arith.constant 0 : index
    %c0_32 = arith.constant 0 : index
    %38 = vector.load %arg6[%c0_31, %c0_32] : memref<256x16xf32, #tpu.memory_space<vmem>>, vector<256x16xf32>
    tpu.vector_store %arg6[%c0_31, %c0_32], %37 {strides = array<i32>} : memref<256x16xf32, #tpu.memory_space<vmem>>, vector<256x16xf32>,
    %c-32_i32 = arith.constant -32 : i32
    %39 = arith.addi %0, %c-32_i32 : i32
    %c0_i32_33 = arith.constant 0 : i32
    %c32768_i32_34 = arith.constant 32768 : i32
    %40 = arith.maxsi %c0_i32_33, %39 : i32
    %41 = arith.minsi %c32768_i32_34, %40 : i32
    %42 = tpu.assume_multiple %41, 16 : i32
    %43 = arith.index_cast %42 : i32 to index
    %c0_35 = arith.constant 0 : index
    %44 = vector.load %arg1[%43, %c0_35] : memref<33024x12xbf16, #tpu.memory_space<vmem>>, vector<256x12xbf16>
    %c0_36 = arith.constant 0 : index
    %c0_37 = arith.constant 0 : index
    %45 = vector.load %arg6[%c0_36, %c0_37] : memref<256x16xf32, #tpu.memory_space<vmem>>, vector<256x16xf32>
    %c1_38 = arith.constant 1 : index
    %c0_39 = arith.constant 0 : index
    %c0_40 = arith.constant 0 : index
    %c0_41 = arith.constant 0 : index
    %46 = vector.load %arg2[%c1_38, %c0_39, %c0_40, %c0_41] : memref<3x3x12x16xbf16, #tpu.memory_space<vmem>>, vector<1x1x12x16xbf16>
    %47 = vector.shape_cast %46 : vector<1x1x12x16xbf16> to vector<12x16xbf16>
    %cst_42 = arith.constant dense<0.000000e+00> : vector<256x16xf32>
    %48 = tpu.matmul %44, %47, %cst_42 {dimension_numbers = #tpu.dot_dimension_numbers<[1], [0], [0], [1], [0, 0, 1, 1], [], []>} : vector<256x12xbf16>, vector<12x16xbf16>, vector<256x16xf32> -> vector<256x16xf32>
    %49 = arith.addf %45, %48 : vector<256x16xf32>
    %c0_43 = arith.constant 0 : index
    %c0_44 = arith.constant 0 : index
    %50 = vector.load %arg6[%c0_43, %c0_44] : memref<256x16xf32, #tpu.memory_space<vmem>>, vector<256x16xf32>
    tpu.vector_store %arg6[%c0_43, %c0_44], %49 {strides = array<i32>} : memref<256x16xf32, #tpu.memory_space<vmem>>, vector<256x16xf32>,
    %c0_i32_45 = arith.constant 0 : i32
    %51 = arith.addi %0, %c0_i32_45 : i32
    %c0_i32_46 = arith.constant 0 : i32
    %c32768_i32_47 = arith.constant 32768 : i32
    %52 = arith.maxsi %c0_i32_46, %51 : i32
    %53 = arith.minsi %c32768_i32_47, %52 : i32
    %54 = tpu.assume_multiple %53, 16 : i32
    %55 = arith.index_cast %54 : i32 to index
    %c0_48 = arith.constant 0 : index
    %56 = vector.load %arg1[%55, %c0_48] : memref<33024x12xbf16, #tpu.memory_space<vmem>>, vector<256x12xbf16>
    %c0_49 = arith.constant 0 : index
    %c0_50 = arith.constant 0 : index
    %57 = vector.load %arg6[%c0_49, %c0_50] : memref<256x16xf32, #tpu.memory_space<vmem>>, vector<256x16xf32>
    %c1_51 = arith.constant 1 : index
    %c1_52 = arith.constant 1 : index
    %c0_53 = arith.constant 0 : index
    %c0_54 = arith.constant 0 : index
    %58 = vector.load %arg2[%c1_51, %c1_52, %c0_53, %c0_54] : memref<3x3x12x16xbf16, #tpu.memory_space<vmem>>, vector<1x1x12x16xbf16>
    %59 = vector.shape_cast %58 : vector<1x1x12x16xbf16> to vector<12x16xbf16>
    %cst_55 = arith.constant dense<0.000000e+00> : vector<256x16xf32>
    %60 = tpu.matmul %56, %59, %cst_55 {dimension_numbers = #tpu.dot_dimension_numbers<[1], [0], [0], [1], [0, 0, 1, 1], [], []>} : vector<256x12xbf16>, vector<12x16xbf16>, vector<256x16xf32> -> vector<256x16xf32>
    %61 = arith.addf %57, %60 : vector<256x16xf32>
    %c0_56 = arith.constant 0 : index
    %c0_57 = arith.constant 0 : index
    %62 = vector.load %arg6[%c0_56, %c0_57] : memref<256x16xf32, #tpu.memory_space<vmem>>, vector<256x16xf32>
    tpu.vector_store %arg6[%c0_56, %c0_57], %61 {strides = array<i32>} : memref<256x16xf32, #tpu.memory_space<vmem>>, vector<256x16xf32>,
    %c32_i32 = arith.constant 32 : i32
    %63 = arith.addi %0, %c32_i32 : i32
    %c0_i32_58 = arith.constant 0 : i32
    %c32768_i32_59 = arith.constant 32768 : i32
    %64 = arith.maxsi %c0_i32_58, %63 : i32
    %65 = arith.minsi %c32768_i32_59, %64 : i32
    %66 = tpu.assume_multiple %65, 16 : i32
    %67 = arith.index_cast %66 : i32 to index
    %c0_60 = arith.constant 0 : index
    %68 = vector.load %arg1[%67, %c0_60] : memref<33024x12xbf16, #tpu.memory_space<vmem>>, vector<256x12xbf16>
    %c0_61 = arith.constant 0 : index
    %c0_62 = arith.constant 0 : index
    %69 = vector.load %arg6[%c0_61, %c0_62] : memref<256x16xf32, #tpu.memory_space<vmem>>, vector<256x16xf32>
    %c1_63 = arith.constant 1 : index
    %c2_64 = arith.constant 2 : index
    %c0_65 = arith.constant 0 : index
    %c0_66 = arith.constant 0 : index
    %70 = vector.load %arg2[%c1_63, %c2_64, %c0_65, %c0_66] : memref<3x3x12x16xbf16, #tpu.memory_space<vmem>>, vector<1x1x12x16xbf16>
    %71 = vector.shape_cast %70 : vector<1x1x12x16xbf16> to vector<12x16xbf16>
    %cst_67 = arith.constant dense<0.000000e+00> : vector<256x16xf32>
    %72 = tpu.matmul %68, %71, %cst_67 {dimension_numbers = #tpu.dot_dimension_numbers<[1], [0], [0], [1], [0, 0, 1, 1], [], []>} : vector<256x12xbf16>, vector<12x16xbf16>, vector<256x16xf32> -> vector<256x16xf32>
    %73 = arith.addf %69, %72 : vector<256x16xf32>
    %c0_68 = arith.constant 0 : index
    %c0_69 = arith.constant 0 : index
    %74 = vector.load %arg6[%c0_68, %c0_69] : memref<256x16xf32, #tpu.memory_space<vmem>>, vector<256x16xf32>
    tpu.vector_store %arg6[%c0_68, %c0_69], %73 {strides = array<i32>} : memref<256x16xf32, #tpu.memory_space<vmem>>, vector<256x16xf32>,
    %c544_i32 = arith.constant 544 : i32
    %75 = arith.addi %0, %c544_i32 : i32
    %c0_i32_70 = arith.constant 0 : i32
    %c32768_i32_71 = arith.constant 32768 : i32
    %76 = arith.maxsi %c0_i32_70, %75 : i32
    %77 = arith.minsi %c32768_i32_71, %76 : i32
    %78 = tpu.assume_multiple %77, 16 : i32
    %79 = arith.index_cast %78 : i32 to index
    %c0_72 = arith.constant 0 : index
    %80 = vector.load %arg1[%79, %c0_72] : memref<33024x12xbf16, #tpu.memory_space<vmem>>, vector<256x12xbf16>
    %c0_73 = arith.constant 0 : index
    %c0_74 = arith.constant 0 : index
    %81 = vector.load %arg6[%c0_73, %c0_74] : memref<256x16xf32, #tpu.memory_space<vmem>>, vector<256x16xf32>
    %c2_75 = arith.constant 2 : index
    %c0_76 = arith.constant 0 : index
    %c0_77 = arith.constant 0 : index
    %c0_78 = arith.constant 0 : index
    %82 = vector.load %arg2[%c2_75, %c0_76, %c0_77, %c0_78] : memref<3x3x12x16xbf16, #tpu.memory_space<vmem>>, vector<1x1x12x16xbf16>
    %83 = vector.shape_cast %82 : vector<1x1x12x16xbf16> to vector<12x16xbf16>
    %cst_79 = arith.constant dense<0.000000e+00> : vector<256x16xf32>
    %84 = tpu.matmul %80, %83, %cst_79 {dimension_numbers = #tpu.dot_dimension_numbers<[1], [0], [0], [1], [0, 0, 1, 1], [], []>} : vector<256x12xbf16>, vector<12x16xbf16>, vector<256x16xf32> -> vector<256x16xf32>
    %85 = arith.addf %81, %84 : vector<256x16xf32>
    %c0_80 = arith.constant 0 : index
    %c0_81 = arith.constant 0 : index
    %86 = vector.load %arg6[%c0_80, %c0_81] : memref<256x16xf32, #tpu.memory_space<vmem>>, vector<256x16xf32>
    tpu.vector_store %arg6[%c0_80, %c0_81], %85 {strides = array<i32>} : memref<256x16xf32, #tpu.memory_space<vmem>>, vector<256x16xf32>,
    %c576_i32 = arith.constant 576 : i32
    %87 = arith.addi %0, %c576_i32 : i32
    %c0_i32_82 = arith.constant 0 : i32
    %c32768_i32_83 = arith.constant 32768 : i32
    %88 = arith.maxsi %c0_i32_82, %87 : i32
    %89 = arith.minsi %c32768_i32_83, %88 : i32
    %90 = tpu.assume_multiple %89, 16 : i32
    %91 = arith.index_cast %90 : i32 to index
    %c0_84 = arith.constant 0 : index
    %92 = vector.load %arg1[%91, %c0_84] : memref<33024x12xbf16, #tpu.memory_space<vmem>>, vector<256x12xbf16>
    %c0_85 = arith.constant 0 : index
    %c0_86 = arith.constant 0 : index
    %93 = vector.load %arg6[%c0_85, %c0_86] : memref<256x16xf32, #tpu.memory_space<vmem>>, vector<256x16xf32>
    %c2_87 = arith.constant 2 : index
    %c1_88 = arith.constant 1 : index
    %c0_89 = arith.constant 0 : index
    %c0_90 = arith.constant 0 : index
    %94 = vector.load %arg2[%c2_87, %c1_88, %c0_89, %c0_90] : memref<3x3x12x16xbf16, #tpu.memory_space<vmem>>, vector<1x1x12x16xbf16>
    %95 = vector.shape_cast %94 : vector<1x1x12x16xbf16> to vector<12x16xbf16>
    %cst_91 = arith.constant dense<0.000000e+00> : vector<256x16xf32>
    %96 = tpu.matmul %92, %95, %cst_91 {dimension_numbers = #tpu.dot_dimension_numbers<[1], [0], [0], [1], [0, 0, 1, 1], [], []>} : vector<256x12xbf16>, vector<12x16xbf16>, vector<256x16xf32> -> vector<256x16xf32>
    %97 = arith.addf %93, %96 : vector<256x16xf32>
    %c0_92 = arith.constant 0 : index
    %c0_93 = arith.constant 0 : index
    %98 = vector.load %arg6[%c0_92, %c0_93] : memref<256x16xf32, #tpu.memory_space<vmem>>, vector<256x16xf32>
    tpu.vector_store %arg6[%c0_92, %c0_93], %97 {strides = array<i32>} : memref<256x16xf32, #tpu.memory_space<vmem>>, vector<256x16xf32>,
    %c608_i32 = arith.constant 608 : i32
    %99 = arith.addi %0, %c608_i32 : i32
    %c0_i32_94 = arith.constant 0 : i32
    %c32768_i32_95 = arith.constant 32768 : i32
    %100 = arith.maxsi %c0_i32_94, %99 : i32
    %101 = arith.minsi %c32768_i32_95, %100 : i32
    %102 = tpu.assume_multiple %101, 16 : i32
    %103 = arith.index_cast %102 : i32 to index
    %c0_96 = arith.constant 0 : index
    %104 = vector.load %arg1[%103, %c0_96] : memref<33024x12xbf16, #tpu.memory_space<vmem>>, vector<256x12xbf16>
    %c0_97 = arith.constant 0 : index
    %c0_98 = arith.constant 0 : index
    %105 = vector.load %arg6[%c0_97, %c0_98] : memref<256x16xf32, #tpu.memory_space<vmem>>, vector<256x16xf32>
    %c2_99 = arith.constant 2 : index
    %c2_100 = arith.constant 2 : index
    %c0_101 = arith.constant 0 : index
    %c0_102 = arith.constant 0 : index
    %106 = vector.load %arg2[%c2_99, %c2_100, %c0_101, %c0_102] : memref<3x3x12x16xbf16, #tpu.memory_space<vmem>>, vector<1x1x12x16xbf16>
    %107 = vector.shape_cast %106 : vector<1x1x12x16xbf16> to vector<12x16xbf16>
    %cst_103 = arith.constant dense<0.000000e+00> : vector<256x16xf32>
    %108 = tpu.matmul %104, %107, %cst_103 {dimension_numbers = #tpu.dot_dimension_numbers<[1], [0], [0], [1], [0, 0, 1, 1], [], []>} : vector<256x12xbf16>, vector<12x16xbf16>, vector<256x16xf32> -> vector<256x16xf32>
    %109 = arith.addf %105, %108 : vector<256x16xf32>
    %c0_104 = arith.constant 0 : index
    %c0_105 = arith.constant 0 : index
    %110 = vector.load %arg6[%c0_104, %c0_105] : memref<256x16xf32, #tpu.memory_space<vmem>>, vector<256x16xf32>
    tpu.vector_store %arg6[%c0_104, %c0_105], %109 {strides = array<i32>} : memref<256x16xf32, #tpu.memory_space<vmem>>, vector<256x16xf32>,
    %c0_106 = arith.constant 0 : index
    %c0_107 = arith.constant 0 : index
    %111 = vector.load %arg6[%c0_106, %c0_107] : memref<256x16xf32, #tpu.memory_space<vmem>>, vector<256x16xf32>
    %c0_108 = arith.constant 0 : index
    %c0_109 = arith.constant 0 : index
    %112 = vector.load %arg3[%c0_108, %c0_109] : memref<1x16xf32, #tpu.memory_space<vmem>>, vector<1x16xf32>
    %113 = vector.broadcast %112 : vector<1x16xf32> to vector<256x16xf32>
    %114 = arith.addf %111, %113 : vector<256x16xf32>
    %cst_110 = arith.constant 0.000000e+00 : f32
    %115 = vector.broadcast %cst_110 : f32 to vector<256x16xf32>
    %116 = arith.maximumf %114, %115 : vector<256x16xf32>
    %c0_111 = arith.constant 0 : index
    %c0_112 = arith.constant 0 : index
    %117 = vector.load %arg4[%c0_111, %c0_112] : memref<256x1xf32, #tpu.memory_space<vmem>>, vector<256x1xf32>
    %118 = vector.broadcast %117 : vector<256x1xf32> to vector<256x16xf32>
    %119 = arith.mulf %116, %118 : vector<256x16xf32>
    %120 = arith.truncf %119 : vector<256x16xf32> to vector<256x16xbf16>
    %c0_113 = arith.constant 0 : index
    %c0_114 = arith.constant 0 : index
    %121 = vector.load %arg5[%c0_113, %c0_114] : memref<256x16xbf16, #tpu.memory_space<vmem>>, vector<256x16xbf16>
    tpu.vector_store %arg5[%c0_113, %c0_114], %120 {strides = array<i32>} : memref<256x16xbf16, #tpu.memory_space<vmem>>, vector<256x16xbf16>,
    return
  }
  func.func @transform_0(%arg0: i32) -> (i32, i32) {
    %c0_i32 = arith.constant 0 : i32
    %c0_i32_0 = arith.constant 0 : i32
    %c0_i32_1 = arith.constant 0 : i32
    return %c0_i32, %c0_i32_0 : i32, i32
  }
  func.func @transform_1(%arg0: i32) -> (i32, i32, i32, i32) {
    %c0_i32 = arith.constant 0 : i32
    %c0_i32_0 = arith.constant 0 : i32
    %c0_i32_1 = arith.constant 0 : i32
    %c0_i32_2 = arith.constant 0 : i32
    %c0_i32_3 = arith.constant 0 : i32
    return %c0_i32, %c0_i32_0, %c0_i32_1, %c0_i32_2 : i32, i32, i32, i32
  }
  func.func @transform_2(%arg0: i32) -> (i32, i32) {
    %c0_i32 = arith.constant 0 : i32
    %c0_i32_0 = arith.constant 0 : i32
    %c0_i32_1 = arith.constant 0 : i32
    return %c0_i32, %c0_i32_0 : i32, i32
  }
  func.func @transform_3(%arg0: i32) -> (i32, i32) {
    %c0_i32 = arith.constant 0 : i32
    %c0_i32_0 = arith.constant 0 : i32
    return %arg0, %c0_i32 : i32, i32
  }
  func.func @transform_4(%arg0: i32) -> (i32, i32) {
    %c0_i32 = arith.constant 0 : i32
    %c0_i32_0 = arith.constant 0 : i32
    return %arg0, %c0_i32 : i32, i32
  }
}

</mosaic_0001>

<bundles_post_ra>
// kernel: tpu_custom_call.1
= control target key start
LH: loop header
LB: loop body
LE: loop exit
PB: predicated region body
PF: predicated region fallthrough
CT: control target
= control target key end

     0   :  { %s5046_s15 = smov 0   ;;  %s6146_s0 = inlined_call_operand.vmem [shape: bf16[33024,12], index: 0, kind: input, shape index: {}]   ;;  %s6147_s1 = inlined_call_operand.vmem [shape: bf16[3,3,12,16], index: 1, kind: input, shape index: {}]   ;;  %s6148_s2 = inlined_call_operand.vmem [shape: f32[1,16], index: 2, kind: input, shape index: {}]   ;;  %s6149_s3 = inlined_call_operand.vmem [shape: f32[33024,1], index: 3, kind: input, shape index: {}]   ;;  %s6150_s4 = inlined_call_operand.vmem [shape: bf16[33024,16], index: 4, kind: output, shape index: {}]  }
   0x1 LB: > { %s3984_s16 = sadd.s32 4294967295, %s5017_s15   ;;  %p3988_p0 = scmp.ge.s32.totalorder %s5017_s15, 1  ;;  %s5017_s15 = sphi %s5046_s15, %s14_s15  }
   0x2   : > { %p163_p1 = scmp.lt.s32.totalorder %s5017_s15, 130 }
   0x4   : > { %p164_p2 = pnand %p3988_p0, %p163_p1 }
   0x5   : > { %s5062_s21 = sshll.u32 (!%p164_p2), %s3984_s16, 8 }
   0x6   : > { %167 = sbr.rel (%p164_p2) target bundleno = 764 (0x2fc), region = 36  ;;  %s236_s22 = sadd.s32 (!%p164_p2), 4294966688, %s5062_s21 }
   0x7   : > { %p237_p3 = scmp.gt.s32.totalorder (!%p164_p2), %s236_s22, 0  ;;  %p3994_p4 = scmp.lt.s32.totalorder (!%p164_p2), %s236_s22, 32768 }
   0x8   : > { %s5140_s5 = sadd.s32 (!%p164_p2), 4294966752, %s5062_s21  ;;  %s1332_s10 = sadd.s32 (!%p164_p2), 4294967264, %s5062_s21 }
   0x9   : > { %p968_p6 = scmp.gt.s32.totalorder (!%p164_p2), %s5140_s5, 0  ;;  %p1333_p8 = scmp.gt.s32.totalorder (!%p164_p2), %s1332_s10, 0 }
   0xa   : > { %p4176_p9 = scmp.lt.s32.totalorder (!%p164_p2), %s5140_s5, 32768  ;;  %p1697_p10 = scmp.gt.s32.totalorder (!%p164_p2), %s5062_s21, 0 }
   0xb   : > { %v4066_v0 = vld [vmem:[%s6147_s1] sm:$0xf]  ;;  %v4840_v1 = vld [vmem:[%s6147_s1] sm:$0x30]  ;;  %vm445_vm0 = vcmask 1045504   ;;  %s238_s9 = scalar_select %p237_p3, %s236_s22, 0 }
   0xc   : > { %v4067_v2 = vor.u32 %v4840_v1, %v4066_v0  ;;  %v4158_v3 = vld [vmem:[%s6147_s1 + $0x8] sm:$0xf]  ;;  %v4859_v4 = vld [vmem:[%s6147_s1 + $0x8] sm:$0x30]  ;;  %v4250_v6 = vld [vmem:[%s6147_s1 + $0x10] sm:$0xf] }
   0xd   : > { %v4159_v5 = vor.u32 %v4859_v4, %v4158_v3  ;;  %v4878_v7 = vld [vmem:[%s6147_s1 + $0x10] sm:$0x30]  ;;  %v4342_v10 = vld [vmem:[%s6147_s1 + $0x18] sm:$0xf]  ;;  %v4897_v11 = vld [vmem:[%s6147_s1 + $0x18] sm:$0x30] }
   0xe   : > { %v447_v8 = vsel %vm445_vm0, %v4067_v2, 0  ;;  %v4251_v9 = vor.u32 %v4878_v7, %v4250_v6  ;;  %v4343_v13 = vor.u32 %v4897_v11, %v4342_v10  ;;  %v4434_v14 = vld [vmem:[%s6147_s1 + $0x20] sm:$0xf]  ;;  %v4916_v15 = vld [vmem:[%s6147_s1 + $0x20] sm:$0x30]  ;;  %s6152_s9 = smov (!%p3994_p4, %s238_s9), 32768 }
   0xf   : > { %4993 = vmatpush.bf16.msra.mxu1 %v447_v8  ;;  %4994 = vmatpush.bf16.msra.mxu2 %v447_v8  ;;  %v812_v12 = vsel %vm445_vm0, %v4159_v5, 0  ;;  %v4435_v17 = vor.u32 %v4916_v15, %v4434_v14  ;;  %s241_s14 = sshra.s32 %s6152_s9, 3  ;;  %vm396_vm1 = vcmask 97280   ;;  %s5121_s22 = sadd.s32 4294966720, %s5062_s21  ;;  %v4526_v32 = vld [vmem:[%s6147_s1 + $0x28] sm:$0xf] }
  0x10   : > { %4995 = vmatpush.bf16.msra.mxu3 %v447_v8  ;;  %v1177_v16 = vsel %vm445_vm0, %v4251_v9, 0  ;;  %v1542_v18 = vsel %vm445_vm0, %v4343_v13, 0  ;;  %456 = vmatpush.bf16.msra.mxu0 %v447_v8  ;;  %s3999_s17 = sshll.u32 %s241_s14, 2  ;;  %v4935_v33 = vld [vmem:[%s6147_s1 + $0x28] sm:$0x30]  ;;  %p603_p5 = scmp.gt.s32.totalorder %s5121_s22, 0 }
  0x11   : > { %v1906_v19 = vsel %vm445_vm0, %v4435_v17, 0  ;;  %s5098_s20 = scalar_lea.vmem %s6146_s0, %s3999_s17  ;;  %v4618_v34 = vld [vmem:[%s6147_s1 + $0x30] sm:$0xf]  ;;  %v4527_v35 = vor.u32 %v4935_v33, %v4526_v32  ;;  %v4954_v36 = vld [vmem:[%s6147_s1 + $0x30] sm:$0x30]  ;;  %p4084_p7 = scmp.lt.s32.totalorder %s5121_s22, 32768 }
  0x12   : > { %v4828_v20 = vld [vmem:[%s5098_s20 + $0x20] sm:$0xff]  ;;  %v4829_v24 = vld [vmem:[%s5098_s20 + $0x28] sm:$0xff]  ;;  %v4830_v28 = vld [vmem:[%s5098_s20 + $0x30] sm:$0xff]  ;;  %v4619_v37 = vor.u32 %v4954_v36, %v4618_v34  ;;  %s604_s11 = scalar_select %p603_p5, %s5121_s22, 0  ;;  %vm203_vm2 = vcmask 130048   ;;  %v5019_v60 = vmov 0.0  }
  0x13   : > { %821 = vmatpush.bf16.msrb.mxu1 %v812_v12  ;;  %1186 = vmatpush.bf16.msrb.mxu2 %v1177_v16  ;;  %v4832_v21 = vld [vmem:[%s5098_s20 + $0x40] sm:$0xff]  ;;  %v4833_v25 = vld [vmem:[%s5098_s20 + $0x48] sm:$0xff]  ;;  %v4834_v29 = vld [vmem:[%s5098_s20 + $0x50] sm:$0xff]  ;;  %v2271_v40 = vsel %vm445_vm0, %v4527_v35, 0  ;;  %s6154_s5 = smov (!%p968_p6, %s5140_s5), 0  ;;  %p4268_p11 = scmp.lt.s32.totalorder %s1332_s10, 32768 }
  0x14   : > { %1551 = vmatpush.bf16.msrb.mxu3 %v1542_v18  ;;  %1915 = vmatpush.bf16.msrb.mxu0 %v1906_v19  ;;  %v4836_v22 = vld [vmem:[%s5098_s20 + $0x60] sm:$0xff]  ;;  %v4837_v26 = vld [vmem:[%s5098_s20 + $0x68] sm:$0xff]  ;;  %v4838_v30 = vld [vmem:[%s5098_s20 + $0x70] sm:$0xff]  ;;  %v2636_v42 = vsel %vm445_vm0, %v4619_v37, 0  ;;  %s1334_s12 = scalar_select %p1333_p8, %s1332_s10, 0  ;;  %212 = vst.msk [vmem:[#allocation2 + $0x40] sm:$0xff] %vm203_vm2, %v5019_v60 }
  0x15   : > { %v4824_v23 = vld [vmem:[%s5098_s20] sm:$0xff]  ;;  %4072 = vmatmul.msk.bf16.vlgmr.msra.gmra.mxu1 %vm396_vm1, %v4828_v20  ;;  %4076 = vmatmul.msk.bf16.vlgmr.msra.gmra.mxu2 %vm396_vm1, %v4832_v21  ;;  %v4825_v27 = vld [vmem:[%s5098_s20 + $0x8] sm:$0xff]  ;;  %v4826_v31 = vld [vmem:[%s5098_s20 + $0x10] sm:$0xff]  ;;  %p4360_p12 = scmp.lt.s32.totalorder %s5062_s21, 32768  ;;  %s6156_s11 = smov (!%p4084_p7, %s604_s11), 32768  ;;  %204 = vst.msk [vmem:[#allocation2] sm:$0xff] %vm203_vm2, %v5019_v60 }
  0x16   : > { %4080 = vmatmul.msk.bf16.vlgmr.msra.gmra.mxu3 %vm396_vm1, %v4836_v22  ;;  %4068 = vmatmul.msk.bf16.vlgmr.msra.gmra.mxu0 %vm396_vm1, %v4824_v23  ;;  %v4710_v38 = vld [vmem:[%s6147_s1 + $0x38] sm:$0xf]  ;;  %v4973_v39 = vld [vmem:[%s6147_s1 + $0x38] sm:$0x30]  ;;  %s1698_s13 = scalar_select %p1697_p10, %s5062_s21, 0  ;;  %205 = vst.msk [vmem:[#allocation2 + $0x8] sm:$0xff] %vm203_vm2, %v5019_v60 }
  0x17   : > { %v4711_v41 = vor.u32 %v4973_v39, %v4710_v38  ;;  %2280 = vmatpush.bf16.msra.mxu1 %v2271_v40  ;;  %2645 = vmatpush.bf16.msra.mxu2 %v2636_v42  ;;  %v4831_v44 = vld [vmem:[%s5098_s20 + $0x38] sm:$0xff]  ;;  %s6158_s5 = smov (!%p4176_p9, %s6154_s5), 32768  ;;  %s6160_s12 = smov (!%p4268_p11, %s1334_s12), 32768  ;;  %v4802_v48 = vld [vmem:[%s6147_s1 + $0x40] sm:$0xf]  ;;  %206 = vst.msk [vmem:[#allocation2 + $0x10] sm:$0xff] %vm203_vm2, %v5019_v60 }
  0x18   : > { %v4835_v45 = vld [vmem:[%s5098_s20 + $0x58] sm:$0xff]  ;;  %s6162_s13 = smov (!%p4360_p12, %s1698_s13), 32768  ;;  %v4992_v49 = vld [vmem:[%s6147_s1 + $0x40] sm:$0x30]  ;;  %s972_s22 = sshra.s32 %s6158_s5, 3  ;;  %207 = vst.msk [vmem:[#allocation2 + $0x18] sm:$0xff] %vm203_vm2, %v5019_v60 }
  0x19   : > { %v3001_v43 = vsel %vm445_vm0, %v4711_v41, 0  ;;  %v4839_v46 = vld [vmem:[%s5098_s20 + $0x78] sm:$0xff]  ;;  %v4803_v50 = vor.u32 %v4992_v49, %v4802_v48  ;;  %s1337_s23 = sshra.s32 %s6160_s12, 3  ;;  %s1701_s24 = sshra.s32 %s6162_s13, 3  ;;  %208 = vst.msk [vmem:[#allocation2 + $0x20] sm:$0xff] %vm203_vm2, %v5019_v60  ;;  %vm3877_vm3 = vcmask 125952  }
  0x1a   : > { %3010 = vmatpush.bf16.msra.mxu3 %v3001_v43  ;;  %v4827_v47 = vld [vmem:[%s5098_s20 + $0x18] sm:$0xff]  ;;  %s607_s20 = sshra.s32 %s6156_s11, 3  ;;  %s4181_s26 = sshll.u32 %s972_s22, 2  ;;  %209 = vst.msk [vmem:[#allocation2 + $0x28] sm:$0xff] %vm203_vm2, %v5019_v60 }
  0x1b   : > { %v3366_v51 = vsel %vm445_vm0, %v4803_v50, 0  ;;  %s4089_s25 = sshll.u32 %s607_s20, 2  ;;  %s4273_s27 = sshll.u32 %s1337_s23, 2  ;;  %210 = vst.msk [vmem:[#allocation2 + $0x30] sm:$0xff] %vm203_vm2, %v5019_v60  ;;  %v285_v5 = vld [vmem:[#allocation2 + $0x40] sm:$0xff] }
  0x1c   : > { %3375 = vmatpush.bf16.msra.mxu0 %v3366_v51  ;;  %s4365_s28 = sshll.u32 %s1701_s24, 2  ;;  %s5181_s6 = scalar_lea.vmem %s6146_s0, %s4089_s25  ;;  %211 = vst.msk [vmem:[#allocation2 + $0x38] sm:$0xff] %vm203_vm2, %v5019_v60  ;;  %v277_v8 = vld [vmem:[#allocation2] sm:$0xff] }
  0x1d   : > { %s5186_s5 = scalar_lea.vmem %s6146_s0, %s4181_s26  ;;  %s5191_s11 = scalar_lea.vmem %s6146_s0, %s4273_s27  ;;  %v4843_v52 = vld [vmem:[%s5181_s6] sm:$0xff]  ;;  %v4844_v56 = vld [vmem:[%s5181_s6 + $0x8] sm:$0xff]  ;;  %213 = vst.msk [vmem:[#allocation2 + $0x48] sm:$0xff] %vm203_vm2, %v5019_v60  ;;  %v4845_v61 = vld [vmem:[%s5181_s6 + $0x10] sm:$0xff] }
  0x1e   : > { %s5196_s14 = scalar_lea.vmem %s6146_s0, %s4365_s28  ;;  %v4862_v53 = vld [vmem:[%s5186_s5] sm:$0xff]  ;;  %v4863_v57 = vld [vmem:[%s5186_s5 + $0x8] sm:$0xff]  ;;  %v4864_v62 = vld [vmem:[%s5186_s5 + $0x10] sm:$0xff]  ;;  %214 = vst.msk [vmem:[#allocation2 + $0x50] sm:$0xff] %vm203_vm2, %v5019_v60  ;;  %s5453_s17 = sadd.s32 32, %s5062_s21 }
  0x1f   : > { %v4881_v54 = vld [vmem:[%s5191_s11] sm:$0xff]  ;;  %v4882_v58 = vld [vmem:[%s5191_s11 + $0x8] sm:$0xff]  ;;  %v4883_v63 = vld [vmem:[%s5191_s11 + $0x10] sm:$0xff]  ;;  %215 = vst.msk [vmem:[#allocation2 + $0x58] sm:$0xff] %vm203_vm2, %v5019_v60  ;;  %p2062_p13 = scmp.gt.s32.totalorder %s5453_s17, 0  ;;  %s5462_s18 = sadd.s32 544, %s5062_s21 }
  0x20   : > { %v4900_v55 = vld [vmem:[%s5196_s14] sm:$0xff]  ;;  %v4901_v59 = vld [vmem:[%s5196_s14 + $0x8] sm:$0xff]  ;;  %v4902_v0 = vld [vmem:[%s5196_s14 + $0x10] sm:$0xff]  ;;  %216 = vst.msk [vmem:[#allocation2 + $0x60] sm:$0xff] %vm203_vm2, %v5019_v60  ;;  %s5466_s19 = sadd.s32 576, %s5062_s21  ;;  %p2427_p0 = scmp.gt.s32.totalorder %s5462_s18, 0 }
  0x21   : > { %217 = vst.msk [vmem:[#allocation2 + $0x68] sm:$0xff] %vm203_vm2, %v5019_v60  ;;  %v4846_v1 = vld [vmem:[%s5181_s6 + $0x18] sm:$0xff]  ;;  %v4847_v6 = vld [vmem:[%s5181_s6 + $0x20] sm:$0xff]  ;;  %v278_v21 = vld [vmem:[#allocation2 + $0x8] sm:$0xff]  ;;  %s5472_s20 = sadd.s32 608, %s5062_s21  ;;  %p2792_p1 = scmp.gt.s32.totalorder %s5466_s19, 0 }
  0x22   : > { %218 = vst.msk [vmem:[#allocation2 + $0x70] sm:$0xff] %vm203_vm2, %v5019_v60  ;;  %v4865_v2 = vld [vmem:[%s5186_s5 + $0x18] sm:$0xff]  ;;  %v4866_v7 = vld [vmem:[%s5186_s5 + $0x20] sm:$0xff]  ;;  %v4848_v32 = vld [vmem:[%s5181_s6 + $0x28] sm:$0xff]  ;;  %s2063_s22 = scalar_select %p2062_p13, %s5453_s17, 0 }
  0x23   : > { %219 = vst.msk [vmem:[#allocation2 + $0x78] sm:$0xff] %vm203_vm2, %v5019_v60  ;;  %v4884_v3 = vld [vmem:[%s5191_s11 + $0x18] sm:$0xff]  ;;  %v4885_v10 = vld [vmem:[%s5191_s11 + $0x20] sm:$0xff]  ;;  %v4867_v33 = vld [vmem:[%s5186_s5 + $0x28] sm:$0xff]  ;;  %p4452_p2 = scmp.lt.s32.totalorder %s5453_s17, 32768  ;;  %p3157_p3 = scmp.gt.s32.totalorder %s5472_s20, 0 }
  0x24   : > { %220 = vst.msk [vmem:[#allocation2 + $0x80] sm:$0xff] %vm203_vm2, %v5019_v60  ;;  %v4903_v4 = vld [vmem:[%s5196_s14 + $0x18] sm:$0xff]  ;;  %v4904_v11 = vld [vmem:[%s5196_s14 + $0x20] sm:$0xff]  ;;  %v286_v18 = vld [vmem:[#allocation2 + $0x48] sm:$0xff]  ;;  %s2428_s21 = scalar_select %p2427_p0, %s5462_s18, 0 }
  0x25   : > { %4073 = vmatmul.msk.bf16.gmra.mxu1 %vm396_vm1, %v4829_v24  ;;  %4077 = vmatmul.msk.bf16.gmra.mxu2 %vm396_vm1, %v4833_v25  ;;  %221 = vst.msk [vmem:[#allocation2 + $0x88] sm:$0xff] %vm203_vm2, %v5019_v60  ;;  %v279_v35 = vld [vmem:[#allocation2 + $0x10] sm:$0xff]  ;;  %v4886_v38 = vld [vmem:[%s5191_s11 + $0x28] sm:$0xff]  ;;  %v280_v49 = vld [vmem:[#allocation2 + $0x18] sm:$0xff]  ;;  %p4544_p4 = scmp.lt.s32.totalorder %s5462_s18, 32768  ;;  %p4636_p5 = scmp.lt.s32.totalorder %s5466_s19, 32768 }
  0x26   : > { %4081 = vmatmul.msk.bf16.gmra.mxu3 %vm396_vm1, %v4837_v26  ;;  %4069 = vmatmul.msk.bf16.gmra.mxu0 %vm396_vm1, %v4825_v27  ;;  %222 = vst.msk [vmem:[#allocation2 + $0x90] sm:$0xff] %vm203_vm2, %v5019_v60  ;;  %v4905_v39 = vld [vmem:[%s5196_s14 + $0x28] sm:$0xff]  ;;  %s2793_s23 = scalar_select %p2792_p1, %s5466_s19, 0 }
  0x27   : > { %223 = vst.msk [vmem:[#allocation2 + $0x98] sm:$0xff] %vm203_vm2, %v5019_v60  ;;  %s3158_s24 = scalar_select %p3157_p3, %s5472_s20, 0 }
  0x28   : > { %224 = vst.msk [vmem:[#allocation2 + $0xa0] sm:$0xff] %vm203_vm2, %v5019_v60  ;;  %p4728_p6 = scmp.lt.s32.totalorder %s5472_s20, 32768  ;;  %s6164_s22 = smov (!%p4452_p2, %s2063_s22), 32768 }
  0x29   : > { %225 = vst.msk [vmem:[#allocation2 + $0xa8] sm:$0xff] %vm203_vm2, %v5019_v60  ;;  %s6166_s21 = smov (!%p4544_p4, %s2428_s21), 32768  ;;  %s6168_s23 = smov (!%p4636_p5, %s2793_s23), 32768 }
  0x2a   : > { %226 = vst.msk [vmem:[#allocation2 + $0xb0] sm:$0xff] %vm203_vm2, %v5019_v60  ;;  %s6170_s24 = smov (!%p4728_p6, %s3158_s24), 32768  ;;  %s2066_s25 = sshra.s32 %s6164_s22, 3 }
  0x2b   : > { %227 = vst.msk [vmem:[#allocation2 + $0xb8] sm:$0xff] %vm203_vm2, %v5019_v60  ;;  %v293_v15 = vld [vmem:[#allocation2 + $0x80] sm:$0xff]  ;;  %s2431_s26 = sshra.s32 %s6166_s21, 3  ;;  %s2796_s27 = sshra.s32 %s6168_s23, 3 }
  0x2c   : > { %228 = vst.msk [vmem:[#allocation2 + $0xc0] sm:$0xff] %vm203_vm2, %v5019_v60  ;;  %v294_v27 = vld [vmem:[#allocation2 + $0x88] sm:$0xff]  ;;  %s3161_s28 = sshra.s32 %s6170_s24, 3  ;;  %s4457_s29 = sshll.u32 %s2066_s25, 2 }
  0x2d   : > { %229 = vst.msk [vmem:[#allocation2 + $0xc8] sm:$0xff] %vm203_vm2, %v5019_v60  ;;  %v295_v43 = vld [vmem:[#allocation2 + $0x90] sm:$0xff]  ;;  %s4549_s30 = sshll.u32 %s2431_s26, 2  ;;  %s4733_s7 = sshll.u32 %s3161_s28, 2 }
  0x2e   : > { %230 = vst.msk [vmem:[#allocation2 + $0xd0] sm:$0xff] %vm203_vm2, %v5019_v60  ;;  %s5528_s9 = scalar_lea.vmem %s6146_s0, %s4457_s29  ;;  %s5533_s12 = scalar_lea.vmem %s6146_s0, %s4549_s30 }
  0x2f   : > { %231 = vst.msk [vmem:[#allocation2 + $0xd8] sm:$0xff] %vm203_vm2, %v5019_v60  ;;  %s5544_s20 = scalar_lea.vmem %s6146_s0, %s4733_s7  ;;  %s3989_s22 = sshll.u32 %s3984_s16, 5 }
  0x30   : > { %232 = vst.msk [vmem:[#allocation2 + $0xe0] sm:$0xff] %vm203_vm2, %v5019_v60  ;;  %p190_p7 = scmp.lt.s32.totalorder %s3989_s22, 4127 }
  0x31   : > { %233 = vst.msk [vmem:[#allocation2 + $0xe8] sm:$0xff] %vm203_vm2, %v5019_v60 }
  0x32   : > { %234 = vst.msk [vmem:[#allocation2 + $0xf0] sm:$0xff] %vm203_vm2, %v5019_v60  ;;  %s6172_s22 = smov (!%p190_p7, %s3989_s22), 4127 }
  0x33   : > { %235 = vst.msk [vmem:[#allocation2 + $0xf8] sm:$0xff] %vm203_vm2, %v5019_v60  ;;  %v301_v16 = vld [vmem:[#allocation2 + $0xc0] sm:$0xff]  ;;  %v4849_v60 = vld [vmem:[%s5181_s6 + $0x30] sm:$0xff]  ;;  %s3990_s16 = sshll.u32 %s6172_s22, 3 }
  0x34   : > { %s5591_s24 = scalar_lea.vmem %s6149_s3, %s3990_s16 }
  0x35   : > { %4074 = vmatmul.msk.bf16.gmra.mxu1 %vm396_vm1, %v4830_v28  ;;  %4078 = vmatmul.msk.bf16.gmra.mxu2 %vm396_vm1, %v4834_v29  ;;  %v302_v28 = vld [vmem:[#allocation2 + $0xc8] sm:$0xff] }
  0x36   : > { %4082 = vmatmul.msk.bf16.gmra.mxu3 %vm396_vm1, %v4838_v30  ;;  %4070 = vmatmul.msk.bf16.gmra.mxu0 %vm396_vm1, %v4826_v31  ;;  %v287_v30 = vld [vmem:[#allocation2 + $0x50] sm:$0xff] }
  0x45   : > { %4075 = vmatmul.msk.bf16.gmra.mxu1 %vm396_vm1, %v4831_v44  ;;  %4079 = vmatmul.msk.bf16.gmra.mxu2 %vm396_vm1, %v4835_v45  ;;  %v303_v44 = vld [vmem:[#allocation2 + $0xd0] sm:$0xff] }
  0x46   : > { %4083 = vmatmul.msk.bf16.gmra.mxu3 %vm396_vm1, %v4839_v46  ;;  %4071 = vmatmul.msk.bf16.gmra.mxu0 %vm396_vm1, %v4827_v47  ;;  %v288_v46 = vld [vmem:[#allocation2 + $0x58] sm:$0xff] }
  0x55   : > { %4160 = vmatmul.msk.bf16.vlgmr.msrb.gmra.mxu1 %vm396_vm1, %v4843_v52  ;;  %4252 = vmatmul.msk.bf16.vlgmr.msrb.gmra.mxu2 %vm396_vm1, %v4862_v53 }
  0x56   : > { %4344 = vmatmul.msk.bf16.vlgmr.msrb.gmra.mxu3 %vm396_vm1, %v4881_v54  ;;  %4436 = vmatmul.msk.bf16.vlgmr.msrb.gmra.mxu0 %vm396_vm1, %v4900_v55  ;;  %v296_v55 = vld [vmem:[#allocation2 + $0x98] sm:$0xff] }
  0x65   : > { %4161 = vmatmul.msk.bf16.gmra.mxu1 %vm396_vm1, %v4844_v56  ;;  %4253 = vmatmul.msk.bf16.gmra.mxu2 %vm396_vm1, %v4863_v57  ;;  %v304_v56 = vld [vmem:[#allocation2 + $0xd8] sm:$0xff] }
  0x66   : > { %4345 = vmatmul.msk.bf16.gmra.mxu3 %vm396_vm1, %v4882_v58  ;;  %4437 = vmatmul.msk.bf16.gmra.mxu0 %vm396_vm1, %v4901_v59  ;;  %v289_v58 = vld [vmem:[#allocation2 + $0x60] sm:$0xff] }
  0x75   : > { %4162 = vmatmul.msk.bf16.gmra.mxu1 %vm396_vm1, %v4845_v61  ;;  %4254 = vmatmul.msk.bf16.gmra.mxu2 %vm396_vm1, %v4864_v62  ;;  %v4868_v61 = vld [vmem:[%s5186_s5 + $0x30] sm:$0xff] }
  0x76   : > { %4346 = vmatmul.msk.bf16.gmra.mxu3 %vm396_vm1, %v4883_v63  ;;  %4438 = vmatmul.msk.bf16.gmra.mxu0 %vm396_vm1, %v4902_v0  ;;  %v281_v63 = vld [vmem:[#allocation2 + $0x20] sm:$0xff] }
  0x85   : > { %4163 = vmatmul.msk.bf16.gmra.mxu1 %vm396_vm1, %v4846_v1  ;;  %4255 = vmatmul.msk.bf16.gmra.mxu2 %vm396_vm1, %v4865_v2  ;;  %v4887_v2 = vld [vmem:[%s5191_s11 + $0x30] sm:$0xff] }
  0x86   : > { %4347 = vmatmul.msk.bf16.gmra.mxu3 %vm396_vm1, %v4884_v3  ;;  %4439 = vmatmul.msk.bf16.gmra.mxu0 %vm396_vm1, %v4903_v4  ;;  %v4906_v3 = vld [vmem:[%s5196_s14 + $0x30] sm:$0xff] }
  0x92   : > { %v478_v9 = vpop.f32.mrf.mxu1 }
  0x93   : > { %v546_v12 = vadd.f32 %v478_v9, %v285_v5  ;;  %v458_v13 = vpop.f32.mrf.mxu0 }
  0x94   : > { %v538_v14 = vadd.f32 %v458_v13, %v277_v8  ;;  %v305_v8 = vld [vmem:[#allocation2 + $0xe0] sm:$0xff]  ;;  %v282_v13 = vld [vmem:[#allocation2 + $0x28] sm:$0xff] }
  0x95   : > { %578 = vst.msk [vmem:[#allocation2 + $0x40] sm:$0xff] %vm203_vm2, %v546_v12  ;;  %4164 = vmatmul.msk.bf16.gmra.mxu1 %vm396_vm1, %v4847_v6  ;;  %4256 = vmatmul.msk.bf16.gmra.mxu2 %vm396_vm1, %v4866_v7  ;;  %v297_v7 = vld [vmem:[#allocation2 + $0xa0] sm:$0xff] }
  0x96   : > { %4348 = vmatmul.msk.bf16.gmra.mxu3 %vm396_vm1, %v4885_v10  ;;  %570 = vst.msk [vmem:[#allocation2] sm:$0xff] %vm203_vm2, %v538_v14  ;;  %4440 = vmatmul.msk.bf16.gmra.mxu0 %vm396_vm1, %v4904_v11  ;;  %v290_v10 = vld [vmem:[#allocation2 + $0x68] sm:$0xff] }
  0x98   : > { %v498_v17 = vpop.f32.mrf.mxu2 }
  0x99   : > { %v554_v19 = vadd.f32 %v498_v17, %v293_v15  ;;  %v518_v20 = vpop.f32.mrf.mxu3 }
  0x9a   : > { %v480_v22 = vpop.f32.mrf.mxu1  ;;  %v562_v23 = vadd.f32 %v518_v20, %v301_v16  ;;  %v306_v20 = vld [vmem:[#allocation2 + $0xe8] sm:$0xff] }
  0x9b   : > { %586 = vst.msk [vmem:[#allocation2 + $0x80] sm:$0xff] %vm203_vm2, %v554_v19  ;;  %v547_v24 = vadd.f32 %v480_v22, %v286_v18  ;;  %v460_v25 = vpop.f32.mrf.mxu0  ;;  %v298_v19 = vld [vmem:[#allocation2 + $0xa8] sm:$0xff]  ;;  %v291_v22 = vld [vmem:[#allocation2 + $0x70] sm:$0xff] }
  0x9c   : > { %594 = vst.msk [vmem:[#allocation2 + $0xc0] sm:$0xff] %vm203_vm2, %v562_v23  ;;  %v539_v26 = vadd.f32 %v460_v25, %v278_v21  ;;  %v4869_v25 = vld [vmem:[%s5186_s5 + $0x38] sm:$0xff] }
  0x9d   : > { %579 = vst.msk [vmem:[#allocation2 + $0x48] sm:$0xff] %vm203_vm2, %v547_v24  ;;  %v4850_v24 = vld [vmem:[%s5181_s6 + $0x38] sm:$0xff] }
  0x9e   : > { %571 = vst.msk [vmem:[#allocation2 + $0x8] sm:$0xff] %vm203_vm2, %v539_v26 }
  0xa0   : > { %v500_v29 = vpop.f32.mrf.mxu2 }
  0xa1   : > { %v555_v31 = vadd.f32 %v500_v29, %v294_v27  ;;  %v520_v34 = vpop.f32.mrf.mxu3  ;;  %v283_v27 = vld [vmem:[#allocation2 + $0x30] sm:$0xff] }
  0xa2   : > { %v483_v36 = vpop.f32.mrf.mxu1  ;;  %v563_v37 = vadd.f32 %v520_v34, %v302_v28 }
  0xa3   : > { %587 = vst.msk [vmem:[#allocation2 + $0x88] sm:$0xff] %vm203_vm2, %v555_v31  ;;  %v548_v40 = vadd.f32 %v483_v36, %v287_v30  ;;  %v463_v41 = vpop.f32.mrf.mxu0  ;;  %v4888_v30 = vld [vmem:[%s5191_s11 + $0x38] sm:$0xff]  ;;  %v307_v36 = vld [vmem:[#allocation2 + $0xf0] sm:$0xff] }
  0xa4   : > { %595 = vst.msk [vmem:[#allocation2 + $0xc8] sm:$0xff] %vm203_vm2, %v563_v37  ;;  %v540_v42 = vadd.f32 %v463_v41, %v279_v35  ;;  %v4907_v31 = vld [vmem:[%s5196_s14 + $0x38] sm:$0xff]  ;;  %v299_v35 = vld [vmem:[#allocation2 + $0xb0] sm:$0xff] }
  0xa5   : > { %580 = vst.msk [vmem:[#allocation2 + $0x50] sm:$0xff] %vm203_vm2, %v548_v40  ;;  %4165 = vmatmul.msk.bf16.gmra.mxu1 %vm396_vm1, %v4848_v32  ;;  %4257 = vmatmul.msk.bf16.gmra.mxu2 %vm396_vm1, %v4867_v33  ;;  %v284_v41 = vld [vmem:[#allocation2 + $0x38] sm:$0xff] }
  0xa6   : > { %4349 = vmatmul.msk.bf16.gmra.mxu3 %vm396_vm1, %v4886_v38  ;;  %572 = vst.msk [vmem:[#allocation2 + $0x10] sm:$0xff] %vm203_vm2, %v540_v42  ;;  %4441 = vmatmul.msk.bf16.gmra.mxu0 %vm396_vm1, %v4905_v39  ;;  %v292_v38 = vld [vmem:[#allocation2 + $0x78] sm:$0xff] }
  0xa8   : > { %v503_v45 = vpop.f32.mrf.mxu2 }
  0xa9   : > { %v556_v47 = vadd.f32 %v503_v45, %v295_v43  ;;  %v523_v48 = vpop.f32.mrf.mxu3 }
  0xaa   : > { %v485_v50 = vpop.f32.mrf.mxu1  ;;  %v564_v51 = vadd.f32 %v523_v48, %v303_v44  ;;  %v308_v48 = vld [vmem:[#allocation2 + $0xf8] sm:$0xff] }
  0xab   : > { %588 = vst.msk [vmem:[#allocation2 + $0x90] sm:$0xff] %vm203_vm2, %v556_v47  ;;  %v549_v52 = vadd.f32 %v485_v50, %v288_v46  ;;  %v465_v53 = vpop.f32.mrf.mxu0  ;;  %v300_v47 = vld [vmem:[#allocation2 + $0xb8] sm:$0xff] }
  0xac   : > { %596 = vst.msk [vmem:[#allocation2 + $0xd0] sm:$0xff] %vm203_vm2, %v564_v51  ;;  %v541_v54 = vadd.f32 %v465_v53, %v280_v49  ;;  %v4851_v51 = vld [vmem:[%s5181_s6 + $0x40] sm:$0xff] }
  0xad   : > { %581 = vst.msk [vmem:[#allocation2 + $0x58] sm:$0xff] %vm203_vm2, %v549_v52  ;;  %v4870_v52 = vld [vmem:[%s5186_s5 + $0x40] sm:$0xff] }
  0xae   : > { %573 = vst.msk [vmem:[#allocation2 + $0x18] sm:$0xff] %vm203_vm2, %v541_v54  ;;  %v643_v54 = vld [vmem:[#allocation2] sm:$0xff] }
  0xb0   : > { %v505_v57 = vpop.f32.mrf.mxu2 }
  0xb1   : > { %v557_v59 = vadd.f32 %v505_v57, %v296_v55  ;;  %v525_v62 = vpop.f32.mrf.mxu3  ;;  %v4889_v57 = vld [vmem:[%s5191_s11 + $0x40] sm:$0xff] }
  0xb2   : > { %v488_v0 = vpop.f32.mrf.mxu1  ;;  %v565_v1 = vadd.f32 %v525_v62, %v304_v56 }
  0xb3   : > { %589 = vst.msk [vmem:[#allocation2 + $0x98] sm:$0xff] %vm203_vm2, %v557_v59  ;;  %v550_v4 = vadd.f32 %v488_v0, %v289_v58  ;;  %v468_v5 = vpop.f32.mrf.mxu0  ;;  %v4908_v58 = vld [vmem:[%s5196_s14 + $0x40] sm:$0xff] }
  0xb4   : > { %597 = vst.msk [vmem:[#allocation2 + $0xd8] sm:$0xff] %vm203_vm2, %v565_v1  ;;  %v542_v6 = vadd.f32 %v468_v5, %v281_v63  ;;  %v644_v63 = vld [vmem:[#allocation2 + $0x8] sm:$0xff] }
  0xb5   : > { %582 = vst.msk [vmem:[#allocation2 + $0x60] sm:$0xff] %vm203_vm2, %v550_v4  ;;  %4166 = vmatmul.msk.bf16.gmra.mxu1 %vm396_vm1, %v4849_v60  ;;  %4258 = vmatmul.msk.bf16.gmra.mxu2 %vm396_vm1, %v4868_v61 }
  0xb6   : > { %4350 = vmatmul.msk.bf16.gmra.mxu3 %vm396_vm1, %v4887_v2  ;;  %574 = vst.msk [vmem:[#allocation2 + $0x20] sm:$0xff] %vm203_vm2, %v542_v6  ;;  %4442 = vmatmul.msk.bf16.gmra.mxu0 %vm396_vm1, %v4906_v3  ;;  %v4852_v6 = vld [vmem:[%s5181_s6 + $0x48] sm:$0xff] }
  0xb8   : > { %v508_v9 = vpop.f32.mrf.mxu2 }
  0xb9   : > { %v558_v11 = vadd.f32 %v508_v9, %v297_v7  ;;  %v528_v12 = vpop.f32.mrf.mxu3  ;;  %v4871_v7 = vld [vmem:[%s5186_s5 + $0x48] sm:$0xff]  ;;  %v645_v9 = vld [vmem:[#allocation2 + $0x10] sm:$0xff] }
  0xba   : > { %v490_v14 = vpop.f32.mrf.mxu1  ;;  %v566_v15 = vadd.f32 %v528_v12, %v305_v8  ;;  %v4909_v12 = vld [vmem:[%s5196_s14 + $0x48] sm:$0xff] }
  0xbb   : > { %590 = vst.msk [vmem:[#allocation2 + $0xa0] sm:$0xff] %vm203_vm2, %v558_v11  ;;  %v551_v16 = vadd.f32 %v490_v14, %v290_v10  ;;  %v470_v17 = vpop.f32.mrf.mxu0  ;;  %v4890_v11 = vld [vmem:[%s5191_s11 + $0x48] sm:$0xff] }
  0xbc   : > { %598 = vst.msk [vmem:[#allocation2 + $0xe0] sm:$0xff] %vm203_vm2, %v566_v15  ;;  %v543_v18 = vadd.f32 %v470_v17, %v282_v13 }
  0xbd   : > { %583 = vst.msk [vmem:[#allocation2 + $0x68] sm:$0xff] %vm203_vm2, %v551_v16 }
  0xbe   : > { %575 = vst.msk [vmem:[#allocation2 + $0x28] sm:$0xff] %vm203_vm2, %v543_v18 }
  0xc0   : > { %v510_v21 = vpop.f32.mrf.mxu2 }
  0xc1   : > { %v559_v23 = vadd.f32 %v510_v21, %v298_v19  ;;  %v530_v26 = vpop.f32.mrf.mxu3  ;;  %v646_v21 = vld [vmem:[#allocation2 + $0x18] sm:$0xff] }
  0xc2   : > { %v493_v28 = vpop.f32.mrf.mxu1  ;;  %v567_v29 = vadd.f32 %v530_v26, %v306_v20 }
  0xc3   : > { %591 = vst.msk [vmem:[#allocation2 + $0xa8] sm:$0xff] %vm203_vm2, %v559_v23  ;;  %v552_v32 = vadd.f32 %v493_v28, %v291_v22  ;;  %v473_v33 = vpop.f32.mrf.mxu0 }
  0xc4   : > { %599 = vst.msk [vmem:[#allocation2 + $0xe8] sm:$0xff] %vm203_vm2, %v567_v29  ;;  %v544_v34 = vadd.f32 %v473_v33, %v283_v27  ;;  %v4872_v33 = vld [vmem:[%s5186_s5 + $0x50] sm:$0xff] }
  0xc5   : > { %584 = vst.msk [vmem:[#allocation2 + $0x70] sm:$0xff] %vm203_vm2, %v552_v32  ;;  %4167 = vmatmul.msk.bf16.gmra.mxu1 %vm396_vm1, %v4850_v24  ;;  %4259 = vmatmul.msk.bf16.gmra.mxu2 %vm396_vm1, %v4869_v25  ;;  %v4853_v32 = vld [vmem:[%s5181_s6 + $0x50] sm:$0xff] }
  0xc6   : > { %4351 = vmatmul.msk.bf16.gmra.mxu3 %vm396_vm1, %v4888_v30  ;;  %576 = vst.msk [vmem:[#allocation2 + $0x30] sm:$0xff] %vm203_vm2, %v544_v34  ;;  %4443 = vmatmul.msk.bf16.gmra.mxu0 %vm396_vm1, %v4907_v31 }
  0xc8   : > { %v513_v37 = vpop.f32.mrf.mxu2 }
  0xc9   : > { %v560_v39 = vadd.f32 %v513_v37, %v299_v35  ;;  %v533_v40 = vpop.f32.mrf.mxu3  ;;  %v647_v35 = vld [vmem:[#allocation2 + $0x20] sm:$0xff]  ;;  %v4891_v37 = vld [vmem:[%s5191_s11 + $0x50] sm:$0xff] }
  0xca   : > { %v495_v42 = vpop.f32.mrf.mxu1  ;;  %v568_v43 = vadd.f32 %v533_v40, %v307_v36 }
  0xcb   : > { %592 = vst.msk [vmem:[#allocation2 + $0xb0] sm:$0xff] %vm203_vm2, %v560_v39  ;;  %v553_v44 = vadd.f32 %v495_v42, %v292_v38  ;;  %v475_v45 = vpop.f32.mrf.mxu0  ;;  %v4910_v38 = vld [vmem:[%s5196_s14 + $0x50] sm:$0xff] }
  0xcc   : > { %600 = vst.msk [vmem:[#allocation2 + $0xf0] sm:$0xff] %vm203_vm2, %v568_v43  ;;  %v545_v46 = vadd.f32 %v475_v45, %v284_v41 }
  0xcd   : > { %585 = vst.msk [vmem:[#allocation2 + $0x78] sm:$0xff] %vm203_vm2, %v553_v44 }
  0xce   : > { %577 = vst.msk [vmem:[#allocation2 + $0x38] sm:$0xff] %vm203_vm2, %v545_v46 }
  0xd0   : > { %v515_v49 = vpop.f32.mrf.mxu2 }
  0xd1   : > { %v561_v50 = vadd.f32 %v515_v49, %v300_v47  ;;  %v535_v53 = vpop.f32.mrf.mxu3  ;;  %v648_v49 = vld [vmem:[#allocation2 + $0x28] sm:$0xff] }
  0xd2   : > { %v823_v55 = vpop.f32.mrf.mxu1  ;;  %v569_v56 = vadd.f32 %v535_v53, %v308_v48 }
  0xd3   : > { %593 = vst.msk [vmem:[#allocation2 + $0xb8] sm:$0xff] %vm203_vm2, %v561_v50  ;;  %v903_v59 = vadd.f32 %v823_v55, %v643_v54  ;;  %v1917_v60 = vpop.f32.mrf.mxu0 }
  0xd4   : > { %601 = vst.msk [vmem:[#allocation2 + $0xf8] sm:$0xff] %vm203_vm2, %v569_v56 }
  0xd5   : > { %935 = vst.msk [vmem:[#allocation2] sm:$0xff] %vm203_vm2, %v903_v59  ;;  %4168 = vmatmul.msk.bf16.gmra.mxu1 %vm396_vm1, %v4851_v51  ;;  %4260 = vmatmul.msk.bf16.gmra.mxu2 %vm396_vm1, %v4870_v52 }
  0xd6   : > { %4352 = vmatmul.msk.bf16.gmra.mxu3 %vm396_vm1, %v4889_v57  ;;  %4444 = vmatmul.msk.bf16.gmra.mxu0 %vm396_vm1, %v4908_v58 }
  0xd8   : > { %v1188_v61 = vpop.f32.mrf.mxu2 }
  0xd9   : > { %v1553_v62 = vpop.f32.mrf.mxu3 }
  0xda   : > { %v825_v0 = vpop.f32.mrf.mxu1 }
  0xdb   : > { %v904_v1 = vadd.f32 %v825_v0, %v644_v63  ;;  %v5335_v2 = vpop.f32.mrf.mxu0  ;;  %v649_v63 = vld [vmem:[#allocation2 + $0x30] sm:$0xff] }
  0xdc   : > { %v1008_v3 = vld [vmem:[#allocation2] sm:$0xff] }
  0xdd   : > { %v1268_v4 = vadd.f32 %v1188_v61, %v1008_v3  ;;  %936 = vst.msk [vmem:[#allocation2 + $0x8] sm:$0xff] %vm203_vm2, %v904_v1  ;;  %v4873_v61 = vld [vmem:[%s5186_s5 + $0x58] sm:$0xff] }
  0xde   : > { %v4892_v1 = vld [vmem:[%s5191_s11 + $0x58] sm:$0xff] }
  0xdf   : > { %1300 = vst.msk [vmem:[#allocation2] sm:$0xff] %vm203_vm2, %v1268_v4 }
  0xe0   : > { %v1190_v5 = vpop.f32.mrf.mxu2 }
  0xe1   : > { %v1555_v8 = vpop.f32.mrf.mxu3 }
  0xe2   : > { %v828_v10 = vpop.f32.mrf.mxu1 }
  0xe3   : > { %v905_v13 = vadd.f32 %v828_v10, %v645_v9  ;;  %v5343_v14 = vpop.f32.mrf.mxu0 }
  0xe4   : > { %v1009_v15 = vld [vmem:[#allocation2 + $0x8] sm:$0xff] }
  0xe5   : > { %v1269_v16 = vadd.f32 %v1190_v5, %v1009_v15  ;;  %937 = vst.msk [vmem:[#allocation2 + $0x10] sm:$0xff] %vm203_vm2, %v905_v13  ;;  %4169 = vmatmul.msk.bf16.gmra.mxu1 %vm396_vm1, %v4852_v6  ;;  %4261 = vmatmul.msk.bf16.gmra.mxu2 %vm396_vm1, %v4871_v7  ;;  %v650_v13 = vld [vmem:[#allocation2 + $0x38] sm:$0xff] }
  0xe6   : > { %v1373_v17 = vld [vmem:[#allocation2] sm:$0xff]  ;;  %4353 = vmatmul.msk.bf16.gmra.mxu3 %vm396_vm1, %v4890_v11  ;;  %4445 = vmatmul.msk.bf16.gmra.mxu0 %vm396_vm1, %v4909_v12 }
  0xe7   : > { %v1633_v18 = vadd.f32 %v1553_v62, %v1373_v17  ;;  %1301 = vst.msk [vmem:[#allocation2 + $0x8] sm:$0xff] %vm203_vm2, %v1269_v16 }
  0xe8   : > { %v1193_v19 = vpop.f32.mrf.mxu2 }
  0xe9   : > { %1665 = vst.msk [vmem:[#allocation2] sm:$0xff] %vm203_vm2, %v1633_v18  ;;  %v1558_v20 = vpop.f32.mrf.mxu3 }
  0xea   : > { %v830_v22 = vpop.f32.mrf.mxu1 }
  0xeb   : > { %v906_v23 = vadd.f32 %v830_v22, %v646_v21  ;;  %v5352_v24 = vpop.f32.mrf.mxu0 }
  0xec   : > { %v1010_v25 = vld [vmem:[#allocation2 + $0x10] sm:$0xff] }
  0xed   : > { %v1270_v26 = vadd.f32 %v1193_v19, %v1010_v25  ;;  %938 = vst.msk [vmem:[#allocation2 + $0x18] sm:$0xff] %vm203_vm2, %v906_v23  ;;  %v4874_v25 = vld [vmem:[%s5186_s5 + $0x60] sm:$0xff] }
  0xee   : > { %v1374_v27 = vld [vmem:[#allocation2 + $0x8] sm:$0xff] }
  0xef   : > { %v1634_v28 = vadd.f32 %v1555_v8, %v1374_v27  ;;  %1302 = vst.msk [vmem:[#allocation2 + $0x10] sm:$0xff] %vm203_vm2, %v1270_v26  ;;  %v651_v27 = vld [vmem:[#allocation2 + $0x40] sm:$0xff] }
  0xf0   : > { %v1737_v29 = vld [vmem:[#allocation2] sm:$0xff]  ;;  %v1195_v30 = vpop.f32.mrf.mxu2 }
  0xf1   : > { %1666 = vst.msk [vmem:[#allocation2 + $0x8] sm:$0xff] %vm203_vm2, %v1634_v28  ;;  %v1997_v31 = vadd.f32 %v1917_v60, %v1737_v29  ;;  %v1560_v34 = vpop.f32.mrf.mxu3  ;;  %v4854_v60 = vld [vmem:[%s5181_s6 + $0x58] sm:$0xff]  ;;  %v4893_v29 = vld [vmem:[%s5191_s11 + $0x60] sm:$0xff] }
  0xf2   : > { %v833_v36 = vpop.f32.mrf.mxu1 }
  0xf3   : > { %2029 = vst.msk [vmem:[#allocation2] sm:$0xff] %vm203_vm2, %v1997_v31  ;;  %v907_v39 = vadd.f32 %v833_v36, %v647_v35  ;;  %v5362_v40 = vpop.f32.mrf.mxu0 }
  0xf4   : > { %v1011_v41 = vld [vmem:[#allocation2 + $0x18] sm:$0xff] }
  0xf5   : > { %v1271_v42 = vadd.f32 %v1195_v30, %v1011_v41  ;;  %939 = vst.msk [vmem:[#allocation2 + $0x20] sm:$0xff] %vm203_vm2, %v907_v39  ;;  %4170 = vmatmul.msk.bf16.gmra.mxu1 %vm396_vm1, %v4853_v32  ;;  %4262 = vmatmul.msk.bf16.gmra.mxu2 %vm396_vm1, %v4872_v33  ;;  %v4912_v30 = vld [vmem:[%s5196_s14 + $0x60] sm:$0xff]  ;;  %v652_v41 = vld [vmem:[#allocation2 + $0x48] sm:$0xff] }
  0xf6   : > { %v1375_v43 = vld [vmem:[#allocation2 + $0x10] sm:$0xff]  ;;  %4354 = vmatmul.msk.bf16.gmra.mxu3 %vm396_vm1, %v4891_v37  ;;  %4446 = vmatmul.msk.bf16.gmra.mxu0 %vm396_vm1, %v4910_v38 }
  0xf7   : > { %v1635_v44 = vadd.f32 %v1558_v20, %v1375_v43  ;;  %1303 = vst.msk [vmem:[#allocation2 + $0x18] sm:$0xff] %vm203_vm2, %v1271_v42 }
  0xf8   : > { %v1738_v45 = vld [vmem:[#allocation2 + $0x8] sm:$0xff]  ;;  %v1198_v46 = vpop.f32.mrf.mxu2 }
  0xf9   : > { %1667 = vst.msk [vmem:[#allocation2 + $0x10] sm:$0xff] %vm203_vm2, %v1635_v44  ;;  %v1998_v47 = vadd.f32 %v5335_v2, %v1738_v45  ;;  %v1563_v48 = vpop.f32.mrf.mxu3  ;;  %v4911_v2 = vld [vmem:[%s5196_s14 + $0x58] sm:$0xff] }
  0xfa   : > { %v835_v50 = vpop.f32.mrf.mxu1 }
  0xfb   : > { %2030 = vst.msk [vmem:[#allocation2 + $0x8] sm:$0xff] %vm203_vm2, %v1998_v47  ;;  %v908_v51 = vadd.f32 %v835_v50, %v648_v49  ;;  %v5373_v52 = vpop.f32.mrf.mxu0 }
  0xfc   : > { %v1012_v53 = vld [vmem:[#allocation2 + $0x20] sm:$0xff] }
  0xfd   : > { %v1272_v54 = vadd.f32 %v1198_v46, %v1012_v53  ;;  %940 = vst.msk [vmem:[#allocation2 + $0x28] sm:$0xff] %vm203_vm2, %v908_v51  ;;  %v4875_v53 = vld [vmem:[%s5186_s5 + $0x68] sm:$0xff] }
  0xfe   : > { %v1376_v55 = vld [vmem:[#allocation2 + $0x18] sm:$0xff] }
  0xff   : > { %v1636_v56 = vadd.f32 %v1560_v34, %v1376_v55  ;;  %1304 = vst.msk [vmem:[#allocation2 + $0x20] sm:$0xff] %vm203_vm2, %v1272_v54  ;;  %v653_v55 = vld [vmem:[#allocation2 + $0x50] sm:$0xff] }
 0x100   : > { %v1739_v57 = vld [vmem:[#allocation2 + $0x10] sm:$0xff]  ;;  %v1200_v58 = vpop.f32.mrf.mxu2 }
 0x101   : > { %1668 = vst.msk [vmem:[#allocation2 + $0x18] sm:$0xff] %vm203_vm2, %v1636_v56  ;;  %v1999_v59 = vadd.f32 %v5343_v14, %v1739_v57  ;;  %v1565_v62 = vpop.f32.mrf.mxu3  ;;  %v4894_v57 = vld [vmem:[%s5191_s11 + $0x68] sm:$0xff] }
 0x102   : > { %v838_v0 = vpop.f32.mrf.mxu1 }
 0x103   : > { %2031 = vst.msk [vmem:[#allocation2 + $0x10] sm:$0xff] %vm203_vm2, %v1999_v59  ;;  %v909_v3 = vadd.f32 %v838_v0, %v649_v63  ;;  %v5384_v4 = vpop.f32.mrf.mxu0 }
 0x104   : > { %v1013_v5 = vld [vmem:[#allocation2 + $0x28] sm:$0xff] }
 0x105   : > { %v1273_v6 = vadd.f32 %v1200_v58, %v1013_v5  ;;  %941 = vst.msk [vmem:[#allocation2 + $0x30] sm:$0xff] %vm203_vm2, %v909_v3  ;;  %4171 = vmatmul.msk.bf16.gmra.mxu1 %vm396_vm1, %v4854_v60  ;;  %4263 = vmatmul.msk.bf16.gmra.mxu2 %vm396_vm1, %v4873_v61  ;;  %v4913_v58 = vld [vmem:[%s5196_s14 + $0x68] sm:$0xff]  ;;  %v654_v5 = vld [vmem:[#allocation2 + $0x58] sm:$0xff] }
 0x106   : > { %v1377_v7 = vld [vmem:[#allocation2 + $0x20] sm:$0xff]  ;;  %4355 = vmatmul.msk.bf16.gmra.mxu3 %vm396_vm1, %v4892_v1  ;;  %4447 = vmatmul.msk.bf16.gmra.mxu0 %vm396_vm1, %v4911_v2 }
 0x107   : > { %v1637_v8 = vadd.f32 %v1563_v48, %v1377_v7  ;;  %1305 = vst.msk [vmem:[#allocation2 + $0x28] sm:$0xff] %vm203_vm2, %v1273_v6 }
 0x108   : > { %v1740_v9 = vld [vmem:[#allocation2 + $0x18] sm:$0xff]  ;;  %v1203_v10 = vpop.f32.mrf.mxu2 }
 0x109   : > { %1669 = vst.msk [vmem:[#allocation2 + $0x20] sm:$0xff] %vm203_vm2, %v1637_v8  ;;  %v2000_v11 = vadd.f32 %v5352_v24, %v1740_v9  ;;  %v1568_v12 = vpop.f32.mrf.mxu3  ;;  %v4855_v24 = vld [vmem:[%s5181_s6 + $0x60] sm:$0xff] }
 0x10a   : > { %v840_v14 = vpop.f32.mrf.mxu1 }
 0x10b   : > { %2032 = vst.msk [vmem:[#allocation2 + $0x18] sm:$0xff] %vm203_vm2, %v2000_v11  ;;  %v910_v15 = vadd.f32 %v840_v14, %v650_v13  ;;  %v5395_v16 = vpop.f32.mrf.mxu0 }
 0x10c   : > { %v1014_v17 = vld [vmem:[#allocation2 + $0x30] sm:$0xff] }
 0x10d   : > { %v1274_v18 = vadd.f32 %v1203_v10, %v1014_v17  ;;  %942 = vst.msk [vmem:[#allocation2 + $0x38] sm:$0xff] %vm203_vm2, %v910_v15  ;;  %v4876_v17 = vld [vmem:[%s5186_s5 + $0x70] sm:$0xff] }
 0x10e   : > { %v1378_v19 = vld [vmem:[#allocation2 + $0x28] sm:$0xff] }
 0x10f   : > { %v1638_v20 = vadd.f32 %v1565_v62, %v1378_v19  ;;  %1306 = vst.msk [vmem:[#allocation2 + $0x30] sm:$0xff] %vm203_vm2, %v1274_v18  ;;  %v655_v19 = vld [vmem:[#allocation2 + $0x60] sm:$0xff] }
 0x110   : > { %v1741_v21 = vld [vmem:[#allocation2 + $0x20] sm:$0xff]  ;;  %v1205_v22 = vpop.f32.mrf.mxu2 }
 0x111   : > { %1670 = vst.msk [vmem:[#allocation2 + $0x28] sm:$0xff] %vm203_vm2, %v1638_v20  ;;  %v2001_v23 = vadd.f32 %v5362_v40, %v1741_v21  ;;  %v1570_v26 = vpop.f32.mrf.mxu3  ;;  %v4895_v21 = vld [vmem:[%s5191_s11 + $0x70] sm:$0xff] }
 0x112   : > { %v843_v28 = vpop.f32.mrf.mxu1 }
 0x113   : > { %2033 = vst.msk [vmem:[#allocation2 + $0x20] sm:$0xff] %vm203_vm2, %v2001_v23  ;;  %v911_v31 = vadd.f32 %v843_v28, %v651_v27  ;;  %v5406_v32 = vpop.f32.mrf.mxu0 }
 0x114   : > { %v1015_v33 = vld [vmem:[#allocation2 + $0x38] sm:$0xff] }
 0x115   : > { %v1275_v34 = vadd.f32 %v1205_v22, %v1015_v33  ;;  %943 = vst.msk [vmem:[#allocation2 + $0x40] sm:$0xff] %vm203_vm2, %v911_v31  ;;  %4172 = vmatmul.msk.bf16.gmra.mxu1 %vm396_vm1, %v4855_v24  ;;  %4264 = vmatmul.msk.bf16.gmra.mxu2 %vm396_vm1, %v4874_v25  ;;  %v4914_v22 = vld [vmem:[%s5196_s14 + $0x70] sm:$0xff]  ;;  %v656_v33 = vld [vmem:[#allocation2 + $0x68] sm:$0xff] }
 0x116   : > { %v1379_v35 = vld [vmem:[#allocation2 + $0x30] sm:$0xff]  ;;  %4356 = vmatmul.msk.bf16.gmra.mxu3 %vm396_vm1, %v4893_v29  ;;  %4448 = vmatmul.msk.bf16.gmra.mxu0 %vm396_vm1, %v4912_v30 }
 0x117   : > { %v1639_v36 = vadd.f32 %v1568_v12, %v1379_v35  ;;  %1307 = vst.msk [vmem:[#allocation2 + $0x38] sm:$0xff] %vm203_vm2, %v1275_v34 }
 0x118   : > { %v1742_v37 = vld [vmem:[#allocation2 + $0x28] sm:$0xff]  ;;  %v1208_v38 = vpop.f32.mrf.mxu2 }
 0x119   : > { %1671 = vst.msk [vmem:[#allocation2 + $0x30] sm:$0xff] %vm203_vm2, %v1639_v36  ;;  %v2002_v39 = vadd.f32 %v5373_v52, %v1742_v37  ;;  %v1573_v40 = vpop.f32.mrf.mxu3  ;;  %v4856_v52 = vld [vmem:[%s5181_s6 + $0x68] sm:$0xff] }
 0x11a   : > { %v845_v42 = vpop.f32.mrf.mxu1 }
 0x11b   : > { %2034 = vst.msk [vmem:[#allocation2 + $0x28] sm:$0xff] %vm203_vm2, %v2002_v39  ;;  %v912_v43 = vadd.f32 %v845_v42, %v652_v41  ;;  %v5417_v44 = vpop.f32.mrf.mxu0 }
 0x11c   : > { %v1016_v45 = vld [vmem:[#allocation2 + $0x40] sm:$0xff] }
 0x11d   : > { %v1276_v46 = vadd.f32 %v1208_v38, %v1016_v45  ;;  %944 = vst.msk [vmem:[#allocation2 + $0x48] sm:$0xff] %vm203_vm2, %v912_v43  ;;  %v4877_v45 = vld [vmem:[%s5186_s5 + $0x78] sm:$0xff] }
 0x11e   : > { %v1380_v47 = vld [vmem:[#allocation2 + $0x38] sm:$0xff] }
 0x11f   : > { %v1640_v48 = vadd.f32 %v1570_v26, %v1380_v47  ;;  %1308 = vst.msk [vmem:[#allocation2 + $0x40] sm:$0xff] %vm203_vm2, %v1276_v46  ;;  %v657_v47 = vld [vmem:[#allocation2 + $0x70] sm:$0xff] }
 0x120   : > { %v1743_v49 = vld [vmem:[#allocation2 + $0x30] sm:$0xff]  ;;  %v1210_v50 = vpop.f32.mrf.mxu2 }
 0x121   : > { %1672 = vst.msk [vmem:[#allocation2 + $0x38] sm:$0xff] %vm203_vm2, %v1640_v48  ;;  %v2003_v51 = vadd.f32 %v5384_v4, %v1743_v49  ;;  %v1575_v54 = vpop.f32.mrf.mxu3  ;;  %v4896_v49 = vld [vmem:[%s5191_s11 + $0x78] sm:$0xff] }
 0x122   : > { %v848_v56 = vpop.f32.mrf.mxu1 }
 0x123   : > { %2035 = vst.msk [vmem:[#allocation2 + $0x30] sm:$0xff] %vm203_vm2, %v2003_v51  ;;  %v913_v59 = vadd.f32 %v848_v56, %v653_v55  ;;  %v5428_v60 = vpop.f32.mrf.mxu0 }
 0x124   : > { %v1017_v61 = vld [vmem:[#allocation2 + $0x48] sm:$0xff] }
 0x125   : > { %v1277_v62 = vadd.f32 %v1210_v50, %v1017_v61  ;;  %945 = vst.msk [vmem:[#allocation2 + $0x50] sm:$0xff] %vm203_vm2, %v913_v59  ;;  %4173 = vmatmul.msk.bf16.gmra.mxu1 %vm396_vm1, %v4856_v52  ;;  %4265 = vmatmul.msk.bf16.gmra.mxu2 %vm396_vm1, %v4875_v53  ;;  %v4915_v50 = vld [vmem:[%s5196_s14 + $0x78] sm:$0xff] }
 0x126   : > { %v1381_v63 = vld [vmem:[#allocation2 + $0x40] sm:$0xff]  ;;  %4357 = vmatmul.msk.bf16.gmra.mxu3 %vm396_vm1, %v4894_v57  ;;  %4449 = vmatmul.msk.bf16.gmra.mxu0 %vm396_vm1, %v4913_v58  ;;  %v658_v61 = vld [vmem:[#allocation2 + $0x78] sm:$0xff] }
 0x127   : > { %v1641_v0 = vadd.f32 %v1573_v40, %v1381_v63  ;;  %1309 = vst.msk [vmem:[#allocation2 + $0x48] sm:$0xff] %vm203_vm2, %v1277_v62 }
 0x128   : > { %v1744_v1 = vld [vmem:[#allocation2 + $0x38] sm:$0xff]  ;;  %v1213_v2 = vpop.f32.mrf.mxu2 }
 0x129   : > { %1673 = vst.msk [vmem:[#allocation2 + $0x40] sm:$0xff] %vm203_vm2, %v1641_v0  ;;  %v2004_v3 = vadd.f32 %v5395_v16, %v1744_v1  ;;  %v1578_v4 = vpop.f32.mrf.mxu3  ;;  %v4857_v16 = vld [vmem:[%s5181_s6 + $0x70] sm:$0xff] }
 0x12a   : > { %v850_v6 = vpop.f32.mrf.mxu1 }
 0x12b   : > { %2036 = vst.msk [vmem:[#allocation2 + $0x38] sm:$0xff] %vm203_vm2, %v2004_v3  ;;  %v914_v7 = vadd.f32 %v850_v6, %v654_v5  ;;  %v5439_v8 = vpop.f32.mrf.mxu0 }
 0x12c   : > { %v1018_v9 = vld [vmem:[#allocation2 + $0x50] sm:$0xff] }
 0x12d   : > { %v1278_v10 = vadd.f32 %v1213_v2, %v1018_v9  ;;  %946 = vst.msk [vmem:[#allocation2 + $0x58] sm:$0xff] %vm203_vm2, %v914_v7  ;;  %v4938_v9 = vld [vmem:[%s5533_s12] sm:$0xff] }
 0x12e   : > { %v1382_v11 = vld [vmem:[#allocation2 + $0x48] sm:$0xff] }
 0x12f   : > { %v1642_v12 = vadd.f32 %v1575_v54, %v1382_v11  ;;  %1310 = vst.msk [vmem:[#allocation2 + $0x50] sm:$0xff] %vm203_vm2, %v1278_v10  ;;  %v659_v11 = vld [vmem:[#allocation2 + $0x80] sm:$0xff] }
 0x130   : > { %v1745_v13 = vld [vmem:[#allocation2 + $0x40] sm:$0xff]  ;;  %v1215_v14 = vpop.f32.mrf.mxu2 }
 0x131   : > { %1674 = vst.msk [vmem:[#allocation2 + $0x48] sm:$0xff] %vm203_vm2, %v1642_v12  ;;  %v2005_v15 = vadd.f32 %v5406_v32, %v1745_v13  ;;  %v1580_v18 = vpop.f32.mrf.mxu3 }
 0x132   : > { %v853_v20 = vpop.f32.mrf.mxu1 }
 0x133   : > { %2037 = vst.msk [vmem:[#allocation2 + $0x40] sm:$0xff] %vm203_vm2, %v2005_v15  ;;  %v915_v23 = vadd.f32 %v853_v20, %v655_v19  ;;  %v5450_v24 = vpop.f32.mrf.mxu0 }
 0x134   : > { %v1019_v25 = vld [vmem:[#allocation2 + $0x58] sm:$0xff] }
 0x135   : > { %v1279_v26 = vadd.f32 %v1215_v14, %v1019_v25  ;;  %947 = vst.msk [vmem:[#allocation2 + $0x60] sm:$0xff] %vm203_vm2, %v915_v23  ;;  %4174 = vmatmul.msk.bf16.gmra.mxu1 %vm396_vm1, %v4857_v16  ;;  %4266 = vmatmul.msk.bf16.gmra.mxu2 %vm396_vm1, %v4876_v17  ;;  %v4976_v14 = vld [vmem:[%s5544_s20] sm:$0xff]  ;;  %v660_v25 = vld [vmem:[#allocation2 + $0x88] sm:$0xff] }
 0x136   : > { %v1383_v27 = vld [vmem:[#allocation2 + $0x50] sm:$0xff]  ;;  %4358 = vmatmul.msk.bf16.gmra.mxu3 %vm396_vm1, %v4895_v21  ;;  %4450 = vmatmul.msk.bf16.gmra.mxu0 %vm396_vm1, %v4914_v22 }
 0x137   : > { %v1643_v28 = vadd.f32 %v1578_v4, %v1383_v27  ;;  %1311 = vst.msk [vmem:[#allocation2 + $0x58] sm:$0xff] %vm203_vm2, %v1279_v26 }
 0x138   : > { %v1746_v29 = vld [vmem:[#allocation2 + $0x48] sm:$0xff]  ;;  %v1218_v30 = vpop.f32.mrf.mxu2 }
 0x139   : > { %1675 = vst.msk [vmem:[#allocation2 + $0x50] sm:$0xff] %vm203_vm2, %v1643_v28  ;;  %v2006_v31 = vadd.f32 %v5417_v44, %v1746_v29  ;;  %v1583_v32 = vpop.f32.mrf.mxu3  ;;  %v4858_v44 = vld [vmem:[%s5181_s6 + $0x78] sm:$0xff]  ;;  %s4641_s6 = sshll.u32 %s2796_s27, 2  ;;  %s3992_s27 = sshll.u32 %s6172_s22, 2 }
 0x13a   : > { %v855_v34 = vpop.f32.mrf.mxu1  ;;  %s5539_s17 = scalar_lea.vmem %s6146_s0, %s4641_s6  ;;  %s5829_s30 = scalar_lea.vmem %s6150_s4, %s3992_s27 }
 0x13b   : > { %2038 = vst.msk [vmem:[#allocation2 + $0x48] sm:$0xff] %vm203_vm2, %v2006_v31  ;;  %v916_v35 = vadd.f32 %v855_v34, %v656_v33  ;;  %v5478_v36 = vpop.f32.mrf.mxu0  ;;  %v4957_v13 = vld [vmem:[%s5539_s17] sm:$0xff] }
 0x13c   : > { %v1020_v37 = vld [vmem:[#allocation2 + $0x60] sm:$0xff] }
 0x13d   : > { %v1280_v38 = vadd.f32 %v1218_v30, %v1020_v37  ;;  %948 = vst.msk [vmem:[#allocation2 + $0x68] sm:$0xff] %vm203_vm2, %v916_v35  ;;  %v4939_v37 = vld [vmem:[%s5533_s12 + $0x8] sm:$0xff] }
 0x13e   : > { %v1384_v39 = vld [vmem:[#allocation2 + $0x58] sm:$0xff] }
 0x13f   : > { %v1644_v40 = vadd.f32 %v1580_v18, %v1384_v39  ;;  %1312 = vst.msk [vmem:[#allocation2 + $0x60] sm:$0xff] %vm203_vm2, %v1280_v38  ;;  %v661_v39 = vld [vmem:[#allocation2 + $0x90] sm:$0xff] }
 0x140   : > { %v1747_v41 = vld [vmem:[#allocation2 + $0x50] sm:$0xff]  ;;  %v1220_v42 = vpop.f32.mrf.mxu2 }
 0x141   : > { %1676 = vst.msk [vmem:[#allocation2 + $0x58] sm:$0xff] %vm203_vm2, %v1644_v40  ;;  %v2007_v43 = vadd.f32 %v5428_v60, %v1747_v41  ;;  %v1585_v46 = vpop.f32.mrf.mxu3  ;;  %v4958_v41 = vld [vmem:[%s5539_s17 + $0x8] sm:$0xff] }
 0x142   : > { %v858_v48 = vpop.f32.mrf.mxu1 }
 0x143   : > { %2039 = vst.msk [vmem:[#allocation2 + $0x50] sm:$0xff] %vm203_vm2, %v2007_v43  ;;  %v917_v51 = vadd.f32 %v858_v48, %v657_v47  ;;  %v5506_v52 = vpop.f32.mrf.mxu0 }
 0x144   : > { %v1021_v53 = vld [vmem:[#allocation2 + $0x68] sm:$0xff] }
 0x145   : > { %v1281_v54 = vadd.f32 %v1220_v42, %v1021_v53  ;;  %949 = vst.msk [vmem:[#allocation2 + $0x70] sm:$0xff] %vm203_vm2, %v917_v51  ;;  %4175 = vmatmul.msk.bf16.gmra.mxu1 %vm396_vm1, %v4858_v44  ;;  %4267 = vmatmul.msk.bf16.gmra.mxu2 %vm396_vm1, %v4877_v45  ;;  %v4977_v42 = vld [vmem:[%s5544_s20 + $0x8] sm:$0xff]  ;;  %v662_v53 = vld [vmem:[#allocation2 + $0x98] sm:$0xff] }
 0x146   : > { %v1385_v55 = vld [vmem:[#allocation2 + $0x60] sm:$0xff]  ;;  %4359 = vmatmul.msk.bf16.gmra.mxu3 %vm396_vm1, %v4896_v49  ;;  %4451 = vmatmul.msk.bf16.gmra.mxu0 %vm396_vm1, %v4915_v50 }
 0x147   : > { %v1645_v56 = vadd.f32 %v1583_v32, %v1385_v55  ;;  %1313 = vst.msk [vmem:[#allocation2 + $0x68] sm:$0xff] %vm203_vm2, %v1281_v54 }
 0x148   : > { %v1748_v57 = vld [vmem:[#allocation2 + $0x58] sm:$0xff]  ;;  %v1223_v58 = vpop.f32.mrf.mxu2 }
 0x149   : > { %1677 = vst.msk [vmem:[#allocation2 + $0x60] sm:$0xff] %vm203_vm2, %v1645_v56  ;;  %v2008_v59 = vadd.f32 %v5439_v8, %v1748_v57  ;;  %v1588_v60 = vpop.f32.mrf.mxu3  ;;  %v4919_v8 = vld [vmem:[%s5528_s9] sm:$0xff]  ;;  %v5020_v57 = vmov 0  }
 0x14a   : > { %v860_v62 = vpop.f32.mrf.mxu1  ;;  %5006 = vset.pattern.permute.xlu0 %v5020_v57  ;;  %5007 = vset.pattern.permute.xlu1 %v5020_v57 }
 0x14b   : > { %2040 = vst.msk [vmem:[#allocation2 + $0x58] sm:$0xff] %vm203_vm2, %v2008_v59  ;;  %v918_v63 = vadd.f32 %v860_v62, %v658_v61  ;;  %v5522_v0 = vpop.f32.mrf.mxu0  ;;  %5008 = vset.pattern.permute.xlu2 %v5020_v57 }
 0x14c   : > { %v1022_v1 = vld [vmem:[#allocation2 + $0x70] sm:$0xff] }
 0x14d   : > { %v1282_v2 = vadd.f32 %v1223_v58, %v1022_v1  ;;  %950 = vst.msk [vmem:[#allocation2 + $0x78] sm:$0xff] %vm203_vm2, %v918_v63  ;;  %v3621_v58 = vld [vmem:[%s5591_s24] sm:$0xff] }
 0x14e   : > { %v1386_v3 = vld [vmem:[#allocation2 + $0x68] sm:$0xff]  ;;  %3655 = vperm.xlu0 %5006, %v3621_v58  }
 0x14f   : > { %v1646_v4 = vadd.f32 %v1585_v46, %v1386_v3  ;;  %1314 = vst.msk [vmem:[#allocation2 + $0x70] sm:$0xff] %vm203_vm2, %v1282_v2  ;;  %v4921_v2 = vld [vmem:[%s5528_s9 + $0x10] sm:$0xff] }
 0x150   : > { %v1749_v5 = vld [vmem:[#allocation2 + $0x60] sm:$0xff]  ;;  %v1225_v6 = vpop.f32.mrf.mxu2  ;;  %v4940_v3 = vld [vmem:[%s5533_s12 + $0x10] sm:$0xff] }
 0x151   : > { %1678 = vst.msk [vmem:[#allocation2 + $0x68] sm:$0xff] %vm203_vm2, %v1646_v4  ;;  %v2009_v7 = vadd.f32 %v5450_v24, %v1749_v5  ;;  %v1590_v10 = vpop.f32.mrf.mxu3  ;;  %v663_v5 = vld [vmem:[#allocation2 + $0xa0] sm:$0xff] }
 0x152   : > { %v863_v12 = vpop.f32.mrf.mxu1 }
 0x153   : > { %2041 = vst.msk [vmem:[#allocation2 + $0x60] sm:$0xff] %vm203_vm2, %v2009_v7  ;;  %v919_v15 = vadd.f32 %v863_v12, %v659_v11  ;;  %v5553_v16 = vpop.f32.mrf.mxu0  ;;  %v4959_v7 = vld [vmem:[%s5539_s17 + $0x10] sm:$0xff]  ;;  %v3622_v11 = vld [vmem:[%s5591_s24 + $0x8] sm:$0xff] }
 0x154   : > { %v1023_v17 = vld [vmem:[#allocation2 + $0x78] sm:$0xff] }
 0x155   : > { %v1283_v18 = vadd.f32 %v1225_v6, %v1023_v17  ;;  %951 = vst.msk [vmem:[#allocation2 + $0x80] sm:$0xff] %vm203_vm2, %v919_v15  ;;  %4528 = vmatmul.msk.bf16.vlgmr.msra.gmra.mxu1 %vm396_vm1, %v4919_v8  ;;  %4620 = vmatmul.msk.bf16.vlgmr.msra.gmra.mxu2 %vm396_vm1, %v4938_v9  ;;  %v4978_v8 = vld [vmem:[%s5544_s20 + $0x10] sm:$0xff] }
 0x156   : > { %v1387_v19 = vld [vmem:[#allocation2 + $0x70] sm:$0xff]  ;;  %4712 = vmatmul.msk.bf16.vlgmr.msra.gmra.mxu3 %vm396_vm1, %v4957_v13  ;;  %4804 = vmatmul.msk.bf16.vlgmr.msra.gmra.mxu0 %vm396_vm1, %v4976_v14 }
 0x157   : > { %v1647_v20 = vadd.f32 %v1588_v60, %v1387_v19  ;;  %1315 = vst.msk [vmem:[#allocation2 + $0x78] sm:$0xff] %vm203_vm2, %v1283_v18  ;;  %3660 = vperm.xlu0 %5006, %v3622_v11  }
 0x158   : > { %v1750_v21 = vld [vmem:[#allocation2 + $0x68] sm:$0xff]  ;;  %v1228_v22 = vpop.f32.mrf.mxu2 }
 0x159   : > { %1679 = vst.msk [vmem:[#allocation2 + $0x70] sm:$0xff] %vm203_vm2, %v1647_v20  ;;  %v2010_v23 = vadd.f32 %v5478_v36, %v1750_v21  ;;  %v1593_v24 = vpop.f32.mrf.mxu3  ;;  %v4920_v36 = vld [vmem:[%s5528_s9 + $0x8] sm:$0xff] }
 0x15a   : > { %v865_v26 = vpop.f32.mrf.mxu1  ;;  %v664_v20 = vld [vmem:[#allocation2 + $0xa8] sm:$0xff] }
 0x15b   : > { %2042 = vst.msk [vmem:[#allocation2 + $0x68] sm:$0xff] %vm203_vm2, %v2010_v23  ;;  %v920_v27 = vadd.f32 %v865_v26, %v660_v25  ;;  %v5566_v28 = vpop.f32.mrf.mxu0 }
 0x15c   : > { %v1024_v29 = vld [vmem:[#allocation2 + $0x80] sm:$0xff] }
 0x15d   : > { %v1284_v30 = vadd.f32 %v1228_v22, %v1024_v29  ;;  %952 = vst.msk [vmem:[#allocation2 + $0x88] sm:$0xff] %vm203_vm2, %v920_v27 }
 0x15e   : > { %v1388_v31 = vld [vmem:[#allocation2 + $0x78] sm:$0xff] }
 0x15f   : > { %v1648_v32 = vadd.f32 %v1590_v10, %v1388_v31  ;;  %1316 = vst.msk [vmem:[#allocation2 + $0x80] sm:$0xff] %vm203_vm2, %v1284_v30 }
 0x160   : > { %v1751_v33 = vld [vmem:[#allocation2 + $0x70] sm:$0xff]  ;;  %v1230_v34 = vpop.f32.mrf.mxu2 }
 0x161   : > { %1680 = vst.msk [vmem:[#allocation2 + $0x78] sm:$0xff] %vm203_vm2, %v1648_v32  ;;  %v2011_v35 = vadd.f32 %v5506_v52, %v1751_v33  ;;  %v1595_v38 = vpop.f32.mrf.mxu3  ;;  %v4922_v32 = vld [vmem:[%s5528_s9 + $0x18] sm:$0xff] }
 0x162   : > { %v868_v40 = vpop.f32.mrf.mxu1  ;;  %v4941_v33 = vld [vmem:[%s5533_s12 + $0x18] sm:$0xff] }
 0x163   : > { %2043 = vst.msk [vmem:[#allocation2 + $0x70] sm:$0xff] %vm203_vm2, %v2011_v35  ;;  %v921_v43 = vadd.f32 %v868_v40, %v661_v39  ;;  %v5579_v44 = vpop.f32.mrf.mxu0  ;;  %v665_v35 = vld [vmem:[#allocation2 + $0xb0] sm:$0xff] }
 0x164   : > { %v1025_v45 = vld [vmem:[#allocation2 + $0x88] sm:$0xff] }
 0x165   : > { %v1285_v46 = vadd.f32 %v1230_v34, %v1025_v45  ;;  %953 = vst.msk [vmem:[#allocation2 + $0x90] sm:$0xff] %vm203_vm2, %v921_v43  ;;  %4529 = vmatmul.msk.bf16.gmra.mxu1 %vm396_vm1, %v4920_v36  ;;  %4621 = vmatmul.msk.bf16.gmra.mxu2 %vm396_vm1, %v4939_v37  ;;  %v4960_v37 = vld [vmem:[%s5539_s17 + $0x18] sm:$0xff] }
 0x166   : > { %v1389_v47 = vld [vmem:[#allocation2 + $0x80] sm:$0xff]  ;;  %4713 = vmatmul.msk.bf16.gmra.mxu3 %vm396_vm1, %v4958_v41  ;;  %4805 = vmatmul.msk.bf16.gmra.mxu0 %vm396_vm1, %v4977_v42  ;;  %v3624_v41 = vld [vmem:[%s5591_s24 + $0x18] sm:$0xff] }
 0x167   : > { %v1649_v48 = vadd.f32 %v1593_v24, %v1389_v47  ;;  %1317 = vst.msk [vmem:[#allocation2 + $0x88] sm:$0xff] %vm203_vm2, %v1285_v46  ;;  %v3623_v24 = vld [vmem:[%s5591_s24 + $0x10] sm:$0xff] }
 0x168   : > { %v1752_v49 = vld [vmem:[#allocation2 + $0x78] sm:$0xff]  ;;  %v1233_v50 = vpop.f32.mrf.mxu2  ;;  %3665 = vperm.xlu1 %5007, %v3623_v24  }
 0x169   : > { %1681 = vst.msk [vmem:[#allocation2 + $0x80] sm:$0xff] %vm203_vm2, %v1649_v48  ;;  %v2012_v51 = vadd.f32 %v5522_v0, %v1752_v49  ;;  %v1598_v52 = vpop.f32.mrf.mxu3 }
 0x16a   : > { %v870_v54 = vpop.f32.mrf.mxu1 }
 0x16b   : > { %2044 = vst.msk [vmem:[#allocation2 + $0x78] sm:$0xff] %vm203_vm2, %v2012_v51  ;;  %v922_v55 = vadd.f32 %v870_v54, %v662_v53  ;;  %v5596_v56 = vpop.f32.mrf.mxu0 }
 0x16c   : > { %v1026_v59 = vld [vmem:[#allocation2 + $0x90] sm:$0xff] }
 0x16d   : > { %v1286_v60 = vadd.f32 %v1233_v50, %v1026_v59  ;;  %954 = vst.msk [vmem:[#allocation2 + $0x98] sm:$0xff] %vm203_vm2, %v922_v55  ;;  %v666_v50 = vld [vmem:[#allocation2 + $0xb8] sm:$0xff] }
 0x16e   : > { %v1390_v61 = vld [vmem:[#allocation2 + $0x88] sm:$0xff] }
 0x16f   : > { %v1650_v62 = vadd.f32 %v1595_v38, %v1390_v61  ;;  %1318 = vst.msk [vmem:[#allocation2 + $0x90] sm:$0xff] %vm203_vm2, %v1286_v60  ;;  %v4979_v38 = vld [vmem:[%s5544_s20 + $0x18] sm:$0xff]  ;;  %v4923_v61 = vld [vmem:[%s5528_s9 + $0x20] sm:$0xff] }
 0x170   : > { %v1753_v63 = vld [vmem:[#allocation2 + $0x80] sm:$0xff]  ;;  %v1235_v0 = vpop.f32.mrf.mxu2  ;;  %3670 = vperm.xlu1 %5007, %v3624_v41  }
 0x171   : > { %1682 = vst.msk [vmem:[#allocation2 + $0x88] sm:$0xff] %vm203_vm2, %v1650_v62  ;;  %v2013_v1 = vadd.f32 %v5553_v16, %v1753_v63  ;;  %v1600_v4 = vpop.f32.mrf.mxu3  ;;  %v4942_v62 = vld [vmem:[%s5533_s12 + $0x20] sm:$0xff] }
 0x172   : > { %v873_v6 = vpop.f32.mrf.mxu1 }
 0x173   : > { %2045 = vst.msk [vmem:[#allocation2 + $0x80] sm:$0xff] %vm203_vm2, %v2013_v1  ;;  %v923_v9 = vadd.f32 %v873_v6, %v663_v5  ;;  %v5608_v10 = vpop.f32.mrf.mxu0 }
 0x174   : > { %v1027_v12 = vld [vmem:[#allocation2 + $0x98] sm:$0xff] }
 0x175   : > { %v1287_v13 = vadd.f32 %v1235_v0, %v1027_v12  ;;  %955 = vst.msk [vmem:[#allocation2 + $0xa0] sm:$0xff] %vm203_vm2, %v923_v9  ;;  %4530 = vmatmul.msk.bf16.gmra.mxu1 %vm396_vm1, %v4921_v2  ;;  %4622 = vmatmul.msk.bf16.gmra.mxu2 %vm396_vm1, %v4940_v3  ;;  %v667_v0 = vld [vmem:[#allocation2 + $0xc0] sm:$0xff] }
 0x176   : > { %v1391_v14 = vld [vmem:[#allocation2 + $0x90] sm:$0xff]  ;;  %4714 = vmatmul.msk.bf16.gmra.mxu3 %vm396_vm1, %v4959_v7  ;;  %4806 = vmatmul.msk.bf16.gmra.mxu0 %vm396_vm1, %v4978_v8  ;;  %v4961_v2 = vld [vmem:[%s5539_s17 + $0x20] sm:$0xff] }
 0x177   : > { %v1651_v15 = vadd.f32 %v1598_v52, %v1391_v14  ;;  %1319 = vst.msk [vmem:[#allocation2 + $0x98] sm:$0xff] %vm203_vm2, %v1287_v13  ;;  %v4980_v3 = vld [vmem:[%s5544_s20 + $0x20] sm:$0xff]  ;;  %v668_v14 = vld [vmem:[#allocation2 + $0xc8] sm:$0xff] }
 0x178   : > { %v1754_v16 = vld [vmem:[#allocation2 + $0x88] sm:$0xff]  ;;  %v1238_v17 = vpop.f32.mrf.mxu2 }
 0x179   : > { %1683 = vst.msk [vmem:[#allocation2 + $0x90] sm:$0xff] %vm203_vm2, %v1651_v15  ;;  %v2014_v18 = vadd.f32 %v5566_v28, %v1754_v16  ;;  %v1603_v19 = vpop.f32.mrf.mxu3 }
 0x17a   : > { %v875_v21 = vpop.f32.mrf.mxu1 }
 0x17b   : > { %2046 = vst.msk [vmem:[#allocation2 + $0x88] sm:$0xff] %vm203_vm2, %v2014_v18  ;;  %v924_v22 = vadd.f32 %v875_v21, %v664_v20  ;;  %v5620_v23 = vpop.f32.mrf.mxu0  ;;  %v3627_v18 = vld [vmem:[%s5591_s24 + $0x30] sm:$0xff] }
 0x17c   : > { %v1028_v25 = vld [vmem:[#allocation2 + $0xa0] sm:$0xff]  ;;  %3685 = vperm.xlu0 %5006, %v3627_v18  }
 0x17d   : > { %v1288_v26 = vadd.f32 %v1238_v17, %v1028_v25  ;;  %956 = vst.msk [vmem:[#allocation2 + $0xa8] sm:$0xff] %vm203_vm2, %v924_v22 }
 0x17e   : > { %v1392_v27 = vld [vmem:[#allocation2 + $0x98] sm:$0xff] }
 0x17f   : > { %v1652_v28 = vadd.f32 %v1600_v4, %v1392_v27  ;;  %1320 = vst.msk [vmem:[#allocation2 + $0xa0] sm:$0xff] %vm203_vm2, %v1288_v26  ;;  %v4924_v26 = vld [vmem:[%s5528_s9 + $0x28] sm:$0xff] }
 0x180   : > { %v1755_v29 = vld [vmem:[#allocation2 + $0x90] sm:$0xff]  ;;  %v1240_v30 = vpop.f32.mrf.mxu2  ;;  %v4943_v27 = vld [vmem:[%s5533_s12 + $0x28] sm:$0xff] }
 0x181   : > { %1684 = vst.msk [vmem:[#allocation2 + $0x98] sm:$0xff] %vm203_vm2, %v1652_v28  ;;  %v2015_v31 = vadd.f32 %v5579_v44, %v1755_v29  ;;  %v1605_v34 = vpop.f32.mrf.mxu3  ;;  %v669_v29 = vld [vmem:[#allocation2 + $0xd0] sm:$0xff] }
 0x182   : > { %v878_v36 = vpop.f32.mrf.mxu1 }
 0x183   : > { %2047 = vst.msk [vmem:[#allocation2 + $0x90] sm:$0xff] %vm203_vm2, %v2015_v31  ;;  %v925_v39 = vadd.f32 %v878_v36, %v665_v35  ;;  %v5632_v40 = vpop.f32.mrf.mxu0  ;;  %v4962_v31 = vld [vmem:[%s5539_s17 + $0x28] sm:$0xff]  ;;  %v3625_v35 = vld [vmem:[%s5591_s24 + $0x20] sm:$0xff]  ;;  %v3628_v36 = vld [vmem:[%s5591_s24 + $0x38] sm:$0xff] }
 0x184   : > { %v1029_v42 = vld [vmem:[#allocation2 + $0xa8] sm:$0xff]  ;;  %3675 = vperm.xlu2 %5008, %v3625_v35   ;;  %3690 = vperm.xlu1 %5007, %v3628_v36  }
 0x185   : > { %v1289_v43 = vadd.f32 %v1240_v30, %v1029_v42  ;;  %957 = vst.msk [vmem:[#allocation2 + $0xb0] sm:$0xff] %vm203_vm2, %v925_v39  ;;  %4531 = vmatmul.msk.bf16.gmra.mxu1 %vm396_vm1, %v4922_v32  ;;  %4623 = vmatmul.msk.bf16.gmra.mxu2 %vm396_vm1, %v4941_v33  ;;  %v4981_v32 = vld [vmem:[%s5544_s20 + $0x28] sm:$0xff] }
 0x186   : > { %v1393_v44 = vld [vmem:[#allocation2 + $0xa0] sm:$0xff]  ;;  %4715 = vmatmul.msk.bf16.gmra.mxu3 %vm396_vm1, %v4960_v37  ;;  %4807 = vmatmul.msk.bf16.gmra.mxu0 %vm396_vm1, %v4979_v38 }
 0x187   : > { %v1653_v45 = vadd.f32 %v1603_v19, %v1393_v44  ;;  %1321 = vst.msk [vmem:[#allocation2 + $0xa8] sm:$0xff] %vm203_vm2, %v1289_v43 }
 0x188   : > { %v1756_v46 = vld [vmem:[#allocation2 + $0x98] sm:$0xff]  ;;  %v1243_v47 = vpop.f32.mrf.mxu2 }
 0x189   : > { %1685 = vst.msk [vmem:[#allocation2 + $0xa0] sm:$0xff] %vm203_vm2, %v1653_v45  ;;  %v2016_v48 = vadd.f32 %v5596_v56, %v1756_v46  ;;  %v1608_v49 = vpop.f32.mrf.mxu3  ;;  %v670_v45 = vld [vmem:[#allocation2 + $0xd8] sm:$0xff] }
 0x18a   : > { %v880_v51 = vpop.f32.mrf.mxu1 }
 0x18b   : > { %2048 = vst.msk [vmem:[#allocation2 + $0x98] sm:$0xff] %vm203_vm2, %v2016_v48  ;;  %v926_v52 = vadd.f32 %v880_v51, %v666_v50  ;;  %v5644_v53 = vpop.f32.mrf.mxu0 }
 0x18c   : > { %v1030_v54 = vld [vmem:[#allocation2 + $0xb0] sm:$0xff] }
 0x18d   : > { %v1290_v55 = vadd.f32 %v1243_v47, %v1030_v54  ;;  %958 = vst.msk [vmem:[#allocation2 + $0xb8] sm:$0xff] %vm203_vm2, %v926_v52 }
 0x18e   : > { %v1394_v57 = vld [vmem:[#allocation2 + $0xa8] sm:$0xff] }
 0x18f   : > { %v1654_v58 = vadd.f32 %v1605_v34, %v1394_v57  ;;  %1322 = vst.msk [vmem:[#allocation2 + $0xb0] sm:$0xff] %vm203_vm2, %v1290_v55 }
 0x190   : > { %v1757_v56 = vld [vmem:[#allocation2 + $0xa0] sm:$0xff]  ;;  %v1245_v59 = vpop.f32.mrf.mxu2 }
 0x191   : > { %1686 = vst.msk [vmem:[#allocation2 + $0xa8] sm:$0xff] %vm203_vm2, %v1654_v58  ;;  %v2017_v60 = vadd.f32 %v5608_v10, %v1757_v56  ;;  %v1610_v63 = vpop.f32.mrf.mxu3  ;;  %v4925_v58 = vld [vmem:[%s5528_s9 + $0x30] sm:$0xff] }
 0x192   : > { %v883_v1 = vpop.f32.mrf.mxu1  ;;  %v4944_v56 = vld [vmem:[%s5533_s12 + $0x30] sm:$0xff] }
 0x193   : > { %2049 = vst.msk [vmem:[#allocation2 + $0xa0] sm:$0xff] %vm203_vm2, %v2017_v60  ;;  %v927_v4 = vadd.f32 %v883_v1, %v667_v0  ;;  %v5655_v5 = vpop.f32.mrf.mxu0  ;;  %v671_v60 = vld [vmem:[#allocation2 + $0xe0] sm:$0xff] }
 0x194   : > { %v1031_v6 = vld [vmem:[#allocation2 + $0xb8] sm:$0xff] }
 0x195   : > { %v1291_v7 = vadd.f32 %v1245_v59, %v1031_v6  ;;  %959 = vst.msk [vmem:[#allocation2 + $0xc0] sm:$0xff] %vm203_vm2, %v927_v4  ;;  %4532 = vmatmul.msk.bf16.gmra.mxu1 %vm396_vm1, %v4923_v61  ;;  %4624 = vmatmul.msk.bf16.gmra.mxu2 %vm396_vm1, %v4942_v62  ;;  %v4963_v62 = vld [vmem:[%s5539_s17 + $0x30] sm:$0xff] }
 0x196   : > { %v1395_v8 = vld [vmem:[#allocation2 + $0xb0] sm:$0xff]  ;;  %4716 = vmatmul.msk.bf16.gmra.mxu3 %vm396_vm1, %v4961_v2  ;;  %4808 = vmatmul.msk.bf16.gmra.mxu0 %vm396_vm1, %v4980_v3  ;;  %v3630_v2 = vld [vmem:[%s5591_s24 + $0x48] sm:$0xff] }
 0x197   : > { %v1655_v9 = vadd.f32 %v1608_v49, %v1395_v8  ;;  %1323 = vst.msk [vmem:[#allocation2 + $0xb8] sm:$0xff] %vm203_vm2, %v1291_v7  ;;  %v3626_v49 = vld [vmem:[%s5591_s24 + $0x28] sm:$0xff]  ;;  %3700 = vperm.xlu0 %5006, %v3630_v2  }
 0x198   : > { %v1758_v10 = vld [vmem:[#allocation2 + $0xa8] sm:$0xff]  ;;  %v1248_v11 = vpop.f32.mrf.mxu2  ;;  %3680 = vperm.xlu2 %5008, %v3626_v49  }
 0x199   : > { %1687 = vst.msk [vmem:[#allocation2 + $0xb0] sm:$0xff] %vm203_vm2, %v1655_v9  ;;  %v2018_v12 = vadd.f32 %v5620_v23, %v1758_v10  ;;  %v1613_v13 = vpop.f32.mrf.mxu3 }
 0x19a   : > { %v885_v15 = vpop.f32.mrf.mxu1 }
 0x19b   : > { %2050 = vst.msk [vmem:[#allocation2 + $0xa8] sm:$0xff] %vm203_vm2, %v2018_v12  ;;  %v928_v16 = vadd.f32 %v885_v15, %v668_v14  ;;  %v5666_v17 = vpop.f32.mrf.mxu0  ;;  %v3631_v15 = vld [vmem:[%s5591_s24 + $0x50] sm:$0xff] }
 0x19c   : > { %v1032_v19 = vld [vmem:[#allocation2 + $0xc0] sm:$0xff]  ;;  %3705 = vperm.xlu1 %5007, %v3631_v15  }
 0x19d   : > { %v1292_v20 = vadd.f32 %v1248_v11, %v1032_v19  ;;  %960 = vst.msk [vmem:[#allocation2 + $0xc8] sm:$0xff] %vm203_vm2, %v928_v16  ;;  %v672_v11 = vld [vmem:[#allocation2 + $0xe8] sm:$0xff] }
 0x19e   : > { %v1396_v21 = vld [vmem:[#allocation2 + $0xb8] sm:$0xff] }
 0x19f   : > { %v1656_v22 = vadd.f32 %v1610_v63, %v1396_v21  ;;  %1324 = vst.msk [vmem:[#allocation2 + $0xc0] sm:$0xff] %vm203_vm2, %v1292_v20  ;;  %v4982_v63 = vld [vmem:[%s5544_s20 + $0x30] sm:$0xff] }
 0x1a0   : > { %v1759_v23 = vld [vmem:[#allocation2 + $0xb0] sm:$0xff]  ;;  %v1250_v24 = vpop.f32.mrf.mxu2 }
 0x1a1   : > { %1688 = vst.msk [vmem:[#allocation2 + $0xb8] sm:$0xff] %vm203_vm2, %v1656_v22  ;;  %v2019_v25 = vadd.f32 %v5632_v40, %v1759_v23  ;;  %v1615_v28 = vpop.f32.mrf.mxu3  ;;  %v4926_v23 = vld [vmem:[%s5528_s9 + $0x38] sm:$0xff] }
 0x1a2   : > { %v888_v30 = vpop.f32.mrf.mxu1 }
 0x1a3   : > { %2051 = vst.msk [vmem:[#allocation2 + $0xb0] sm:$0xff] %vm203_vm2, %v2019_v25  ;;  %v929_v33 = vadd.f32 %v888_v30, %v669_v29  ;;  %v5678_v34 = vpop.f32.mrf.mxu0  ;;  %v4983_v29 = vld [vmem:[%s5544_s20 + $0x38] sm:$0xff] }
 0x1a4   : > { %v1033_v37 = vld [vmem:[#allocation2 + $0xc8] sm:$0xff] }
 0x1a5   : > { %v1293_v38 = vadd.f32 %v1250_v24, %v1033_v37  ;;  %961 = vst.msk [vmem:[#allocation2 + $0xd0] sm:$0xff] %vm203_vm2, %v929_v33  ;;  %4533 = vmatmul.msk.bf16.gmra.mxu1 %vm396_vm1, %v4924_v26  ;;  %4625 = vmatmul.msk.bf16.gmra.mxu2 %vm396_vm1, %v4943_v27  ;;  %v4945_v24 = vld [vmem:[%s5533_s12 + $0x38] sm:$0xff]  ;;  %v673_v26 = vld [vmem:[#allocation2 + $0xf0] sm:$0xff] }
 0x1a6   : > { %v1397_v39 = vld [vmem:[#allocation2 + $0xc0] sm:$0xff]  ;;  %4717 = vmatmul.msk.bf16.gmra.mxu3 %vm396_vm1, %v4962_v31  ;;  %4809 = vmatmul.msk.bf16.gmra.mxu0 %vm396_vm1, %v4981_v32 }
 0x1a7   : > { %v1657_v40 = vadd.f32 %v1613_v13, %v1397_v39  ;;  %1325 = vst.msk [vmem:[#allocation2 + $0xc8] sm:$0xff] %vm203_vm2, %v1293_v38  ;;  %v3629_v32 = vld [vmem:[%s5591_s24 + $0x40] sm:$0xff] }
 0x1a8   : > { %v1760_v41 = vld [vmem:[#allocation2 + $0xb8] sm:$0xff]  ;;  %v1253_v42 = vpop.f32.mrf.mxu2  ;;  %3695 = vperm.xlu2 %5008, %v3629_v32  }
 0x1a9   : > { %1689 = vst.msk [vmem:[#allocation2 + $0xc0] sm:$0xff] %vm203_vm2, %v1657_v40  ;;  %v2020_v43 = vadd.f32 %v5644_v53, %v1760_v41  ;;  %v1618_v44 = vpop.f32.mrf.mxu3  ;;  %v674_v41 = vld [vmem:[#allocation2 + $0xf8] sm:$0xff] }
 0x1aa   : > { %v890_v46 = vpop.f32.mrf.mxu1 }
 0x1ab   : > { %2052 = vst.msk [vmem:[#allocation2 + $0xb8] sm:$0xff] %vm203_vm2, %v2020_v43  ;;  %v930_v47 = vadd.f32 %v890_v46, %v670_v45  ;;  %v5691_v48 = vpop.f32.mrf.mxu0  ;;  %v3633_v45 = vld [vmem:[%s5591_s24 + $0x60] sm:$0xff] }
 0x1ac   : > { %v1034_v50 = vld [vmem:[#allocation2 + $0xd0] sm:$0xff]  ;;  %3715 = vperm.xlu0 %5006, %v3633_v45  }
 0x1ad   : > { %v1294_v51 = vadd.f32 %v1253_v42, %v1034_v50  ;;  %962 = vst.msk [vmem:[#allocation2 + $0xd8] sm:$0xff] %vm203_vm2, %v930_v47 }
 0x1ae   : > { %v1398_v52 = vld [vmem:[#allocation2 + $0xc8] sm:$0xff] }
 0x1af   : > { %v1658_v53 = vadd.f32 %v1615_v28, %v1398_v52  ;;  %1326 = vst.msk [vmem:[#allocation2 + $0xd0] sm:$0xff] %vm203_vm2, %v1294_v51  ;;  %v4964_v28 = vld [vmem:[%s5539_s17 + $0x38] sm:$0xff] }
 0x1b0   : > { %v1761_v54 = vld [vmem:[#allocation2 + $0xc0] sm:$0xff]  ;;  %v1255_v55 = vpop.f32.mrf.mxu2 }
 0x1b1   : > { %1690 = vst.msk [vmem:[#allocation2 + $0xc8] sm:$0xff] %vm203_vm2, %v1658_v53  ;;  %v2021_v57 = vadd.f32 %v5655_v5, %v1761_v54  ;;  %v1620_v59 = vpop.f32.mrf.mxu3  ;;  %v4927_v53 = vld [vmem:[%s5528_s9 + $0x40] sm:$0xff] }
 0x1b2   : > { %v893_v61 = vpop.f32.mrf.mxu1  ;;  %v4946_v54 = vld [vmem:[%s5533_s12 + $0x40] sm:$0xff] }
 0x1b3   : > { %2053 = vst.msk [vmem:[#allocation2 + $0xc0] sm:$0xff] %vm203_vm2, %v2021_v57  ;;  %v931_v0 = vadd.f32 %v893_v61, %v671_v60  ;;  %v5703_v1 = vpop.f32.mrf.mxu0  ;;  %v2102_v57 = vld [vmem:[#allocation2] sm:$0xff] }
 0x1b4   : > { %v1035_v3 = vld [vmem:[#allocation2 + $0xd8] sm:$0xff] }
 0x1b5   : > { %v1295_v4 = vadd.f32 %v1255_v55, %v1035_v3  ;;  %963 = vst.msk [vmem:[#allocation2 + $0xe0] sm:$0xff] %vm203_vm2, %v931_v0  ;;  %4534 = vmatmul.msk.bf16.gmra.mxu1 %vm396_vm1, %v4925_v58  ;;  %4626 = vmatmul.msk.bf16.gmra.mxu2 %vm396_vm1, %v4944_v56  ;;  %v4965_v56 = vld [vmem:[%s5539_s17 + $0x40] sm:$0xff] }
 0x1b6   : > { %v1399_v5 = vld [vmem:[#allocation2 + $0xd0] sm:$0xff]  ;;  %4718 = vmatmul.msk.bf16.gmra.mxu3 %vm396_vm1, %v4963_v62  ;;  %4810 = vmatmul.msk.bf16.gmra.mxu0 %vm396_vm1, %v4982_v63  ;;  %v3634_v62 = vld [vmem:[%s5591_s24 + $0x68] sm:$0xff] }
 0x1b7   : > { %v1659_v6 = vadd.f32 %v1618_v44, %v1399_v5  ;;  %1327 = vst.msk [vmem:[#allocation2 + $0xd8] sm:$0xff] %vm203_vm2, %v1295_v4  ;;  %3720 = vperm.xlu1 %5007, %v3634_v62  }
 0x1b8   : > { %v1762_v7 = vld [vmem:[#allocation2 + $0xc8] sm:$0xff]  ;;  %v1258_v8 = vpop.f32.mrf.mxu2 }
 0x1b9   : > { %1691 = vst.msk [vmem:[#allocation2 + $0xd0] sm:$0xff] %vm203_vm2, %v1659_v6  ;;  %v2022_v9 = vadd.f32 %v5666_v17, %v1762_v7  ;;  %v1623_v10 = vpop.f32.mrf.mxu3  ;;  %v2103_v7 = vld [vmem:[#allocation2 + $0x8] sm:$0xff] }
 0x1ba   : > { %v895_v12 = vpop.f32.mrf.mxu1 }
 0x1bb   : > { %2054 = vst.msk [vmem:[#allocation2 + $0xc8] sm:$0xff] %vm203_vm2, %v2022_v9  ;;  %v932_v13 = vadd.f32 %v895_v12, %v672_v11  ;;  %v5715_v14 = vpop.f32.mrf.mxu0  ;;  %v3632_v11 = vld [vmem:[%s5591_s24 + $0x58] sm:$0xff] }
 0x1bc   : > { %v1036_v16 = vld [vmem:[#allocation2 + $0xe0] sm:$0xff]  ;;  %3710 = vperm.xlu2 %5008, %v3632_v11  }
 0x1bd   : > { %v1296_v18 = vadd.f32 %v1258_v8, %v1036_v16  ;;  %964 = vst.msk [vmem:[#allocation2 + $0xe8] sm:$0xff] %vm203_vm2, %v932_v13 }
 0x1be   : > { %v1400_v19 = vld [vmem:[#allocation2 + $0xd8] sm:$0xff] }
 0x1bf   : > { %v1660_v17 = vadd.f32 %v1620_v59, %v1400_v19  ;;  %1328 = vst.msk [vmem:[#allocation2 + $0xe0] sm:$0xff] %vm203_vm2, %v1296_v18  ;;  %v4984_v59 = vld [vmem:[%s5544_s20 + $0x40] sm:$0xff] }
 0x1c0   : > { %v1763_v20 = vld [vmem:[#allocation2 + $0xd0] sm:$0xff]  ;;  %v1260_v21 = vpop.f32.mrf.mxu2 }
 0x1c1   : > { %1692 = vst.msk [vmem:[#allocation2 + $0xd8] sm:$0xff] %vm203_vm2, %v1660_v17  ;;  %v2023_v22 = vadd.f32 %v5678_v34, %v1763_v20  ;;  %v1625_v25 = vpop.f32.mrf.mxu3  ;;  %v4928_v17 = vld [vmem:[%s5528_s9 + $0x48] sm:$0xff] }
 0x1c2   : > { %v898_v27 = vpop.f32.mrf.mxu1  ;;  %v4947_v20 = vld [vmem:[%s5533_s12 + $0x48] sm:$0xff] }
 0x1c3   : > { %2055 = vst.msk [vmem:[#allocation2 + $0xd0] sm:$0xff] %vm203_vm2, %v2023_v22  ;;  %v933_v30 = vadd.f32 %v898_v27, %v673_v26  ;;  %v5727_v31 = vpop.f32.mrf.mxu0  ;;  %v2104_v22 = vld [vmem:[#allocation2 + $0x10] sm:$0xff] }
 0x1c4   : > { %v1037_v33 = vld [vmem:[#allocation2 + $0xe8] sm:$0xff] }
 0x1c5   : > { %v1297_v35 = vadd.f32 %v1260_v21, %v1037_v33  ;;  %965 = vst.msk [vmem:[#allocation2 + $0xf0] sm:$0xff] %vm203_vm2, %v933_v30  ;;  %4535 = vmatmul.msk.bf16.gmra.mxu1 %vm396_vm1, %v4926_v23  ;;  %4627 = vmatmul.msk.bf16.gmra.mxu2 %vm396_vm1, %v4945_v24  ;;  %v4966_v24 = vld [vmem:[%s5539_s17 + $0x48] sm:$0xff] }
 0x1c6   : > { %v1401_v34 = vld [vmem:[#allocation2 + $0xe0] sm:$0xff]  ;;  %4719 = vmatmul.msk.bf16.gmra.mxu3 %vm396_vm1, %v4964_v28  ;;  %4811 = vmatmul.msk.bf16.gmra.mxu0 %vm396_vm1, %v4983_v29  ;;  %v3636_v29 = vld [vmem:[%s5591_s24 + $0x78] sm:$0xff] }
 0x1c7   : > { %v1661_v36 = vadd.f32 %v1623_v10, %v1401_v34  ;;  %1329 = vst.msk [vmem:[#allocation2 + $0xe8] sm:$0xff] %vm203_vm2, %v1297_v35  ;;  %3730 = vperm.xlu0 %5006, %v3636_v29  }
 0x1c8   : > { %v1764_v37 = vld [vmem:[#allocation2 + $0xd8] sm:$0xff]  ;;  %v1263_v38 = vpop.f32.mrf.mxu2 }
 0x1c9   : > { %1693 = vst.msk [vmem:[#allocation2 + $0xe0] sm:$0xff] %vm203_vm2, %v1661_v36  ;;  %v2024_v39 = vadd.f32 %v5691_v48, %v1764_v37  ;;  %v1628_v40 = vpop.f32.mrf.mxu3  ;;  %v2105_v37 = vld [vmem:[#allocation2 + $0x18] sm:$0xff] }
 0x1ca   : > { %v900_v42 = vpop.f32.mrf.mxu1 }
 0x1cb   : > { %2056 = vst.msk [vmem:[#allocation2 + $0xd8] sm:$0xff] %vm203_vm2, %v2024_v39  ;;  %v934_v43 = vadd.f32 %v900_v42, %v674_v41  ;;  %v5739_v44 = vpop.f32.mrf.mxu0  ;;  %v3637_v42 = vld [vmem:[%s5591_s24 + $0x80] sm:$0xff] }
 0x1cc   : > { %v1038_v46 = vld [vmem:[#allocation2 + $0xf0] sm:$0xff]  ;;  %3735 = vperm.xlu1 %5007, %v3637_v42   ;;  %v3645_v42 = vld [vmem:[%s5591_s24 + $0xc0] sm:$0xff] }
 0x1cd   : > { %v1298_v47 = vadd.f32 %v1263_v38, %v1038_v46  ;;  %966 = vst.msk [vmem:[#allocation2 + $0xf8] sm:$0xff] %vm203_vm2, %v934_v43 }
 0x1ce   : > { %v1402_v49 = vld [vmem:[#allocation2 + $0xe8] sm:$0xff] }
 0x1cf   : > { %v1662_v48 = vadd.f32 %v1625_v25, %v1402_v49  ;;  %1330 = vst.msk [vmem:[#allocation2 + $0xf0] sm:$0xff] %vm203_vm2, %v1298_v47  ;;  %v4985_v25 = vld [vmem:[%s5544_s20 + $0x48] sm:$0xff] }
 0x1d0   : > { %v1765_v50 = vld [vmem:[#allocation2 + $0xe0] sm:$0xff]  ;;  %v1265_v51 = vpop.f32.mrf.mxu2 }
 0x1d1   : > { %1694 = vst.msk [vmem:[#allocation2 + $0xe8] sm:$0xff] %vm203_vm2, %v1662_v48  ;;  %v2025_v52 = vadd.f32 %v5703_v1, %v1765_v50  ;;  %v1630_v55 = vpop.f32.mrf.mxu3  ;;  %v4929_v48 = vld [vmem:[%s5528_s9 + $0x50] sm:$0xff] }
 0x1d2   : > { %v2282_v58 = vpop.f32.mrf.mxu1  ;;  %v4948_v50 = vld [vmem:[%s5533_s12 + $0x50] sm:$0xff] }
 0x1d3   : > { %2057 = vst.msk [vmem:[#allocation2 + $0xe0] sm:$0xff] %vm203_vm2, %v2025_v52  ;;  %v2362_v60 = vadd.f32 %v2282_v58, %v2102_v57  ;;  %v5751_v61 = vpop.f32.mrf.mxu0  ;;  %v2106_v52 = vld [vmem:[#allocation2 + $0x20] sm:$0xff] }
 0x1d4   : > { %v1039_v63 = vld [vmem:[#allocation2 + $0xf8] sm:$0xff] }
 0x1d5   : > { %v1299_v0 = vadd.f32 %v1265_v51, %v1039_v63  ;;  %2394 = vst.msk [vmem:[#allocation2] sm:$0xff] %vm203_vm2, %v2362_v60  ;;  %4536 = vmatmul.msk.bf16.gmra.mxu1 %vm396_vm1, %v4927_v53  ;;  %4628 = vmatmul.msk.bf16.gmra.mxu2 %vm396_vm1, %v4946_v54  ;;  %v4967_v54 = vld [vmem:[%s5539_s17 + $0x50] sm:$0xff]  ;;  %v3640_v60 = vld [vmem:[%s5591_s24 + $0x98] sm:$0xff] }
 0x1d6   : > { %v1403_v1 = vld [vmem:[#allocation2 + $0xf0] sm:$0xff]  ;;  %4720 = vmatmul.msk.bf16.gmra.mxu3 %vm396_vm1, %v4965_v56  ;;  %4812 = vmatmul.msk.bf16.gmra.mxu0 %vm396_vm1, %v4984_v59 }
 0x1d7   : > { %v1663_v2 = vadd.f32 %v1628_v40, %v1403_v1  ;;  %1331 = vst.msk [vmem:[#allocation2 + $0xf8] sm:$0xff] %vm203_vm2, %v1299_v0  ;;  %v3635_v59 = vld [vmem:[%s5591_s24 + $0x70] sm:$0xff]  ;;  %v5813_v1 = vld [vmem:[%s6148_s2] ss:$0 sm:$0xff]  ;;  %3750 = vperm.xlu1 %5007, %v3640_v60   ;;  %v3638_v60 = vld [vmem:[%s5591_s24 + $0x88] sm:$0xff] }
 0x1d8   : > { %v1766_v3 = vld [vmem:[#allocation2 + $0xe8] sm:$0xff]  ;;  %v2647_v4 = vpop.f32.mrf.mxu2  ;;  %3725 = vperm.xlu2 %5008, %v3635_v59  }
 0x1d9   : > { %1695 = vst.msk [vmem:[#allocation2 + $0xf0] sm:$0xff] %vm203_vm2, %v1663_v2  ;;  %v2026_v5 = vadd.f32 %v5715_v14, %v1766_v3  ;;  %v3012_v6 = vpop.f32.mrf.mxu3 }
 0x1da   : > { %v2284_v8 = vpop.f32.mrf.mxu1 }
 0x1db   : > { %2058 = vst.msk [vmem:[#allocation2 + $0xe8] sm:$0xff] %vm203_vm2, %v2026_v5  ;;  %v2363_v9 = vadd.f32 %v2284_v8, %v2103_v7  ;;  %v5763_v10 = vpop.f32.mrf.mxu0 }
 0x1dc   : > { %v2467_v12 = vld [vmem:[#allocation2] sm:$0xff] }
 0x1dd   : > { %v2727_v13 = vadd.f32 %v2647_v4, %v2467_v12  ;;  %2395 = vst.msk [vmem:[#allocation2 + $0x8] sm:$0xff] %vm203_vm2, %v2363_v9  ;;  %v3656_v9 = vpop.permute.xlu0 %3655 }
 0x1de   : > { %v1404_v15 = vld [vmem:[#allocation2 + $0xf8] sm:$0xff] }
 0x1df   : > { %v1664_v14 = vadd.f32 %v1630_v55, %v1404_v15  ;;  %2759 = vst.msk [vmem:[#allocation2] sm:$0xff] %vm203_vm2, %v2727_v13  ;;  %v4986_v55 = vld [vmem:[%s5544_s20 + $0x50] sm:$0xff] }
 0x1e0   : > { %v1767_v16 = vld [vmem:[#allocation2 + $0xf0] sm:$0xff]  ;;  %v2649_v18 = vpop.f32.mrf.mxu2  ;;  %3740 = vperm.xlu2 %5008, %v3638_v60   ;;  %v4970_v60 = vld [vmem:[%s5539_s17 + $0x68] sm:$0xff] }
 0x1e1   : > { %1696 = vst.msk [vmem:[#allocation2 + $0xf8] sm:$0xff] %vm203_vm2, %v1664_v14  ;;  %v2027_v19 = vadd.f32 %v5727_v31, %v1767_v16  ;;  %v3014_v21 = vpop.f32.mrf.mxu3  ;;  %v3643_v14 = vld [vmem:[%s5591_s24 + $0xb0] sm:$0xff] }
 0x1e2   : > { %v2287_v23 = vpop.f32.mrf.mxu1  ;;  %3765 = vperm.xlu1 %5007, %v3643_v14  }
 0x1e3   : > { %2059 = vst.msk [vmem:[#allocation2 + $0xf0] sm:$0xff] %vm203_vm2, %v2027_v19  ;;  %v2364_v26 = vadd.f32 %v2287_v23, %v2104_v22  ;;  %v5775_v27 = vpop.f32.mrf.mxu0 }
 0x1e4   : > { %v2468_v28 = vld [vmem:[#allocation2 + $0x8] sm:$0xff] }
 0x1e5   : > { %v2728_v30 = vadd.f32 %v2649_v18, %v2468_v28  ;;  %2396 = vst.msk [vmem:[#allocation2 + $0x10] sm:$0xff] %vm203_vm2, %v2364_v26  ;;  %4537 = vmatmul.msk.bf16.gmra.mxu1 %vm396_vm1, %v4928_v17  ;;  %4629 = vmatmul.msk.bf16.gmra.mxu2 %vm396_vm1, %v4947_v20  ;;  %v4930_v26 = vld [vmem:[%s5528_s9 + $0x58] sm:$0xff] }
 0x1e6   : > { %v2832_v31 = vld [vmem:[#allocation2] sm:$0xff]  ;;  %4721 = vmatmul.msk.bf16.gmra.mxu3 %vm396_vm1, %v4966_v24  ;;  %4813 = vmatmul.msk.bf16.gmra.mxu0 %vm396_vm1, %v4985_v25  ;;  %v2108_v25 = vld [vmem:[#allocation2 + $0x30] sm:$0xff]  ;;  %v4949_v28 = vld [vmem:[%s5533_s12 + $0x58] sm:$0xff] }
 0x1e7   : > { %v3092_v32 = vadd.f32 %v3012_v6, %v2832_v31  ;;  %2760 = vst.msk [vmem:[#allocation2 + $0x8] sm:$0xff] %vm203_vm2, %v2728_v30  ;;  %v2107_v6 = vld [vmem:[#allocation2 + $0x28] sm:$0xff] }
 0x1e8   : > { %v1768_v33 = vld [vmem:[#allocation2 + $0xf8] sm:$0xff]  ;;  %v2652_v35 = vpop.f32.mrf.mxu2 }
 0x1e9   : > { %3124 = vst.msk [vmem:[#allocation2] sm:$0xff] %vm203_vm2, %v3092_v32  ;;  %v2028_v34 = vadd.f32 %v5739_v44, %v1768_v33  ;;  %v3017_v36 = vpop.f32.mrf.mxu3  ;;  %v4968_v32 = vld [vmem:[%s5539_s17 + $0x58] sm:$0xff] }
 0x1ea   : > { %v2289_v38 = vpop.f32.mrf.mxu1  ;;  %v4987_v33 = vld [vmem:[%s5544_s20 + $0x58] sm:$0xff] }
 0x1eb   : > { %2060 = vst.msk [vmem:[#allocation2 + $0xf8] sm:$0xff] %vm203_vm2, %v2028_v34  ;;  %v2365_v39 = vadd.f32 %v2289_v38, %v2105_v37  ;;  %v5787_v40 = vpop.f32.mrf.mxu0  ;;  %v3661_v37 = vpop.permute.xlu0 %3660  ;;  %v3646_v38 = vld [vmem:[%s5591_s24 + $0xc8] sm:$0xff] }
 0x1ec   : > { %v2469_v41 = vld [vmem:[#allocation2 + $0x10] sm:$0xff]  ;;  %3780 = vperm.xlu1 %5007, %v3646_v38  }
 0x1ed   : > { %v2729_v43 = vadd.f32 %v2652_v35, %v2469_v41  ;;  %2397 = vst.msk [vmem:[#allocation2 + $0x18] sm:$0xff] %vm203_vm2, %v2365_v39 }
 0x1ee   : > { %v2833_v45 = vld [vmem:[#allocation2 + $0x8] sm:$0xff] }
 0x1ef   : > { %v3093_v44 = vadd.f32 %v3014_v21, %v2833_v45  ;;  %2761 = vst.msk [vmem:[#allocation2 + $0x10] sm:$0xff] %vm203_vm2, %v2729_v43 }
 0x1f0   : > { %v3197_v46 = vld [vmem:[#allocation2] sm:$0xff]  ;;  %v2654_v47 = vpop.f32.mrf.mxu2 }
 0x1f1   : > { %3125 = vst.msk [vmem:[#allocation2 + $0x8] sm:$0xff] %vm203_vm2, %v3093_v44  ;;  %v3457_v49 = vadd.f32 %v5751_v61, %v3197_v46  ;;  %v3019_v51 = vpop.f32.mrf.mxu3  ;;  %v3639_v61 = vld [vmem:[%s5591_s24 + $0x90] sm:$0xff] }
 0x1f2   : > { %v2292_v53 = vpop.f32.mrf.mxu1  ;;  %3745 = vperm.xlu0 %5006, %v3639_v61  }
 0x1f3   : > { %3489 = vst.msk [vmem:[#allocation2] sm:$0xff] %vm203_vm2, %v3457_v49  ;;  %v2366_v57 = vadd.f32 %v2292_v53, %v2106_v52  ;;  %v5799_v58 = vpop.f32.mrf.mxu0 }
 0x1f4   : > { %v2470_v56 = vld [vmem:[#allocation2 + $0x18] sm:$0xff] }
 0x1f5   : > { %v2730_v62 = vadd.f32 %v2654_v47, %v2470_v56  ;;  %2398 = vst.msk [vmem:[#allocation2 + $0x20] sm:$0xff] %vm203_vm2, %v2366_v57  ;;  %4538 = vmatmul.msk.bf16.gmra.mxu1 %vm396_vm1, %v4929_v48  ;;  %4630 = vmatmul.msk.bf16.gmra.mxu2 %vm396_vm1, %v4948_v50 }
 0x1f6   : > { %v2834_v63 = vld [vmem:[#allocation2 + $0x10] sm:$0xff]  ;;  %4722 = vmatmul.msk.bf16.gmra.mxu3 %vm396_vm1, %v4967_v54  ;;  %4814 = vmatmul.msk.bf16.gmra.mxu0 %vm396_vm1, %v4986_v55  ;;  %v3666_v54 = vpop.permute.xlu1 %3665 }
 0x1f7   : > { %v3094_v0 = vadd.f32 %v3017_v36, %v2834_v63  ;;  %2762 = vst.msk [vmem:[#allocation2 + $0x18] sm:$0xff] %vm203_vm2, %v2730_v62  ;;  %v3649_v62 = vld [vmem:[%s5591_s24 + $0xe0] sm:$0xff]  ;;  %v3648_v63 = vld [vmem:[%s5591_s24 + $0xd8] sm:$0xff] }
 0x1f8   : > { %v3198_v2 = vld [vmem:[#allocation2 + $0x8] sm:$0xff]  ;;  %v2657_v3 = vpop.f32.mrf.mxu2  ;;  %3795 = vperm.xlu1 %5007, %v3649_v62  }
 0x1f9   : > { %3126 = vst.msk [vmem:[#allocation2 + $0x10] sm:$0xff] %vm203_vm2, %v3094_v0  ;;  %v3458_v4 = vadd.f32 %v5763_v10, %v3198_v2  ;;  %v3022_v5 = vpop.f32.mrf.mxu3  ;;  %v3642_v10 = vld [vmem:[%s5591_s24 + $0xa8] sm:$0xff] }
 0x1fa   : > { %v2294_v7 = vpop.f32.mrf.mxu1  ;;  %v3521_v8 = vld [vmem:[#allocation2] sm:$0xff]  ;;  %3760 = vperm.xlu0 %5006, %v3642_v10   ;;  %v4989_v62 = vld [vmem:[%s5544_s20 + $0x68] sm:$0xff] }
 0x1fb   : > { %3490 = vst.msk [vmem:[#allocation2 + $0x8] sm:$0xff] %vm203_vm2, %v3458_v4  ;;  %v2367_v11 = vadd.f32 %v2294_v7, %v2107_v6  ;;  %v3557_v12 = vadd.f32 %v5813_v1, %v3521_v8  ;;  %v5819_v13 = vpop.f32.mrf.mxu0  ;;  %v2110_v8 = vld [vmem:[#allocation2 + $0x40] sm:$0xff] }
 0x1fc   : > { %v2471_v15 = vld [vmem:[#allocation2 + $0x20] sm:$0xff] }
 0x1fd   : > { %v2731_v16 = vadd.f32 %v2657_v3, %v2471_v15  ;;  %2399 = vst.msk [vmem:[#allocation2 + $0x28] sm:$0xff] %vm203_vm2, %v2367_v11  ;;  %v3589_v18 = vmax.f32 %v3557_v12, 0.0  ;;  %v4950_v11 = vld [vmem:[%s5533_s12 + $0x60] sm:$0xff] }
 0x1fe   : > { %v2835_v19 = vld [vmem:[#allocation2 + $0x18] sm:$0xff] }
 0x1ff   : > { %v3095_v17 = vadd.f32 %v3019_v51, %v2835_v19  ;;  %2763 = vst.msk [vmem:[#allocation2 + $0x20] sm:$0xff] %vm203_vm2, %v2731_v16  ;;  %v3813_v20 = vmul.f32 %v3656_v9, %v3589_v18  ;;  %v2109_v51 = vld [vmem:[#allocation2 + $0x38] sm:$0xff]  ;;  %v4931_v9 = vld [vmem:[%s5528_s9 + $0x60] sm:$0xff] }
 0x200   : > { %v3199_v21 = vld [vmem:[#allocation2 + $0x10] sm:$0xff]  ;;  %v2659_v22 = vpop.f32.mrf.mxu2  ;;  %v4969_v16 = vld [vmem:[%s5539_s17 + $0x60] sm:$0xff] }
 0x201   : > { %3127 = vst.msk [vmem:[#allocation2 + $0x18] sm:$0xff] %vm203_vm2, %v3095_v17  ;;  %v3459_v23 = vadd.f32 %v5775_v27, %v3199_v21  ;;  %v3845_v24 = vpack.c.bf16 %v3813_v20, %v3813_v20  ;;  %v3024_v29 = vpop.f32.mrf.mxu3  ;;  %v4988_v18 = vld [vmem:[%s5544_s20 + $0x60] sm:$0xff]  ;;  %v3671_v20 = vpop.permute.xlu1 %3670  ;;  %v3652_v21 = vld [vmem:[%s5591_s24 + $0xf8] sm:$0xff] }
 0x202   : > { %v2297_v30 = vpop.f32.mrf.mxu1  ;;  %v3522_v31 = vld [vmem:[#allocation2 + $0x8] sm:$0xff]  ;;  %3775 = vperm.xlu0 %5006, %v3645_v42   ;;  %3810 = vperm.xlu1 %5007, %v3652_v21   ;;  %v3686_v21 = vpop.permute.xlu0 %3685 }
 0x203   : > { %3491 = vst.msk [vmem:[#allocation2 + $0x10] sm:$0xff] %vm203_vm2, %v3459_v23  ;;  %v2368_v35 = vadd.f32 %v2297_v30, %v2108_v25  ;;  %v3558_v34 = vadd.f32 %v5813_v1, %v3522_v31  ;;  %v5839_v36 = vpop.f32.mrf.mxu0 }
 0x204   : > { %3878 = vst.msk [vmem:[%s5829_s30] sm:$0xf] %vm3877_vm3, %v3845_v24  ;;  %v2472_v27 = vld [vmem:[#allocation2 + $0x28] sm:$0xff]  ;;  %v3651_v24 = vld [vmem:[%s5591_s24 + $0xf0] sm:$0xff] }
 0x205   : > { %v2732_v39 = vadd.f32 %v2659_v22, %v2472_v27  ;;  %2400 = vst.msk [vmem:[#allocation2 + $0x30] sm:$0xff] %vm203_vm2, %v2368_v35  ;;  %4539 = vmatmul.msk.bf16.gmra.mxu1 %vm396_vm1, %v4930_v26  ;;  %4631 = vmatmul.msk.bf16.gmra.mxu2 %vm396_vm1, %v4949_v28  ;;  %v3590_v41 = vmax.f32 %v3558_v34, 0.0  ;;  %v2111_v35 = vld [vmem:[#allocation2 + $0x48] sm:$0xff] }
 0x206   : > { %v2836_v43 = vld [vmem:[#allocation2 + $0x20] sm:$0xff]  ;;  %4723 = vmatmul.msk.bf16.gmra.mxu3 %vm396_vm1, %v4968_v32  ;;  %4815 = vmatmul.msk.bf16.gmra.mxu0 %vm396_vm1, %v4987_v33 }
 0x207   : > { %v3096_v45 = vadd.f32 %v3022_v5, %v2836_v43  ;;  %2764 = vst.msk [vmem:[#allocation2 + $0x28] sm:$0xff] %vm203_vm2, %v2732_v39  ;;  %v3814_v44 = vmul.f32 %v3661_v37, %v3590_v41  ;;  %v3676_v37 = vpop.permute.xlu2 %3675  ;;  %v3641_v43 = vld [vmem:[%s5591_s24 + $0xa0] sm:$0xff] }
 0x208   : > { %v3200_v46 = vld [vmem:[#allocation2 + $0x18] sm:$0xff]  ;;  %v2662_v47 = vpop.f32.mrf.mxu2  ;;  %3755 = vperm.xlu2 %5008, %v3641_v43  }
 0x209   : > { %3128 = vst.msk [vmem:[#allocation2 + $0x20] sm:$0xff] %vm203_vm2, %v3096_v45  ;;  %v3460_v49 = vadd.f32 %v5787_v40, %v3200_v46  ;;  %v3846_v48 = vpack.c.bf16 %v3814_v44, %v3814_v44  ;;  %v3027_v50 = vpop.f32.mrf.mxu3 }
 0x20a   : > { %v2299_v52 = vpop.f32.mrf.mxu1  ;;  %v3523_v53 = vld [vmem:[#allocation2 + $0x10] sm:$0xff]  ;;  %3790 = vperm.xlu0 %5006, %v3648_v63  }
 0x20b   : > { %3492 = vst.msk [vmem:[#allocation2 + $0x18] sm:$0xff] %vm203_vm2, %v3460_v49  ;;  %v2369_v55 = vadd.f32 %v2299_v52, %v2109_v51  ;;  %v3559_v57 = vadd.f32 %v5813_v1, %v3523_v53  ;;  %v5855_v56 = vpop.f32.mrf.mxu0  ;;  %v2112_v52 = vld [vmem:[#allocation2 + $0x50] sm:$0xff]  ;;  %v4932_v53 = vld [vmem:[%s5528_s9 + $0x68] sm:$0xff] }
 0x20c   : > { %3879 = vst.msk [vmem:[%s5829_s30 + $0x4] sm:$0xf] %vm3877_vm3, %v3846_v48  ;;  %v2473_v59 = vld [vmem:[#allocation2 + $0x30] sm:$0xff] }
 0x20d   : > { %v2733_v40 = vadd.f32 %v2662_v47, %v2473_v59  ;;  %2401 = vst.msk [vmem:[#allocation2 + $0x38] sm:$0xff] %vm203_vm2, %v2369_v55  ;;  %v3591_v61 = vmax.f32 %v3559_v57, 0.0 }
 0x20e   : > { %v2837_v0 = vld [vmem:[#allocation2 + $0x28] sm:$0xff] }
 0x20f   : > { %v3097_v2 = vadd.f32 %v3024_v29, %v2837_v0  ;;  %2765 = vst.msk [vmem:[#allocation2 + $0x30] sm:$0xff] %vm203_vm2, %v2733_v40  ;;  %v3815_v3 = vmul.f32 %v3666_v54, %v3591_v61  ;;  %v4951_v54 = vld [vmem:[%s5533_s12 + $0x68] sm:$0xff]  ;;  %v3681_v0 = vpop.permute.xlu2 %3680 }
 0x210   : > { %v3201_v4 = vld [vmem:[#allocation2 + $0x20] sm:$0xff]  ;;  %v2664_v5 = vpop.f32.mrf.mxu2 }
 0x211   : > { %3129 = vst.msk [vmem:[#allocation2 + $0x28] sm:$0xff] %vm203_vm2, %v3097_v2  ;;  %v3461_v6 = vadd.f32 %v5799_v58, %v3201_v4  ;;  %v3847_v7 = vpack.c.bf16 %v3815_v3, %v3815_v3  ;;  %v3029_v12 = vpop.f32.mrf.mxu3  ;;  %v3644_v2 = vld [vmem:[%s5591_s24 + $0xb8] sm:$0xff] }
 0x212   : > { %v2302_v15 = vpop.f32.mrf.mxu1  ;;  %v3524_v14 = vld [vmem:[#allocation2 + $0x18] sm:$0xff]  ;;  %3805 = vperm.xlu0 %5006, %v3651_v24   ;;  %3770 = vperm.xlu2 %5008, %v3644_v2  }
 0x213   : > { %3493 = vst.msk [vmem:[#allocation2 + $0x20] sm:$0xff] %vm203_vm2, %v3461_v6  ;;  %v2370_v10 = vadd.f32 %v2302_v15, %v2110_v8  ;;  %v3560_v19 = vadd.f32 %v5813_v1, %v3524_v14  ;;  %v5872_v17 = vpop.f32.mrf.mxu0  ;;  %v2113_v14 = vld [vmem:[#allocation2 + $0x58] sm:$0xff] }
 0x214   : > { %3880 = vst.msk [vmem:[%s5829_s30 + $0x8] sm:$0xf] %vm3877_vm3, %v3847_v7  ;;  %v2474_v58 = vld [vmem:[#allocation2 + $0x38] sm:$0xff] }
 0x215   : > { %v2734_v22 = vadd.f32 %v2664_v5, %v2474_v58  ;;  %2402 = vst.msk [vmem:[#allocation2 + $0x40] sm:$0xff] %vm203_vm2, %v2370_v10  ;;  %4540 = vmatmul.msk.bf16.gmra.mxu1 %vm396_vm1, %v4931_v9  ;;  %4632 = vmatmul.msk.bf16.gmra.mxu2 %vm396_vm1, %v4950_v11  ;;  %v3592_v23 = vmax.f32 %v3560_v19, 0.0 }
 0x216   : > { %v2838_v25 = vld [vmem:[#allocation2 + $0x30] sm:$0xff]  ;;  %4724 = vmatmul.msk.bf16.gmra.mxu3 %vm396_vm1, %v4969_v16  ;;  %4816 = vmatmul.msk.bf16.gmra.mxu0 %vm396_vm1, %v4988_v18 }
 0x217   : > { %v3098_v26 = vadd.f32 %v3027_v50, %v2838_v25  ;;  %2766 = vst.msk [vmem:[#allocation2 + $0x38] sm:$0xff] %vm203_vm2, %v2734_v22  ;;  %v3816_v28 = vmul.f32 %v3671_v20, %v3592_v23  ;;  %v3647_v22 = vld [vmem:[%s5591_s24 + $0xd0] sm:$0xff] }
 0x218   : > { %v3202_v29 = vld [vmem:[#allocation2 + $0x28] sm:$0xff]  ;;  %v2667_v30 = vpop.f32.mrf.mxu2 }
 0x219   : > { %3130 = vst.msk [vmem:[#allocation2 + $0x30] sm:$0xff] %vm203_vm2, %v3098_v26  ;;  %v3462_v31 = vadd.f32 %v5819_v13, %v3202_v29  ;;  %v3848_v32 = vpack.c.bf16 %v3816_v28, %v3816_v28  ;;  %v3032_v33 = vpop.f32.mrf.mxu3 }
 0x21a   : > { %v2304_v34 = vpop.f32.mrf.mxu1  ;;  %v3525_v27 = vld [vmem:[#allocation2 + $0x20] sm:$0xff]  ;;  %3785 = vperm.xlu2 %5008, %v3647_v22  }
 0x21b   : > { %3494 = vst.msk [vmem:[#allocation2 + $0x28] sm:$0xff] %vm203_vm2, %v3462_v31  ;;  %v2371_v38 = vadd.f32 %v2304_v34, %v2111_v35  ;;  %v3561_v39 = vadd.f32 %v5813_v1, %v3525_v27  ;;  %v5888_v41 = vpop.f32.mrf.mxu0  ;;  %v4952_v35 = vld [vmem:[%s5533_s12 + $0x70] sm:$0xff] }
 0x21c   : > { %3881 = vst.msk [vmem:[%s5829_s30 + $0xc] sm:$0xf] %vm3877_vm3, %v3848_v32  ;;  %v2475_v42 = vld [vmem:[#allocation2 + $0x40] sm:$0xff] }
 0x21d   : > { %v2735_v13 = vadd.f32 %v2667_v30, %v2475_v42  ;;  %2403 = vst.msk [vmem:[#allocation2 + $0x48] sm:$0xff] %vm203_vm2, %v2371_v38  ;;  %v3593_v45 = vmax.f32 %v3561_v39, 0.0  ;;  %v2114_v32 = vld [vmem:[#allocation2 + $0x60] sm:$0xff]  ;;  %v4971_v38 = vld [vmem:[%s5539_s17 + $0x70] sm:$0xff] }
 0x21e   : > { %v2839_v44 = vld [vmem:[#allocation2 + $0x38] sm:$0xff]  ;;  %v4990_v39 = vld [vmem:[%s5544_s20 + $0x70] sm:$0xff] }
 0x21f   : > { %v3099_v46 = vadd.f32 %v3029_v12, %v2839_v44  ;;  %2767 = vst.msk [vmem:[#allocation2 + $0x40] sm:$0xff] %vm203_vm2, %v2735_v13  ;;  %v3817_v47 = vmul.f32 %v3676_v37, %v3593_v45  ;;  %v3691_v45 = vpop.permute.xlu1 %3690  ;;  %v3650_v44 = vld [vmem:[%s5591_s24 + $0xe8] sm:$0xff] }
 0x220   : > { %v3203_v49 = vld [vmem:[#allocation2 + $0x30] sm:$0xff]  ;;  %v2669_v48 = vpop.f32.mrf.mxu2 }
 0x221   : > { %3131 = vst.msk [vmem:[#allocation2 + $0x38] sm:$0xff] %vm203_vm2, %v3099_v46  ;;  %v3463_v50 = vadd.f32 %v5839_v36, %v3203_v49  ;;  %v3849_v51 = vpack.c.bf16 %v3817_v47, %v3817_v47  ;;  %v3034_v55 = vpop.f32.mrf.mxu3 }
 0x222   : > { %v2307_v57 = vpop.f32.mrf.mxu1  ;;  %v3526_v59 = vld [vmem:[#allocation2 + $0x28] sm:$0xff]  ;;  %3800 = vperm.xlu2 %5008, %v3650_v44  }
 0x223   : > { %3495 = vst.msk [vmem:[#allocation2 + $0x30] sm:$0xff] %vm203_vm2, %v3463_v50  ;;  %v2372_v40 = vadd.f32 %v2307_v57, %v2112_v52  ;;  %v3562_v61 = vadd.f32 %v5813_v1, %v3526_v59  ;;  %v5903_v63 = vpop.f32.mrf.mxu0  ;;  %v2115_v57 = vld [vmem:[#allocation2 + $0x68] sm:$0xff] }
 0x224   : > { %3882 = vst.msk [vmem:[%s5829_s30 + $0x10] sm:$0xf] %vm3877_vm3, %v3849_v51  ;;  %v2476_v36 = vld [vmem:[#allocation2 + $0x48] sm:$0xff] }
 0x225   : > { %v2736_v3 = vadd.f32 %v2669_v48, %v2476_v36  ;;  %2404 = vst.msk [vmem:[#allocation2 + $0x50] sm:$0xff] %vm203_vm2, %v2372_v40  ;;  %4541 = vmatmul.msk.bf16.gmra.mxu1 %vm396_vm1, %v4932_v53  ;;  %4633 = vmatmul.msk.bf16.gmra.mxu2 %vm396_vm1, %v4951_v54  ;;  %v3594_v4 = vmax.f32 %v3562_v61, 0.0 }
 0x226   : > { %v2840_v5 = vld [vmem:[#allocation2 + $0x40] sm:$0xff]  ;;  %4725 = vmatmul.msk.bf16.gmra.mxu3 %vm396_vm1, %v4970_v60  ;;  %4817 = vmatmul.msk.bf16.gmra.mxu0 %vm396_vm1, %v4989_v62 }
 0x227   : > { %v3100_v6 = vadd.f32 %v3032_v33, %v2840_v5  ;;  %2768 = vst.msk [vmem:[#allocation2 + $0x48] sm:$0xff] %vm203_vm2, %v2736_v3  ;;  %v3818_v7 = vmul.f32 %v3681_v0, %v3594_v4  ;;  %v4933_v33 = vld [vmem:[%s5528_s9 + $0x70] sm:$0xff]  ;;  %v3696_v0 = vpop.permute.xlu2 %3695 }
 0x228   : > { %v3204_v8 = vld [vmem:[#allocation2 + $0x38] sm:$0xff]  ;;  %v2672_v9 = vpop.f32.mrf.mxu2 }
 0x229   : > { %3132 = vst.msk [vmem:[#allocation2 + $0x40] sm:$0xff] %vm203_vm2, %v3100_v6  ;;  %v3464_v11 = vadd.f32 %v5855_v56, %v3204_v8  ;;  %v3850_v12 = vpack.c.bf16 %v3818_v7, %v3818_v7  ;;  %v3037_v15 = vpop.f32.mrf.mxu3 }
 0x22a   : > { %v2309_v16 = vpop.f32.mrf.mxu1  ;;  %v3527_v18 = vld [vmem:[#allocation2 + $0x30] sm:$0xff] }
 0x22b   : > { %3496 = vst.msk [vmem:[#allocation2 + $0x38] sm:$0xff] %vm203_vm2, %v3464_v11  ;;  %v2373_v10 = vadd.f32 %v2309_v16, %v2113_v14  ;;  %v3563_v19 = vadd.f32 %v5813_v1, %v3527_v18  ;;  %v5918_v58 = vpop.f32.mrf.mxu0  ;;  %v2116_v11 = vld [vmem:[#allocation2 + $0x70] sm:$0xff] }
 0x22c   : > { %3883 = vst.msk [vmem:[%s5829_s30 + $0x14] sm:$0xf] %vm3877_vm3, %v3850_v12  ;;  %v2477_v20 = vld [vmem:[#allocation2 + $0x50] sm:$0xff]  ;;  %v4934_v12 = vld [vmem:[%s5528_s9 + $0x78] sm:$0xff] }
 0x22d   : > { %v2737_v56 = vadd.f32 %v2672_v9, %v2477_v20  ;;  %2405 = vst.msk [vmem:[#allocation2 + $0x58] sm:$0xff] %vm203_vm2, %v2373_v10  ;;  %v3595_v23 = vmax.f32 %v3563_v19, 0.0  ;;  %v4972_v10 = vld [vmem:[%s5539_s17 + $0x78] sm:$0xff] }
 0x22e   : > { %v2841_v24 = vld [vmem:[#allocation2 + $0x48] sm:$0xff]  ;;  %v4991_v19 = vld [vmem:[%s5544_s20 + $0x78] sm:$0xff] }
 0x22f   : > { %v3101_v25 = vadd.f32 %v3034_v55, %v2841_v24  ;;  %2769 = vst.msk [vmem:[#allocation2 + $0x50] sm:$0xff] %vm203_vm2, %v2737_v56  ;;  %v3819_v26 = vmul.f32 %v3686_v21, %v3595_v23 }
 0x230   : > { %v3205_v28 = vld [vmem:[#allocation2 + $0x40] sm:$0xff]  ;;  %v2674_v29 = vpop.f32.mrf.mxu2 }
 0x231   : > { %3133 = vst.msk [vmem:[#allocation2 + $0x48] sm:$0xff] %vm203_vm2, %v3101_v25  ;;  %v3465_v30 = vadd.f32 %v5872_v17, %v3205_v28  ;;  %v3851_v31 = vpack.c.bf16 %v3819_v26, %v3819_v26  ;;  %v3039_v34 = vpop.f32.mrf.mxu3 }
 0x232   : > { %v2312_v27 = vpop.f32.mrf.mxu1  ;;  %v3528_v37 = vld [vmem:[#allocation2 + $0x38] sm:$0xff] }
 0x233   : > { %3497 = vst.msk [vmem:[#allocation2 + $0x40] sm:$0xff] %vm203_vm2, %v3465_v30  ;;  %v2374_v42 = vadd.f32 %v2312_v27, %v2114_v32  ;;  %v3564_v43 = vadd.f32 %v5813_v1, %v3528_v37  ;;  %v5933_v13 = vpop.f32.mrf.mxu0 }
 0x234   : > { %3884 = vst.msk [vmem:[%s5829_s30 + $0x18] sm:$0xf] %vm3877_vm3, %v3851_v31  ;;  %v2478_v17 = vld [vmem:[#allocation2 + $0x58] sm:$0xff] }
 0x235   : > { %v2738_v46 = vadd.f32 %v2674_v29, %v2478_v17  ;;  %2406 = vst.msk [vmem:[#allocation2 + $0x60] sm:$0xff] %vm203_vm2, %v2374_v42  ;;  %4542 = vmatmul.msk.bf16.gmra.mxu1 %vm396_vm1, %v4933_v33  ;;  %4634 = vmatmul.msk.bf16.gmra.mxu2 %vm396_vm1, %v4952_v35  ;;  %v3596_v47 = vmax.f32 %v3564_v43, 0.0  ;;  %v2117_v35 = vld [vmem:[#allocation2 + $0x78] sm:$0xff]  ;;  %v3706_v43 = vpop.permute.xlu1 %3705 }
 0x236   : > { %v2842_v49 = vld [vmem:[#allocation2 + $0x50] sm:$0xff]  ;;  %4726 = vmatmul.msk.bf16.gmra.mxu3 %vm396_vm1, %v4971_v38  ;;  %4818 = vmatmul.msk.bf16.gmra.mxu0 %vm396_vm1, %v4990_v39 }
 0x237   : > { %v3102_v48 = vadd.f32 %v3037_v15, %v2842_v49  ;;  %2770 = vst.msk [vmem:[#allocation2 + $0x58] sm:$0xff] %vm203_vm2, %v2738_v46  ;;  %v3820_v50 = vmul.f32 %v3691_v45, %v3596_v47  ;;  %v4953_v15 = vld [vmem:[%s5533_s12 + $0x78] sm:$0xff] }
 0x238   : > { %v3206_v51 = vld [vmem:[#allocation2 + $0x48] sm:$0xff]  ;;  %v2677_v52 = vpop.f32.mrf.mxu2 }
 0x239   : > { %3134 = vst.msk [vmem:[#allocation2 + $0x50] sm:$0xff] %vm203_vm2, %v3102_v48  ;;  %v3466_v53 = vadd.f32 %v5888_v41, %v3206_v51  ;;  %v3852_v54 = vpack.c.bf16 %v3820_v50, %v3820_v50  ;;  %v3042_v55 = vpop.f32.mrf.mxu3 }
 0x23a   : > { %v2314_v59 = vpop.f32.mrf.mxu1  ;;  %v3529_v60 = vld [vmem:[#allocation2 + $0x40] sm:$0xff] }
 0x23b   : > { %3498 = vst.msk [vmem:[#allocation2 + $0x48] sm:$0xff] %vm203_vm2, %v3466_v53  ;;  %v2375_v62 = vadd.f32 %v2314_v59, %v2115_v57  ;;  %v3565_v40 = vadd.f32 %v5813_v1, %v3529_v60  ;;  %v5948_v61 = vpop.f32.mrf.mxu0 }
 0x23c   : > { %3885 = vst.msk [vmem:[%s5829_s30 + $0x1c] sm:$0xf] %vm3877_vm3, %v3852_v54  ;;  %v2479_v36 = vld [vmem:[#allocation2 + $0x60] sm:$0xff] }
 0x23d   : > { %v2739_v2 = vadd.f32 %v2677_v52, %v2479_v36  ;;  %2407 = vst.msk [vmem:[#allocation2 + $0x68] sm:$0xff] %vm203_vm2, %v2375_v62  ;;  %v3597_v41 = vmax.f32 %v3565_v40, 0.0  ;;  %v2118_v52 = vld [vmem:[#allocation2 + $0x80] sm:$0xff]  ;;  %v3711_v62 = vpop.permute.xlu2 %3710 }
 0x23e   : > { %v2843_v3 = vld [vmem:[#allocation2 + $0x58] sm:$0xff] }
 0x23f   : > { %v3103_v4 = vadd.f32 %v3039_v34, %v2843_v3  ;;  %2771 = vst.msk [vmem:[#allocation2 + $0x60] sm:$0xff] %vm203_vm2, %v2739_v2  ;;  %v3821_v5 = vmul.f32 %v3696_v0, %v3597_v41 }
 0x240   : > { %v3207_v6 = vld [vmem:[#allocation2 + $0x50] sm:$0xff]  ;;  %v2679_v7 = vpop.f32.mrf.mxu2 }
 0x241   : > { %3135 = vst.msk [vmem:[#allocation2 + $0x58] sm:$0xff] %vm203_vm2, %v3103_v4  ;;  %v3467_v8 = vadd.f32 %v5903_v63, %v3207_v6  ;;  %v3853_v9 = vpack.c.bf16 %v3821_v5, %v3821_v5  ;;  %v3044_v14 = vpop.f32.mrf.mxu3  ;;  %v3701_v63 = vpop.permute.xlu0 %3700 }
 0x242   : > { %v2317_v16 = vpop.f32.mrf.mxu1  ;;  %v3530_v18 = vld [vmem:[#allocation2 + $0x48] sm:$0xff] }
 0x243   : > { %3499 = vst.msk [vmem:[#allocation2 + $0x50] sm:$0xff] %vm203_vm2, %v3467_v8  ;;  %v2376_v20 = vadd.f32 %v2317_v16, %v2116_v11  ;;  %v3566_v21 = vadd.f32 %v5813_v1, %v3530_v18  ;;  %v5962_v22 = vpop.f32.mrf.mxu0 }
 0x244   : > { %3886 = vst.msk [vmem:[%s5829_s30 + $0x20] sm:$0xf] %vm3877_vm3, %v3853_v9  ;;  %v2480_v56 = vld [vmem:[#allocation2 + $0x68] sm:$0xff] }
 0x245   : > { %v2740_v23 = vadd.f32 %v2679_v7, %v2480_v56  ;;  %2408 = vst.msk [vmem:[#allocation2 + $0x70] sm:$0xff] %vm203_vm2, %v2376_v20  ;;  %4543 = vmatmul.msk.bf16.gmra.mxu1 %vm396_vm1, %v4934_v12  ;;  %4635 = vmatmul.msk.bf16.gmra.mxu2 %vm396_vm1, %v4953_v15  ;;  %v3598_v24 = vmax.f32 %v3566_v21, 0.0  ;;  %v2119_v7 = vld [vmem:[#allocation2 + $0x88] sm:$0xff] }
 0x246   : > { %v2844_v25 = vld [vmem:[#allocation2 + $0x60] sm:$0xff]  ;;  %4727 = vmatmul.msk.bf16.gmra.mxu3 %vm396_vm1, %v4972_v10  ;;  %4819 = vmatmul.msk.bf16.gmra.mxu0 %vm396_vm1, %v4991_v19 }
 0x247   : > { %v3104_v26 = vadd.f32 %v3042_v55, %v2844_v25  ;;  %2772 = vst.msk [vmem:[#allocation2 + $0x68] sm:$0xff] %vm203_vm2, %v2740_v23  ;;  %v3822_v28 = vmul.f32 %v3701_v63, %v3598_v24  ;;  %v2120_v25 = vld [vmem:[#allocation2 + $0x90] sm:$0xff] }
 0x248   : > { %v3208_v29 = vld [vmem:[#allocation2 + $0x58] sm:$0xff]  ;;  %v2682_v30 = vpop.f32.mrf.mxu2 }
 0x249   : > { %3136 = vst.msk [vmem:[#allocation2 + $0x60] sm:$0xff] %vm203_vm2, %v3104_v26  ;;  %v3468_v31 = vadd.f32 %v5918_v58, %v3208_v29  ;;  %v3854_v32 = vpack.c.bf16 %v3822_v28, %v3822_v28  ;;  %v3047_v33 = vpop.f32.mrf.mxu3  ;;  %v3716_v16 = vpop.permute.xlu0 %3715 }
 0x24a   : > { %v2319_v34 = vpop.f32.mrf.mxu1  ;;  %v3531_v27 = vld [vmem:[#allocation2 + $0x50] sm:$0xff] }
 0x24b   : > { %3500 = vst.msk [vmem:[#allocation2 + $0x58] sm:$0xff] %vm203_vm2, %v3468_v31  ;;  %v2377_v37 = vadd.f32 %v2319_v34, %v2117_v35  ;;  %v3567_v38 = vadd.f32 %v5813_v1, %v3531_v27  ;;  %v5976_v39 = vpop.f32.mrf.mxu0 }
 0x24c   : > { %3887 = vst.msk [vmem:[%s5829_s30 + $0x24] sm:$0xf] %vm3877_vm3, %v3854_v32  ;;  %v2481_v42 = vld [vmem:[#allocation2 + $0x70] sm:$0xff]  ;;  %v3721_v32 = vpop.permute.xlu1 %3720 }
 0x24d   : > { %v2741_v17 = vadd.f32 %v2682_v30, %v2481_v42  ;;  %2409 = vst.msk [vmem:[#allocation2 + $0x78] sm:$0xff] %vm203_vm2, %v2377_v37  ;;  %v3599_v58 = vmax.f32 %v3567_v38, 0.0 }
 0x24e   : > { %v2845_v45 = vld [vmem:[#allocation2 + $0x68] sm:$0xff] }
 0x24f   : > { %v3105_v44 = vadd.f32 %v3044_v14, %v2845_v45  ;;  %2773 = vst.msk [vmem:[#allocation2 + $0x70] sm:$0xff] %vm203_vm2, %v2741_v17  ;;  %v3823_v46 = vmul.f32 %v3706_v43, %v3599_v58  ;;  %v2121_v45 = vld [vmem:[#allocation2 + $0x98] sm:$0xff] }
 0x250   : > { %v3209_v47 = vld [vmem:[#allocation2 + $0x60] sm:$0xff]  ;;  %v2684_v49 = vpop.f32.mrf.mxu2 }
 0x251   : > { %3137 = vst.msk [vmem:[#allocation2 + $0x68] sm:$0xff] %vm203_vm2, %v3105_v44  ;;  %v3469_v48 = vadd.f32 %v5933_v13, %v3209_v47  ;;  %v3855_v50 = vpack.c.bf16 %v3823_v46, %v3823_v46  ;;  %v3049_v51 = vpop.f32.mrf.mxu3 }
 0x252   : > { %v2322_v53 = vpop.f32.mrf.mxu1  ;;  %v3532_v54 = vld [vmem:[#allocation2 + $0x58] sm:$0xff] }
 0x253   : > { %3501 = vst.msk [vmem:[#allocation2 + $0x60] sm:$0xff] %vm203_vm2, %v3469_v48  ;;  %v2378_v55 = vadd.f32 %v2322_v53, %v2118_v52  ;;  %v3568_v57 = vadd.f32 %v5813_v1, %v3532_v54  ;;  %v5986_v59 = vpop.f32.mrf.mxu0 }
 0x254   : > { %3888 = vst.msk [vmem:[%s5829_s30 + $0x28] sm:$0xf] %vm3877_vm3, %v3855_v50  ;;  %v2482_v60 = vld [vmem:[#allocation2 + $0x78] sm:$0xff]  ;;  %v3726_v50 = vpop.permute.xlu2 %3725 }
 0x255   : > { %v2742_v40 = vadd.f32 %v2684_v49, %v2482_v60  ;;  %2410 = vst.msk [vmem:[#allocation2 + $0x80] sm:$0xff] %vm203_vm2, %v2378_v55  ;;  %v3600_v13 = vmax.f32 %v3568_v57, 0.0 }
 0x256   : > { %v2846_v36 = vld [vmem:[#allocation2 + $0x70] sm:$0xff] }
 0x257   : > { %v3106_v0 = vadd.f32 %v3047_v33, %v2846_v36  ;;  %2774 = vst.msk [vmem:[#allocation2 + $0x78] sm:$0xff] %vm203_vm2, %v2742_v40  ;;  %v3824_v2 = vmul.f32 %v3711_v62, %v3600_v13  ;;  %v2122_v36 = vld [vmem:[#allocation2 + $0xa0] sm:$0xff] }
 0x258   : > { %v3210_v41 = vld [vmem:[#allocation2 + $0x68] sm:$0xff]  ;;  %v2687_v3 = vpop.f32.mrf.mxu2 }
 0x259   : > { %3138 = vst.msk [vmem:[#allocation2 + $0x70] sm:$0xff] %vm203_vm2, %v3106_v0  ;;  %v3470_v4 = vadd.f32 %v5948_v61, %v3210_v41  ;;  %v3856_v5 = vpack.c.bf16 %v3824_v2, %v3824_v2  ;;  %v3052_v6 = vpop.f32.mrf.mxu3 }
 0x25a   : > { %v2324_v8 = vpop.f32.mrf.mxu1  ;;  %v3533_v9 = vld [vmem:[#allocation2 + $0x60] sm:$0xff] }
 0x25b   : > { %3502 = vst.msk [vmem:[#allocation2 + $0x68] sm:$0xff] %vm203_vm2, %v3470_v4  ;;  %v2379_v11 = vadd.f32 %v2324_v8, %v2119_v7  ;;  %v3569_v12 = vadd.f32 %v5813_v1, %v3533_v9  ;;  %v5996_v15 = vpop.f32.mrf.mxu0 }
 0x25c   : > { %3889 = vst.msk [vmem:[%s5829_s30 + $0x2c] sm:$0xf] %vm3877_vm3, %v3856_v5  ;;  %v2483_v14 = vld [vmem:[#allocation2 + $0x80] sm:$0xff]  ;;  %v3731_v5 = vpop.permute.xlu0 %3730 }
 0x25d   : > { %v2743_v18 = vadd.f32 %v2687_v3, %v2483_v14  ;;  %2411 = vst.msk [vmem:[#allocation2 + $0x88] sm:$0xff] %vm203_vm2, %v2379_v11  ;;  %v3601_v61 = vmax.f32 %v3569_v12, 0.0 }
 0x25e   : > { %v2847_v10 = vld [vmem:[#allocation2 + $0x78] sm:$0xff] }
 0x25f   : > { %v3107_v19 = vadd.f32 %v3049_v51, %v2847_v10  ;;  %2775 = vst.msk [vmem:[#allocation2 + $0x80] sm:$0xff] %vm203_vm2, %v2743_v18  ;;  %v3825_v20 = vmul.f32 %v3716_v16, %v3601_v61  ;;  %v2123_v10 = vld [vmem:[#allocation2 + $0xa8] sm:$0xff] }
 0x260   : > { %v3211_v21 = vld [vmem:[#allocation2 + $0x70] sm:$0xff]  ;;  %v2689_v56 = vpop.f32.mrf.mxu2 }
 0x261   : > { %3139 = vst.msk [vmem:[#allocation2 + $0x78] sm:$0xff] %vm203_vm2, %v3107_v19  ;;  %v3471_v63 = vadd.f32 %v5962_v22, %v3211_v21  ;;  %v3857_v23 = vpack.c.bf16 %v3825_v20, %v3825_v20  ;;  %v3054_v24 = vpop.f32.mrf.mxu3 }
 0x262   : > { %v2327_v26 = vpop.f32.mrf.mxu1  ;;  %v3534_v28 = vld [vmem:[#allocation2 + $0x68] sm:$0xff] }
 0x263   : > { %3503 = vst.msk [vmem:[#allocation2 + $0x70] sm:$0xff] %vm203_vm2, %v3471_v63  ;;  %v2380_v29 = vadd.f32 %v2327_v26, %v2120_v25  ;;  %v3570_v30 = vadd.f32 %v5813_v1, %v3534_v28  ;;  %v6009_v34 = vpop.f32.mrf.mxu0 }
 0x264   : > { %3890 = vst.msk [vmem:[%s5829_s30 + $0x30] sm:$0xf] %vm3877_vm3, %v3857_v23  ;;  %v2484_v31 = vld [vmem:[#allocation2 + $0x88] sm:$0xff]  ;;  %v3736_v23 = vpop.permute.xlu1 %3735 }
 0x265   : > { %v2744_v33 = vadd.f32 %v2689_v56, %v2484_v31  ;;  %2412 = vst.msk [vmem:[#allocation2 + $0x90] sm:$0xff] %vm203_vm2, %v2380_v29  ;;  %v3602_v35 = vmax.f32 %v3570_v30, 0.0 }
 0x266   : > { %v2848_v22 = vld [vmem:[#allocation2 + $0x80] sm:$0xff] }
 0x267   : > { %v3108_v27 = vadd.f32 %v3052_v6, %v2848_v22  ;;  %2776 = vst.msk [vmem:[#allocation2 + $0x88] sm:$0xff] %vm203_vm2, %v2744_v33  ;;  %v3826_v37 = vmul.f32 %v3721_v32, %v3602_v35  ;;  %v2124_v35 = vld [vmem:[#allocation2 + $0xb0] sm:$0xff] }
 0x268   : > { %v3212_v38 = vld [vmem:[#allocation2 + $0x78] sm:$0xff]  ;;  %v2692_v42 = vpop.f32.mrf.mxu2 }
 0x269   : > { %3140 = vst.msk [vmem:[#allocation2 + $0x80] sm:$0xff] %vm203_vm2, %v3108_v27  ;;  %v3472_v43 = vadd.f32 %v5976_v39, %v3212_v38  ;;  %v3858_v17 = vpack.c.bf16 %v3826_v37, %v3826_v37  ;;  %v3057_v58 = vpop.f32.mrf.mxu3 }
 0x26a   : > { %v2329_v44 = vpop.f32.mrf.mxu1  ;;  %v3535_v46 = vld [vmem:[#allocation2 + $0x70] sm:$0xff] }
 0x26b   : > { %3504 = vst.msk [vmem:[#allocation2 + $0x78] sm:$0xff] %vm203_vm2, %v3472_v43  ;;  %v2381_v47 = vadd.f32 %v2329_v44, %v2121_v45  ;;  %v3571_v49 = vadd.f32 %v5813_v1, %v3535_v46  ;;  %v6020_v55 = vpop.f32.mrf.mxu0 }
 0x26c   : > { %3891 = vst.msk [vmem:[%s5829_s30 + $0x34] sm:$0xf] %vm3877_vm3, %v3858_v17  ;;  %v2485_v48 = vld [vmem:[#allocation2 + $0x90] sm:$0xff]  ;;  %v3741_v17 = vpop.permute.xlu2 %3740 }
 0x26d   : > { %v2745_v51 = vadd.f32 %v2692_v42, %v2485_v48  ;;  %2413 = vst.msk [vmem:[#allocation2 + $0x98] sm:$0xff] %vm203_vm2, %v2381_v47  ;;  %v3603_v52 = vmax.f32 %v3571_v49, 0.0 }
 0x26e   : > { %v2849_v53 = vld [vmem:[#allocation2 + $0x88] sm:$0xff] }
 0x26f   : > { %v3109_v39 = vadd.f32 %v3054_v24, %v2849_v53  ;;  %2777 = vst.msk [vmem:[#allocation2 + $0x90] sm:$0xff] %vm203_vm2, %v2745_v51  ;;  %v3827_v54 = vmul.f32 %v3726_v50, %v3603_v52  ;;  %v2125_v53 = vld [vmem:[#allocation2 + $0xb8] sm:$0xff] }
 0x270   : > { %v3213_v57 = vld [vmem:[#allocation2 + $0x80] sm:$0xff]  ;;  %v2694_v60 = vpop.f32.mrf.mxu2 }
 0x271   : > { %3141 = vst.msk [vmem:[#allocation2 + $0x88] sm:$0xff] %vm203_vm2, %v3109_v39  ;;  %v3473_v62 = vadd.f32 %v5986_v59, %v3213_v57  ;;  %v3859_v40 = vpack.c.bf16 %v3827_v54, %v3827_v54  ;;  %v3059_v13 = vpop.f32.mrf.mxu3 }
 0x272   : > { %v2332_v0 = vpop.f32.mrf.mxu1  ;;  %v3536_v2 = vld [vmem:[#allocation2 + $0x78] sm:$0xff] }
 0x273   : > { %3505 = vst.msk [vmem:[#allocation2 + $0x80] sm:$0xff] %vm203_vm2, %v3473_v62  ;;  %v2382_v41 = vadd.f32 %v2332_v0, %v2122_v36  ;;  %v3572_v3 = vadd.f32 %v5813_v1, %v3536_v2  ;;  %v6032_v61 = vpop.f32.mrf.mxu0 }
 0x274   : > { %3892 = vst.msk [vmem:[%s5829_s30 + $0x38] sm:$0xf] %vm3877_vm3, %v3859_v40  ;;  %v2486_v4 = vld [vmem:[#allocation2 + $0x98] sm:$0xff] }
 0x275   : > { %v2746_v6 = vadd.f32 %v2694_v60, %v2486_v4  ;;  %2414 = vst.msk [vmem:[#allocation2 + $0xa0] sm:$0xff] %vm203_vm2, %v2382_v41  ;;  %v3604_v7 = vmax.f32 %v3572_v3, 0.0 }
 0x276   : > { %v2850_v8 = vld [vmem:[#allocation2 + $0x90] sm:$0xff] }
 0x277   : > { %v3110_v59 = vadd.f32 %v3057_v58, %v2850_v8  ;;  %2778 = vst.msk [vmem:[#allocation2 + $0x98] sm:$0xff] %vm203_vm2, %v2746_v6  ;;  %v3828_v9 = vmul.f32 %v3731_v5, %v3604_v7  ;;  %v2126_v7 = vld [vmem:[#allocation2 + $0xc0] sm:$0xff] }
 0x278   : > { %v3214_v11 = vld [vmem:[#allocation2 + $0x88] sm:$0xff]  ;;  %v2697_v12 = vpop.f32.mrf.mxu2 }
 0x279   : > { %3142 = vst.msk [vmem:[#allocation2 + $0x90] sm:$0xff] %vm203_vm2, %v3110_v59  ;;  %v3474_v14 = vadd.f32 %v5996_v15, %v3214_v11  ;;  %v3860_v16 = vpack.c.bf16 %v3828_v9, %v3828_v9  ;;  %v3062_v18 = vpop.f32.mrf.mxu3  ;;  %v6061_v59 = vld [vmem:[%s6148_s2] ss:$0 sm:$0xff] }
 0x27a   : > { %v2334_v19 = vpop.f32.mrf.mxu1  ;;  %v3537_v20 = vld [vmem:[#allocation2 + $0x80] sm:$0xff] }
 0x27b   : > { %3506 = vst.msk [vmem:[#allocation2 + $0x88] sm:$0xff] %vm203_vm2, %v3474_v14  ;;  %v2383_v21 = vadd.f32 %v2334_v19, %v2123_v10  ;;  %v3573_v56 = vadd.f32 %v5813_v1, %v3537_v20  ;;  %v3429_v42 = vpop.f32.mrf.mxu0 }
 0x27c   : > { %3893 = vst.msk [vmem:[%s5829_s30 + $0x3c] sm:$0xf] %vm3877_vm3, %v3860_v16  ;;  %v2487_v63 = vld [vmem:[#allocation2 + $0xa0] sm:$0xff] }
 0x27d   : > { %v2747_v24 = vadd.f32 %v2697_v12, %v2487_v63  ;;  %2415 = vst.msk [vmem:[#allocation2 + $0xa8] sm:$0xff] %vm203_vm2, %v2383_v21  ;;  %v3605_v15 = vmax.f32 %v3573_v56, 0.0 }
 0x27e   : > { %v2851_v25 = vld [vmem:[#allocation2 + $0x98] sm:$0xff] }
 0x27f   : > { %v3111_v26 = vadd.f32 %v3059_v13, %v2851_v25  ;;  %2779 = vst.msk [vmem:[#allocation2 + $0xa0] sm:$0xff] %vm203_vm2, %v2747_v24  ;;  %v3829_v28 = vmul.f32 %v3736_v23, %v3605_v15  ;;  %v2127_v15 = vld [vmem:[#allocation2 + $0xc8] sm:$0xff] }
 0x280   : > { %v3215_v29 = vld [vmem:[#allocation2 + $0x90] sm:$0xff]  ;;  %v2699_v30 = vpop.f32.mrf.mxu2 }
 0x281   : > { %3143 = vst.msk [vmem:[#allocation2 + $0x98] sm:$0xff] %vm203_vm2, %v3111_v26  ;;  %v3475_v31 = vadd.f32 %v6009_v34, %v3215_v29  ;;  %v3861_v32 = vpack.c.bf16 %v3829_v28, %v3829_v28  ;;  %v3064_v33 = vpop.f32.mrf.mxu3 }
 0x282   : > { %v2337_v22 = vpop.f32.mrf.mxu1  ;;  %v3538_v27 = vld [vmem:[#allocation2 + $0x88] sm:$0xff] }
 0x283   : > { %3507 = vst.msk [vmem:[#allocation2 + $0x90] sm:$0xff] %vm203_vm2, %v3475_v31  ;;  %v2384_v37 = vadd.f32 %v2337_v22, %v2124_v35  ;;  %v3574_v38 = vadd.f32 %v5813_v1, %v3538_v27  ;;  %v3432_v13 = vpop.f32.mrf.mxu0  ;;  %v3756_v22 = vpop.permute.xlu2 %3755 }
 0x284   : > { %3894 = vst.msk [vmem:[%s5829_s30 + $0x40] sm:$0xf] %vm3877_vm3, %v3861_v32  ;;  %v2488_v43 = vld [vmem:[#allocation2 + $0xa8] sm:$0xff] }
 0x285   : > { %v2748_v58 = vadd.f32 %v2699_v30, %v2488_v43  ;;  %2416 = vst.msk [vmem:[#allocation2 + $0xb0] sm:$0xff] %vm203_vm2, %v2384_v37  ;;  %v3606_v45 = vmax.f32 %v3574_v38, 0.0 }
 0x286   : > { %v2852_v34 = vld [vmem:[#allocation2 + $0xa0] sm:$0xff] }
 0x287   : > { %v3112_v44 = vadd.f32 %v3062_v18, %v2852_v34  ;;  %2780 = vst.msk [vmem:[#allocation2 + $0xa8] sm:$0xff] %vm203_vm2, %v2748_v58  ;;  %v3830_v46 = vmul.f32 %v3741_v17, %v3606_v45  ;;  %v3751_v18 = vpop.permute.xlu1 %3750  ;;  %v2128_v45 = vld [vmem:[#allocation2 + $0xd0] sm:$0xff] }
 0x288   : > { %v3216_v47 = vld [vmem:[#allocation2 + $0x98] sm:$0xff]  ;;  %v2702_v49 = vpop.f32.mrf.mxu2 }
 0x289   : > { %3144 = vst.msk [vmem:[#allocation2 + $0xa0] sm:$0xff] %vm203_vm2, %v3112_v44  ;;  %v3476_v48 = vadd.f32 %v6020_v55, %v3216_v47  ;;  %v3862_v50 = vpack.c.bf16 %v3830_v46, %v3830_v46  ;;  %v3067_v51 = vpop.f32.mrf.mxu3  ;;  %v3746_v55 = vpop.permute.xlu0 %3745 }
 0x28a   : > { %v3539_v52 = vld [vmem:[#allocation2 + $0x90] sm:$0xff]  ;;  %v2339_v39 = vpop.f32.mrf.mxu1 }
 0x28b   : > { %3508 = vst.msk [vmem:[#allocation2 + $0x98] sm:$0xff] %vm203_vm2, %v3476_v48  ;;  %v3575_v54 = vadd.f32 %v5813_v1, %v3539_v52  ;;  %v2385_v57 = vadd.f32 %v2339_v39, %v2125_v53  ;;  %v3434_v20 = vpop.f32.mrf.mxu0 }
 0x28c   : > { %3895 = vst.msk [vmem:[%s5829_s30 + $0x44] sm:$0xf] %vm3877_vm3, %v3862_v50  ;;  %v2489_v60 = vld [vmem:[#allocation2 + $0xb0] sm:$0xff] }
 0x28d   : > { %v3607_v62 = vmax.f32 %v3575_v54, 0.0  ;;  %v2749_v40 = vadd.f32 %v2702_v49, %v2489_v60  ;;  %2417 = vst.msk [vmem:[#allocation2 + $0xb8] sm:$0xff] %vm203_vm2, %v2385_v57 }
 0x28e   : > { %v2853_v36 = vld [vmem:[#allocation2 + $0xa8] sm:$0xff] }
 0x28f   : > { %v3113_v0 = vadd.f32 %v3064_v33, %v2853_v36  ;;  %v3831_v2 = vmul.f32 %v3746_v55, %v3607_v62  ;;  %2781 = vst.msk [vmem:[#allocation2 + $0xb0] sm:$0xff] %vm203_vm2, %v2749_v40 }
 0x290   : > { %v3217_v41 = vld [vmem:[#allocation2 + $0xa0] sm:$0xff]  ;;  %v2704_v3 = vpop.f32.mrf.mxu2 }
 0x291   : > { %3145 = vst.msk [vmem:[#allocation2 + $0xa8] sm:$0xff] %vm203_vm2, %v3113_v0  ;;  %v3863_v1 = vpack.c.bf16 %v3831_v2, %v3831_v2  ;;  %v3477_v4 = vadd.f32 %v6032_v61, %v3217_v41  ;;  %v3069_v5 = vpop.f32.mrf.mxu3  ;;  %v3761_v52 = vpop.permute.xlu0 %3760 }
 0x292   : > { %v3540_v6 = vld [vmem:[#allocation2 + $0x98] sm:$0xff]  ;;  %v2342_v8 = vpop.f32.mrf.mxu1 }
 0x293   : > { %v3576_v9 = vadd.f32 %v6061_v59, %v3540_v6  ;;  %3896 = vst.msk [vmem:[%s5829_s30 + $0x48] sm:$0xf] %vm3877_vm3, %v3863_v1  ;;  %v2386_v11 = vadd.f32 %v2342_v8, %v2126_v7  ;;  %v3437_v17 = vpop.f32.mrf.mxu0 }
 0x294   : > { %3509 = vst.msk [vmem:[#allocation2 + $0xa0] sm:$0xff] %vm203_vm2, %v3477_v4  ;;  %v2490_v12 = vld [vmem:[#allocation2 + $0xb8] sm:$0xff] }
 0x295   : > { %v3608_v14 = vmax.f32 %v3576_v9, 0.0  ;;  %v2750_v16 = vadd.f32 %v2704_v3, %v2490_v12  ;;  %2418 = vst.msk [vmem:[#allocation2 + $0xc0] sm:$0xff] %vm203_vm2, %v2386_v11 }
 0x296   : > { %v2854_v61 = vld [vmem:[#allocation2 + $0xb0] sm:$0xff] }
 0x297   : > { %v3832_v10 = vmul.f32 %v3751_v18, %v3608_v14  ;;  %v3114_v19 = vadd.f32 %v3067_v51, %v2854_v61  ;;  %2782 = vst.msk [vmem:[#allocation2 + $0xb8] sm:$0xff] %vm203_vm2, %v2750_v16  ;;  %v2130_v18 = vld [vmem:[#allocation2 + $0xe0] sm:$0xff] }
 0x298   : > { %v3218_v21 = vld [vmem:[#allocation2 + $0xa8] sm:$0xff]  ;;  %v2707_v56 = vpop.f32.mrf.mxu2 }
 0x299   : > { %v3864_v63 = vpack.c.bf16 %v3832_v10, %v3832_v10  ;;  %3146 = vst.msk [vmem:[#allocation2 + $0xb0] sm:$0xff] %vm203_vm2, %v3114_v19  ;;  %v3478_v23 = vadd.f32 %v3429_v42, %v3218_v21  ;;  %v3072_v24 = vpop.f32.mrf.mxu3 }
 0x29a   : > { %v2344_v25 = vpop.f32.mrf.mxu1 }
 0x29b   : > { %3897 = vst.msk [vmem:[%s5829_s30 + $0x4c] sm:$0xf] %vm3877_vm3, %v3864_v63  ;;  %v3541_v26 = vld [vmem:[#allocation2 + $0xa0] sm:$0xff]  ;;  %v2387_v28 = vadd.f32 %v2344_v25, %v2127_v15  ;;  %v3439_v41 = vpop.f32.mrf.mxu0 }
 0x29c   : > { %3510 = vst.msk [vmem:[#allocation2 + $0xa8] sm:$0xff] %vm203_vm2, %v3478_v23  ;;  %v3577_v29 = vadd.f32 %v6061_v59, %v3541_v26  ;;  %v2491_v30 = vld [vmem:[#allocation2 + $0xc0] sm:$0xff] }
 0x29d   : > { %v2751_v31 = vadd.f32 %v2707_v56, %v2491_v30  ;;  %2419 = vst.msk [vmem:[#allocation2 + $0xc8] sm:$0xff] %vm203_vm2, %v2387_v28 }
 0x29e   : > { %v2855_v32 = vld [vmem:[#allocation2 + $0xb8] sm:$0xff]  ;;  %v3609_v33 = vmax.f32 %v3577_v29, 0.0 }
 0x29f   : > { %v3115_v35 = vadd.f32 %v3069_v5, %v2855_v32  ;;  %2783 = vst.msk [vmem:[#allocation2 + $0xc0] sm:$0xff] %vm203_vm2, %v2751_v31  ;;  %v3766_v5 = vpop.permute.xlu1 %3765  ;;  %v2131_v32 = vld [vmem:[#allocation2 + $0xe8] sm:$0xff] }
 0x2a0   : > { %v3833_v27 = vmul.f32 %v3756_v22, %v3609_v33  ;;  %v3219_v37 = vld [vmem:[#allocation2 + $0xb0] sm:$0xff]  ;;  %v2709_v38 = vpop.f32.mrf.mxu2 }
 0x2a1   : > { %3147 = vst.msk [vmem:[#allocation2 + $0xb8] sm:$0xff] %vm203_vm2, %v3115_v35  ;;  %v3479_v42 = vadd.f32 %v3432_v13, %v3219_v37  ;;  %v3074_v43 = vpop.f32.mrf.mxu3  ;;  %v2129_v13 = vld [vmem:[#allocation2 + $0xd8] sm:$0xff] }
 0x2a2   : > { %v3865_v58 = vpack.c.bf16 %v3833_v27, %v3833_v27  ;;  %v2347_v34 = vpop.f32.mrf.mxu1 }
 0x2a3   : > { %v3542_v44 = vld [vmem:[#allocation2 + $0xa8] sm:$0xff]  ;;  %3511 = vst.msk [vmem:[#allocation2 + $0xb0] sm:$0xff] %vm203_vm2, %v3479_v42  ;;  %v2388_v46 = vadd.f32 %v2347_v34, %v2128_v45  ;;  %v3442_v23 = vpop.f32.mrf.mxu0  ;;  %v3776_v42 = vpop.permute.xlu0 %3775 }
 0x2a4   : > { %v3578_v47 = vadd.f32 %v6061_v59, %v3542_v44  ;;  %3898 = vst.msk [vmem:[%s5829_s30 + $0x50] sm:$0xf] %vm3877_vm3, %v3865_v58  ;;  %v2492_v49 = vld [vmem:[#allocation2 + $0xc8] sm:$0xff] }
 0x2a5   : > { %v2752_v48 = vadd.f32 %v2709_v38, %v2492_v49  ;;  %2420 = vst.msk [vmem:[#allocation2 + $0xd0] sm:$0xff] %vm203_vm2, %v2388_v46 }
 0x2a6   : > { %v3610_v50 = vmax.f32 %v3578_v47, 0.0  ;;  %v2856_v51 = vld [vmem:[#allocation2 + $0xc0] sm:$0xff] }
 0x2a7   : > { %v3116_v53 = vadd.f32 %v3072_v24, %v2856_v51  ;;  %2784 = vst.msk [vmem:[#allocation2 + $0xc8] sm:$0xff] %vm203_vm2, %v2752_v48  ;;  %v3771_v24 = vpop.permute.xlu2 %3770 }
 0x2a8   : > { %v3834_v39 = vmul.f32 %v3761_v52, %v3610_v50  ;;  %v3220_v54 = vld [vmem:[#allocation2 + $0xb8] sm:$0xff]  ;;  %v2712_v57 = vpop.f32.mrf.mxu2  ;;  %v2132_v50 = vld [vmem:[#allocation2 + $0xf0] sm:$0xff] }
 0x2a9   : > { %3148 = vst.msk [vmem:[#allocation2 + $0xc0] sm:$0xff] %vm203_vm2, %v3116_v53  ;;  %v3480_v60 = vadd.f32 %v3434_v20, %v3220_v54  ;;  %v3077_v2 = vpop.f32.mrf.mxu3 }
 0x2aa   : > { %v3866_v62 = vpack.c.bf16 %v3834_v39, %v3834_v39  ;;  %v3543_v40 = vld [vmem:[#allocation2 + $0xb0] sm:$0xff]  ;;  %v2349_v36 = vpop.f32.mrf.mxu1 }
 0x2ab   : > { %v3579_v55 = vadd.f32 %v6061_v59, %v3543_v40  ;;  %3512 = vst.msk [vmem:[#allocation2 + $0xb8] sm:$0xff] %vm203_vm2, %v3480_v60  ;;  %v2389_v0 = vadd.f32 %v2349_v36, %v2129_v13  ;;  %v3444_v34 = vpop.f32.mrf.mxu0  ;;  %v3781_v40 = vpop.permute.xlu1 %3780 }
 0x2ac   : > { %3899 = vst.msk [vmem:[%s5829_s30 + $0x54] sm:$0xf] %vm3877_vm3, %v3866_v62  ;;  %v2493_v3 = vld [vmem:[#allocation2 + $0xd0] sm:$0xff] }
 0x2ad   : > { %v3611_v1 = vmax.f32 %v3579_v55, 0.0  ;;  %v2753_v4 = vadd.f32 %v2712_v57, %v2493_v3  ;;  %2421 = vst.msk [vmem:[#allocation2 + $0xd8] sm:$0xff] %vm203_vm2, %v2389_v0 }
 0x2ae   : > { %v2857_v6 = vld [vmem:[#allocation2 + $0xc8] sm:$0xff] }
 0x2af   : > { %v3835_v7 = vmul.f32 %v3766_v5, %v3611_v1  ;;  %v3117_v8 = vadd.f32 %v3074_v43, %v2857_v6  ;;  %2785 = vst.msk [vmem:[#allocation2 + $0xd0] sm:$0xff] %vm203_vm2, %v2753_v4  ;;  %v2133_v5 = vld [vmem:[#allocation2 + $0xf8] sm:$0xff] }
 0x2b0   : > { %v3221_v9 = vld [vmem:[#allocation2 + $0xc0] sm:$0xff]  ;;  %v2714_v11 = vpop.f32.mrf.mxu2 }
 0x2b1   : > { %v3867_v12 = vpack.c.bf16 %v3835_v7, %v3835_v7  ;;  %3149 = vst.msk [vmem:[#allocation2 + $0xc8] sm:$0xff] %vm203_vm2, %v3117_v8  ;;  %v3481_v14 = vadd.f32 %v3437_v17, %v3221_v9  ;;  %v3079_v63 = vpop.f32.mrf.mxu3 }
 0x2b2   : > { %v3544_v16 = vld [vmem:[#allocation2 + $0xb8] sm:$0xff]  ;;  %v2352_v61 = vpop.f32.mrf.mxu1 }
 0x2b3   : > { %3900 = vst.msk [vmem:[%s5829_s30 + $0x58] sm:$0xf] %vm3877_vm3, %v3867_v12  ;;  %v3580_v10 = vadd.f32 %v6061_v59, %v3544_v16  ;;  %v2390_v19 = vadd.f32 %v2352_v61, %v2130_v18 }
 0x2b4   : > { %3513 = vst.msk [vmem:[#allocation2 + $0xc0] sm:$0xff] %vm203_vm2, %v3481_v14  ;;  %v2494_v20 = vld [vmem:[#allocation2 + $0xd8] sm:$0xff]  ;;  %v3786_v14 = vpop.permute.xlu2 %3785 }
 0x2b5   : > { %v3612_v21 = vmax.f32 %v3580_v10, 0.0  ;;  %v2754_v56 = vadd.f32 %v2714_v11, %v2494_v20  ;;  %2422 = vst.msk [vmem:[#allocation2 + $0xe0] sm:$0xff] %vm203_vm2, %v2390_v19 }
 0x2b6   : > { %v2858_v15 = vld [vmem:[#allocation2 + $0xd0] sm:$0xff] }
 0x2b7   : > { %v3836_v25 = vmul.f32 %v3771_v24, %v3612_v21  ;;  %v3118_v26 = vadd.f32 %v3077_v2, %v2858_v15  ;;  %2786 = vst.msk [vmem:[#allocation2 + $0xd8] sm:$0xff] %vm203_vm2, %v2754_v56 }
 0x2b8   : > { %v3222_v28 = vld [vmem:[#allocation2 + $0xc8] sm:$0xff]  ;;  %v2717_v29 = vpop.f32.mrf.mxu2 }
 0x2b9   : > { %v3868_v30 = vpack.c.bf16 %v3836_v25, %v3836_v25  ;;  %3150 = vst.msk [vmem:[#allocation2 + $0xd0] sm:$0xff] %vm203_vm2, %v3118_v26  ;;  %v3482_v31 = vadd.f32 %v3439_v41, %v3222_v28  ;;  %v3082_v45 = vpop.f32.mrf.mxu3  ;;  %v3447_v41 = vpop.f32.mrf.mxu0 }
 0x2ba   : > { %v2354_v33 = vpop.f32.mrf.mxu1  ;;  %v3791_v28 = vpop.permute.xlu0 %3790 }
 0x2bb   : > { %3901 = vst.msk [vmem:[%s5829_s30 + $0x5c] sm:$0xf] %vm3877_vm3, %v3868_v30  ;;  %v3545_v35 = vld [vmem:[#allocation2 + $0xc0] sm:$0xff]  ;;  %v2391_v22 = vadd.f32 %v2354_v33, %v2131_v32 }
 0x2bc   : > { %v3581_v27 = vadd.f32 %v6061_v59, %v3545_v35  ;;  %3514 = vst.msk [vmem:[#allocation2 + $0xc8] sm:$0xff] %vm203_vm2, %v3482_v31  ;;  %v2495_v37 = vld [vmem:[#allocation2 + $0xe0] sm:$0xff] }
 0x2bd   : > { %v2755_v38 = vadd.f32 %v2717_v29, %v2495_v37  ;;  %2423 = vst.msk [vmem:[#allocation2 + $0xe8] sm:$0xff] %vm203_vm2, %v2391_v22 }
 0x2be   : > { %v3613_v43 = vmax.f32 %v3581_v27, 0.0  ;;  %v2859_v17 = vld [vmem:[#allocation2 + $0xd8] sm:$0xff] }
 0x2bf   : > { %v3119_v58 = vadd.f32 %v3079_v63, %v2859_v17  ;;  %2787 = vst.msk [vmem:[#allocation2 + $0xe0] sm:$0xff] %vm203_vm2, %v2755_v38  ;;  %v3796_v17 = vpop.permute.xlu1 %3795 }
 0x2c0   : > { %v3837_v44 = vmul.f32 %v3776_v42, %v3613_v43  ;;  %v3223_v46 = vld [vmem:[#allocation2 + $0xd0] sm:$0xff]  ;;  %v2719_v47 = vpop.f32.mrf.mxu2 }
 0x2c1   : > { %3151 = vst.msk [vmem:[#allocation2 + $0xd8] sm:$0xff] %vm203_vm2, %v3119_v58  ;;  %v3483_v49 = vadd.f32 %v3442_v23, %v3223_v46  ;;  %v3084_v2 = vpop.f32.mrf.mxu3  ;;  %v3449_v63 = vpop.f32.mrf.mxu0 }
 0x2c2   : > { %v3869_v48 = vpack.c.bf16 %v3837_v44, %v3837_v44  ;;  %v2357_v51 = vpop.f32.mrf.mxu1 }
 0x2c3   : > { %v3546_v52 = vld [vmem:[#allocation2 + $0xc8] sm:$0xff]  ;;  %3515 = vst.msk [vmem:[#allocation2 + $0xd0] sm:$0xff] %vm203_vm2, %v3483_v49  ;;  %v2392_v53 = vadd.f32 %v2357_v51, %v2132_v50  ;;  %v3801_v50 = vpop.permute.xlu2 %3800 }
 0x2c4   : > { %3902 = vst.msk [vmem:[%s5829_s30 + $0x60] sm:$0xf] %vm3877_vm3, %v3869_v48  ;;  %v3582_v39 = vadd.f32 %v6061_v59, %v3546_v52  ;;  %v2496_v54 = vld [vmem:[#allocation2 + $0xe8] sm:$0xff] }
 0x2c5   : > { %v2756_v57 = vadd.f32 %v2719_v47, %v2496_v54  ;;  %2424 = vst.msk [vmem:[#allocation2 + $0xf0] sm:$0xff] %vm203_vm2, %v2392_v53 }
 0x2c6   : > { %v3614_v60 = vmax.f32 %v3582_v39, 0.0  ;;  %v2860_v62 = vld [vmem:[#allocation2 + $0xe0] sm:$0xff] }
 0x2c7   : > { %v3120_v13 = vadd.f32 %v3082_v45, %v2860_v62  ;;  %2788 = vst.msk [vmem:[#allocation2 + $0xe8] sm:$0xff] %vm203_vm2, %v2756_v57 }
 0x2c8   : > { %v3838_v36 = vmul.f32 %v3781_v40, %v3614_v60  ;;  %v3224_v55 = vld [vmem:[#allocation2 + $0xd8] sm:$0xff]  ;;  %v2722_v4 = vpop.f32.mrf.mxu2  ;;  %v3806_v40 = vpop.permute.xlu0 %3805 }
 0x2c9   : > { %3152 = vst.msk [vmem:[#allocation2 + $0xe0] sm:$0xff] %vm203_vm2, %v3120_v13  ;;  %v3484_v0 = vadd.f32 %v3444_v34, %v3224_v55  ;;  %v3087_v23 = vpop.f32.mrf.mxu3  ;;  %v3452_v43 = vpop.f32.mrf.mxu0 }
 0x2ca   : > { %v3870_v3 = vpack.c.bf16 %v3838_v36, %v3838_v36  ;;  %v3547_v1 = vld [vmem:[#allocation2 + $0xd0] sm:$0xff]  ;;  %v2359_v6 = vpop.f32.mrf.mxu1 }
 0x2cb   : > { %v3583_v7 = vadd.f32 %v6061_v59, %v3547_v1  ;;  %3516 = vst.msk [vmem:[#allocation2 + $0xd8] sm:$0xff] %vm203_vm2, %v3484_v0  ;;  %v2393_v8 = vadd.f32 %v2359_v6, %v2133_v5 }
 0x2cc   : > { %3903 = vst.msk [vmem:[%s5829_s30 + $0x64] sm:$0xf] %vm3877_vm3, %v3870_v3  ;;  %v2497_v9 = vld [vmem:[#allocation2 + $0xf0] sm:$0xff] }
 0x2cd   : > { %v3615_v11 = vmax.f32 %v3583_v7, 0.0  ;;  %v2757_v12 = vadd.f32 %v2722_v4, %v2497_v9  ;;  %2425 = vst.msk [vmem:[#allocation2 + $0xf8] sm:$0xff] %vm203_vm2, %v2393_v8 }
 0x2ce   : > { %v2861_v16 = vld [vmem:[#allocation2 + $0xe8] sm:$0xff] }
 0x2cf   : > { %v3839_v18 = vmul.f32 %v3786_v14, %v3615_v11  ;;  %v3121_v61 = vadd.f32 %v3084_v2, %v2861_v16  ;;  %2789 = vst.msk [vmem:[#allocation2 + $0xf0] sm:$0xff] %vm203_vm2, %v2757_v12 }
 0x2d0   : > { %v3225_v10 = vld [vmem:[#allocation2 + $0xe0] sm:$0xff]  ;;  %v2724_v15 = vpop.f32.mrf.mxu2 }
 0x2d1   : > { %v3871_v19 = vpack.c.bf16 %v3839_v18, %v3839_v18  ;;  %3153 = vst.msk [vmem:[#allocation2 + $0xe8] sm:$0xff] %vm203_vm2, %v3121_v61  ;;  %v3485_v20 = vadd.f32 %v3447_v41, %v3225_v10  ;;  %v3089_v42 = vpop.f32.mrf.mxu3  ;;  %v3454_v53 = vpop.f32.mrf.mxu0 }
 0x2d2   : > { %v3548_v21 = vld [vmem:[#allocation2 + $0xd8] sm:$0xff]  ;;  %v3811_v41 = vpop.permute.xlu1 %3810 }
 0x2d3   : > { %3904 = vst.msk [vmem:[%s5829_s30 + $0x68] sm:$0xf] %vm3877_vm3, %v3871_v19  ;;  %v3584_v56 = vadd.f32 %v6061_v59, %v3548_v21 }
 0x2d4   : > { %3517 = vst.msk [vmem:[#allocation2 + $0xe0] sm:$0xff] %vm203_vm2, %v3485_v20  ;;  %v2498_v24 = vld [vmem:[#allocation2 + $0xf8] sm:$0xff] }
 0x2d5   : > { %v3616_v25 = vmax.f32 %v3584_v56, 0.0  ;;  %v2758_v26 = vadd.f32 %v2724_v15, %v2498_v24 }
 0x2d6   : > { %v2862_v29 = vld [vmem:[#allocation2 + $0xf0] sm:$0xff] }
 0x2d7   : > { %v3840_v30 = vmul.f32 %v3791_v28, %v3616_v25  ;;  %v3122_v31 = vadd.f32 %v3087_v23, %v2862_v29  ;;  %2790 = vst.msk [vmem:[#allocation2 + $0xf8] sm:$0xff] %vm203_vm2, %v2758_v26 }
 0x2d8   : > { %v3226_v32 = vld [vmem:[#allocation2 + $0xe8] sm:$0xff] }
 0x2d9   : > { %v3872_v33 = vpack.c.bf16 %v3840_v30, %v3840_v30  ;;  %3154 = vst.msk [vmem:[#allocation2 + $0xf0] sm:$0xff] %vm203_vm2, %v3122_v31  ;;  %v3486_v35 = vadd.f32 %v3449_v63, %v3226_v32 }
 0x2db   : > { %3905 = vst.msk [vmem:[%s5829_s30 + $0x6c] sm:$0xf] %vm3877_vm3, %v3872_v33  ;;  %v3549_v22 = vld [vmem:[#allocation2 + $0xe0] sm:$0xff] }
 0x2dc   : > { %v3585_v27 = vadd.f32 %v6061_v59, %v3549_v22  ;;  %3518 = vst.msk [vmem:[#allocation2 + $0xe8] sm:$0xff] %vm203_vm2, %v3486_v35 }
 0x2de   : > { %v3617_v37 = vmax.f32 %v3585_v27, 0.0  ;;  %v2863_v38 = vld [vmem:[#allocation2 + $0xf8] sm:$0xff] }
 0x2df   : > { %v3123_v58 = vadd.f32 %v3089_v42, %v2863_v38 }
 0x2e0   : > { %v3841_v45 = vmul.f32 %v3796_v17, %v3617_v37  ;;  %v3227_v34 = vld [vmem:[#allocation2 + $0xf0] sm:$0xff] }
 0x2e1   : > { %3155 = vst.msk [vmem:[#allocation2 + $0xf8] sm:$0xff] %vm203_vm2, %v3123_v58  ;;  %v3487_v44 = vadd.f32 %v3452_v43, %v3227_v34 }
 0x2e2   : > { %v3873_v46 = vpack.c.bf16 %v3841_v45, %v3841_v45 }
 0x2e3   : > { %v3550_v47 = vld [vmem:[#allocation2 + $0xe8] sm:$0xff]  ;;  %3519 = vst.msk [vmem:[#allocation2 + $0xf0] sm:$0xff] %vm203_vm2, %v3487_v44 }
 0x2e4   : > { %3906 = vst.msk [vmem:[%s5829_s30 + $0x70] sm:$0xf] %vm3877_vm3, %v3873_v46  ;;  %v3586_v49 = vadd.f32 %v6061_v59, %v3550_v47 }
 0x2e6   : > { %v3618_v48 = vmax.f32 %v3586_v49, 0.0 }
 0x2e8   : > { %v3842_v51 = vmul.f32 %v3801_v50, %v3618_v48  ;;  %v3228_v52 = vld [vmem:[#allocation2 + $0xf8] sm:$0xff] }
 0x2e9   : > { %v3488_v39 = vadd.f32 %v3454_v53, %v3228_v52 }
 0x2ea   : > { %v3874_v54 = vpack.c.bf16 %v3842_v51, %v3842_v51  ;;  %v3551_v57 = vld [vmem:[#allocation2 + $0xf0] sm:$0xff] }
 0x2eb   : > { %v3587_v60 = vadd.f32 %v6061_v59, %v3551_v57  ;;  %3520 = vst.msk [vmem:[#allocation2 + $0xf8] sm:$0xff] %vm203_vm2, %v3488_v39 }
 0x2ec   : > { %3907 = vst.msk [vmem:[%s5829_s30 + $0x74] sm:$0xf] %vm3877_vm3, %v3874_v54 }
 0x2ed   : > { %v3619_v62 = vmax.f32 %v3587_v60, 0.0 }
 0x2ef   : > { %v3843_v13 = vmul.f32 %v3806_v40, %v3619_v62 }
 0x2f1   : > { %v3875_v36 = vpack.c.bf16 %v3843_v13, %v3843_v13 }
 0x2f2   : > { %v3552_v55 = vld [vmem:[#allocation2 + $0xf8] sm:$0xff] }
 0x2f3   : > { %3908 = vst.msk [vmem:[%s5829_s30 + $0x78] sm:$0xf] %vm3877_vm3, %v3875_v36  ;;  %v3588_v0 = vadd.f32 %v6061_v59, %v3552_v55 }
 0x2f5   : > { %v3620_v2 = vmax.f32 %v3588_v0, 0.0 }
 0x2f7   : > { %v3844_v3 = vmul.f32 %v3811_v41, %v3620_v2 }
 0x2f9   : > { %v3876_v1 = vpack.c.bf16 %v3844_v3, %v3844_v3 }
 0x2fb   : > { %3909 = vst.msk [vmem:[%s5829_s30 + $0x7c] sm:$0xf] %vm3877_vm3, %v3876_v1 }
 0x2fc PF: > { %s14_s15 = sadd.s32 1, %s5017_s15  }
 0x2fd   : > { %p11_p8 = scmp.ge.s32.totalorder %s14_s15, 131  }
 0x2ff   :  { %13 = sbr.rel (!%p11_p8) target bundleno = 1 (0x1), region = 83 }

</bundles_post_ra>
